<compile_context>
chip_gen: v6e
topology: v6e:2x2x1
jax: 0.10.0
libtpu: 0.0.40
codegen_flags: <defaults>
</compile_context>

<pallas_src>
import jax
import jax.numpy as jnp
from jax.experimental import pallas as pl
from jax.experimental.pallas import tpu as pltpu

IMAGE_SIZE = 28
IN_DIM = IMAGE_SIZE * IMAGE_SIZE          # 784  (hard-coded by x.view(-1, 784))
IN_PAD = 896                              # 7 * 128 : lane-dense feature dim
ENC_HIDDEN = 400
LATENT = 20
LATENT_PAD = 128                          # lane-dense latent dim
DEC_HIDDEN = 400

COMPUTE_DTYPE = jnp.bfloat16              # MXU input dtype (f32 accumulation)


def _vae_kernel(x_ref, eps_ref,
                w1_ref, b1_ref, w2_ref, b2_ref, w3_ref, b3_ref, w4_ref, b4_ref,
                recon_ref, mu_ref, logvar_ref):
    cdt = w1_ref.dtype

    # ---- encode: h1 = relu(x @ W1 + b1) ---------------------------------
    x = x_ref[...]                                              # (TB, 896) f32
    h1 = jnp.dot(x.astype(cdt), w1_ref[...],
                 preferred_element_type=jnp.float32) + b1_ref[...]
    h1 = jnp.maximum(h1, 0.0)

    # ---- fused mu / logvar projection: one (400, 256) matmul ------------
    mv = jnp.dot(h1.astype(cdt), w2_ref[...],
                 preferred_element_type=jnp.float32) + b2_ref[...]
    mu = mv[:, :LATENT_PAD]                                     # lane-group aligned
    logvar = mv[:, LATENT_PAD:]

    # ---- reparameterize (training semantics, eps supplied) --------------
    std = jnp.exp(0.5 * logvar)
    z = eps_ref[...] * std + mu

    # ---- decode: sigmoid(relu(z @ W3 + b3) @ W4 + b4) --------------------
    h3 = jnp.dot(z.astype(cdt), w3_ref[...],
                 preferred_element_type=jnp.float32) + b3_ref[...]
    h3 = jnp.maximum(h3, 0.0)
    logits = jnp.dot(h3.astype(cdt), w4_ref[...],
                     preferred_element_type=jnp.float32) + b4_ref[...]

    recon_ref[...] = jax.nn.sigmoid(logits)
    mu_ref[...] = mu
    logvar_ref[...] = logvar


def _round_up(n, m):
    return ((n + m - 1) // m) * m


def prepare_params(params, compute_dtype=COMPUTE_DTYPE):
    """Pad to lane-dense shapes, fuse fc21/fc22, cast matmul weights to bf16."""
    f32 = jnp.float32
    w1 = jnp.zeros((IN_PAD, ENC_HIDDEN), f32).at[:IN_DIM, :].set(params["w1"])
    w2 = (jnp.zeros((ENC_HIDDEN, 2 * LATENT_PAD), f32)
          .at[:, :LATENT].set(params["w21"])
          .at[:, LATENT_PAD:LATENT_PAD + LATENT].set(params["w22"]))
    b2 = (jnp.zeros((1, 2 * LATENT_PAD), f32)
          .at[:, :LATENT].set(params["b21"].reshape(1, LATENT))
          .at[:, LATENT_PAD:LATENT_PAD + LATENT].set(params["b22"].reshape(1, LATENT)))
    w3 = jnp.zeros((LATENT_PAD, DEC_HIDDEN), f32).at[:LATENT, :].set(params["w3"])
    w4 = jnp.zeros((DEC_HIDDEN, IN_PAD), f32).at[:, :IN_DIM].set(params["w4"])
    b4 = jnp.zeros((1, IN_PAD), f32).at[:, :IN_DIM].set(params["b4"].reshape(1, IN_DIM))
    return dict(
        w1=w1.astype(compute_dtype),
        b1=params["b1"].reshape(1, ENC_HIDDEN).astype(f32),   # biases stay f32
        w2=w2.astype(compute_dtype),
        b2=b2,
        w3=w3.astype(compute_dtype),
        b3=params["b3"].reshape(1, DEC_HIDDEN).astype(f32),
        w4=w4.astype(compute_dtype),
        b4=b4,
    )


@jax.jit
def vae_forward(x, eps, prep):
    """x: (B,1,28,28) or (B,784); eps: (B,20). Returns (recon, mu, logvar)."""
    x2d = x.reshape(-1, IN_DIM).astype(jnp.float32)             # x.view(-1, 784)
    B = x2d.shape[0]

    tile_b = min(256, _round_up(B, 128))                        # M >= 128 for MXU
    b_pad = _round_up(B, tile_b)
    grid = (b_pad // tile_b,)

    x_p = jnp.zeros((b_pad, IN_PAD), jnp.float32).at[:B, :IN_DIM].set(x2d)
    eps_p = jnp.zeros((b_pad, LATENT_PAD), jnp.float32).at[:B, :LATENT].set(
        eps.astype(jnp.float32))

    # Activation tiles: advance along batch with the grid (double-buffered).
    row_spec = lambda n: pl.BlockSpec((tile_b, n), lambda i: (i, 0))
    # Weights/biases: constant index_map -> DMA'd once, VMEM-resident.
    res_spec = lambda shape: pl.BlockSpec(shape, lambda i: (0, 0))

    recon_p, mu_p, lv_p = pl.pallas_call(
        _vae_kernel,
        grid=grid,
        out_shape=(
            jax.ShapeDtypeStruct((b_pad, IN_PAD), jnp.float32),      # recon
            jax.ShapeDtypeStruct((b_pad, LATENT_PAD), jnp.float32),  # mu
            jax.ShapeDtypeStruct((b_pad, LATENT_PAD), jnp.float32),  # logvar
        ),
        in_specs=[
            row_spec(IN_PAD),                               # x
            row_spec(LATENT_PAD),                           # eps
            res_spec((IN_PAD, ENC_HIDDEN)),                 # w1
            res_spec((1, ENC_HIDDEN)),                      # b1
            res_spec((ENC_HIDDEN, 2 * LATENT_PAD)),         # w2 (fused fc21|fc22)
            res_spec((1, 2 * LATENT_PAD)),                  # b2
            res_spec((LATENT_PAD, DEC_HIDDEN)),             # w3
            res_spec((1, DEC_HIDDEN)),                      # b3
            res_spec((DEC_HIDDEN, IN_PAD)),                 # w4
            res_spec((1, IN_PAD)),                          # b4
        ],
        out_specs=(row_spec(IN_PAD), row_spec(LATENT_PAD), row_spec(LATENT_PAD)),
        compiler_params=pltpu.CompilerParams(
            dimension_semantics=("parallel",),              # v7x: use both TCs
            vmem_limit_bytes=24 * 1024 * 1024,              # sized to usage, not 64 MiB
        ),
    )(x_p, eps_p, prep["w1"], prep["b1"], prep["w2"], prep["b2"],
      prep["w3"], prep["b3"], prep["w4"], prep["b4"])

    return recon_p[:B, :IN_DIM], mu_p[:B, :LATENT], lv_p[:B, :LATENT]


def init_params(key):
    """Deterministic init mirroring PyTorch nn.Linear default (U[-1/sqrt(fan_in), +])."""
    def linear(k, fan_in, fan_out):
        kw, kb = jax.random.split(k)
        bound = 1.0 / jnp.sqrt(fan_in)
        w = jax.random.uniform(kw, (fan_in, fan_out), jnp.float32, -bound, bound)
        b = jax.random.uniform(kb, (1, fan_out), jnp.float32, -bound, bound)
        return w, b

    k1, k21, k22, k3, k4 = jax.random.split(key, 5)
    w1, b1 = linear(k1, IN_DIM, ENC_HIDDEN)
    w21, b21 = linear(k21, ENC_HIDDEN, LATENT)
    w22, b22 = linear(k22, ENC_HIDDEN, LATENT)
    w3, b3 = linear(k3, LATENT, DEC_HIDDEN)
    w4, b4 = linear(k4, DEC_HIDDEN, IN_DIM)
    return dict(w1=w1, b1=b1, w21=w21, b21=b21, w22=w22, b22=b22,
                w3=w3, b3=b3, w4=w4, b4=b4)


def vae_forward_ref(x, eps, params):
    """Pure-JAX f32 reference for validation."""
    x2d = x.reshape(-1, IN_DIM).astype(jnp.float32)
    h1 = jnp.maximum(x2d @ params["w1"] + params["b1"], 0.0)
    mu = h1 @ params["w21"] + params["b21"]
    logvar = h1 @ params["w22"] + params["b22"]
    z = mu + eps * jnp.exp(0.5 * logvar)
    h3 = jnp.maximum(z @ params["w3"] + params["b3"], 0.0)
    recon = jax.nn.sigmoid(h3 @ params["w4"] + params["b4"])
    return recon, mu, logvar


if __name__ == "__main__":
    key = jax.random.PRNGKey(0)
    kp, kx1, ke1, kx2, ke2 = jax.random.split(key, 5)

    params = init_params(kp)
    prep = prepare_params(params)

    def check(B, kx, ke):
        x = jax.random.uniform(kx, (B, 1, IMAGE_SIZE, IMAGE_SIZE), jnp.float32)
        eps = jax.random.normal(ke, (B, LATENT), jnp.float32)
        recon, mu, logvar = jax.block_until_ready(vae_forward(x, eps, prep))
        r_ref, m_ref, lv_ref = vae_forward_ref(x, eps, params)
        assert recon.shape == (B, IN_DIM)
        assert mu.shape == (B, LATENT) and logvar.shape == (B, LATENT)
        # bf16 matmul weights -> relaxed tolerance vs. the pure-f32 reference.
        assert jnp.allclose(recon, r_ref, atol=3e-2, rtol=3e-2)
        assert jnp.allclose(mu, m_ref, atol=3e-2, rtol=3e-2)
        assert jnp.allclose(logvar, lv_ref, atol=3e-2, rtol=3e-2)

    check(8, kx1, ke1)      # small demo batch (single tile, padded to 128 rows)
    check(300, kx2, ke2)    # exercises the batch grid: 2 tiles of 256 rows

    print("KERNEL_OK")
</pallas_src>

<mosaic_0001>
module attributes {stable_mosaic.version = 11 : i64} {
  func.func @_vae_kernel(%arg0: i32, %arg1: memref<128x896xf32, #tpu.memory_space<vmem>>, %arg2: memref<128x128xf32, #tpu.memory_space<vmem>>, %arg3: memref<896x400xbf16, #tpu.memory_space<vmem>>, %arg4: memref<1x400xf32, #tpu.memory_space<vmem>>, %arg5: memref<400x256xbf16, #tpu.memory_space<vmem>>, %arg6: memref<1x256xf32, #tpu.memory_space<vmem>>, %arg7: memref<128x400xbf16, #tpu.memory_space<vmem>>, %arg8: memref<1x400xf32, #tpu.memory_space<vmem>>, %arg9: memref<400x896xbf16, #tpu.memory_space<vmem>>, %arg10: memref<1x896xf32, #tpu.memory_space<vmem>>, %arg11: memref<128x896xf32, #tpu.memory_space<vmem>>, %arg12: memref<128x128xf32, #tpu.memory_space<vmem>>, %arg13: memref<128x128xf32, #tpu.memory_space<vmem>>) attributes {dimension_semantics = [#tpu.dimension_semantics<parallel>], iteration_bounds = array<i64: 1>, scalar_prefetch = 0 : i64, scratch_operands = 0 : i64, tpu.core_type = #tpu.core_type<tc>, window_params = [{transform_indices = @transform_0, window_bounds = array<i64: 128, 896>}, {transform_indices = @transform_1, window_bounds = array<i64: 128, 128>}, {pipeline_mode = #tpu.pipeline_mode<synchronous>, transform_indices = @transform_2, window_bounds = array<i64: 896, 400>}, {pipeline_mode = #tpu.pipeline_mode<synchronous>, transform_indices = @transform_3, window_bounds = array<i64: 1, 400>}, {pipeline_mode = #tpu.pipeline_mode<synchronous>, transform_indices = @transform_4, window_bounds = array<i64: 400, 256>}, {pipeline_mode = #tpu.pipeline_mode<synchronous>, transform_indices = @transform_5, window_bounds = array<i64: 1, 256>}, {pipeline_mode = #tpu.pipeline_mode<synchronous>, transform_indices = @transform_6, window_bounds = array<i64: 128, 400>}, {pipeline_mode = #tpu.pipeline_mode<synchronous>, transform_indices = @transform_7, window_bounds = array<i64: 1, 400>}, {pipeline_mode = #tpu.pipeline_mode<synchronous>, transform_indices = @transform_8, window_bounds = array<i64: 400, 896>}, {pipeline_mode = #tpu.pipeline_mode<synchronous>, transform_indices = @transform_9, window_bounds = array<i64: 1, 896>}, {transform_indices = @transform_10, window_bounds = array<i64: 128, 896>}, {transform_indices = @transform_11, window_bounds = array<i64: 128, 128>}, {transform_indices = @transform_12, window_bounds = array<i64: 128, 128>}]} {
    %c0 = arith.constant 0 : index
    %c0_0 = arith.constant 0 : index
    %0 = vector.load %arg1[%c0, %c0_0] : memref<128x896xf32, #tpu.memory_space<vmem>>, vector<128x896xf32>
    %1 = arith.truncf %0 : vector<128x896xf32> to vector<128x896xbf16>
    %c0_1 = arith.constant 0 : index
    %c0_2 = arith.constant 0 : index
    %2 = vector.load %arg3[%c0_1, %c0_2] : memref<896x400xbf16, #tpu.memory_space<vmem>>, vector<896x400xbf16>
    %cst = arith.constant dense<0.000000e+00> : vector<128x400xf32>
    %3 = tpu.matmul %1, %2, %cst {dimension_numbers = #tpu.dot_dimension_numbers<[1], [0], [0], [1], [0, 0, 1, 1], [], []>} : vector<128x896xbf16>, vector<896x400xbf16>, vector<128x400xf32> -> vector<128x400xf32>
    %c0_3 = arith.constant 0 : index
    %c0_4 = arith.constant 0 : index
    %4 = vector.load %arg4[%c0_3, %c0_4] : memref<1x400xf32, #tpu.memory_space<vmem>>, vector<1x400xf32>
    %5 = vector.broadcast %4 : vector<1x400xf32> to vector<128x400xf32>
    %6 = arith.addf %3, %5 : vector<128x400xf32>
    %cst_5 = arith.constant 0.000000e+00 : f32
    %7 = vector.broadcast %cst_5 : f32 to vector<128x400xf32>
    %8 = arith.maximumf %6, %7 : vector<128x400xf32>
    %9 = arith.truncf %8 : vector<128x400xf32> to vector<128x400xbf16>
    %c0_6 = arith.constant 0 : index
    %c0_7 = arith.constant 0 : index
    %10 = vector.load %arg5[%c0_6, %c0_7] : memref<400x256xbf16, #tpu.memory_space<vmem>>, vector<400x256xbf16>
    %cst_8 = arith.constant dense<0.000000e+00> : vector<128x256xf32>
    %11 = tpu.matmul %9, %10, %cst_8 {dimension_numbers = #tpu.dot_dimension_numbers<[1], [0], [0], [1], [0, 0, 1, 1], [], []>} : vector<128x400xbf16>, vector<400x256xbf16>, vector<128x256xf32> -> vector<128x256xf32>
    %c0_9 = arith.constant 0 : index
    %c0_10 = arith.constant 0 : index
    %12 = vector.load %arg6[%c0_9, %c0_10] : memref<1x256xf32, #tpu.memory_space<vmem>>, vector<1x256xf32>
    %13 = vector.broadcast %12 : vector<1x256xf32> to vector<128x256xf32>
    %14 = arith.addf %11, %13 : vector<128x256xf32>
    %15 = vector.extract_strided_slice %14 {offsets = [0, 0], sizes = [128, 128], strides = [1, 1]} : vector<128x256xf32> to vector<128x128xf32>
    %16 = vector.extract_strided_slice %14 {offsets = [0, 128], sizes = [128, 128], strides = [1, 1]} : vector<128x256xf32> to vector<128x128xf32>
    %cst_11 = arith.constant 5.000000e-01 : f32
    %17 = vector.broadcast %cst_11 : f32 to vector<128x128xf32>
    %18 = arith.mulf %17, %16 : vector<128x128xf32>
    %19 = math.exp %18 : vector<128x128xf32>
    %c0_12 = arith.constant 0 : index
    %c0_13 = arith.constant 0 : index
    %20 = vector.load %arg2[%c0_12, %c0_13] : memref<128x128xf32, #tpu.memory_space<vmem>>, vector<128x128xf32>
    %21 = arith.mulf %20, %19 : vector<128x128xf32>
    %22 = arith.addf %21, %15 : vector<128x128xf32>
    %23 = arith.truncf %22 : vector<128x128xf32> to vector<128x128xbf16>
    %c0_14 = arith.constant 0 : index
    %c0_15 = arith.constant 0 : index
    %24 = vector.load %arg7[%c0_14, %c0_15] : memref<128x400xbf16, #tpu.memory_space<vmem>>, vector<128x400xbf16>
    %cst_16 = arith.constant dense<0.000000e+00> : vector<128x400xf32>
    %25 = tpu.matmul %23, %24, %cst_16 {dimension_numbers = #tpu.dot_dimension_numbers<[1], [0], [0], [1], [0, 0, 1, 1], [], []>} : vector<128x128xbf16>, vector<128x400xbf16>, vector<128x400xf32> -> vector<128x400xf32>
    %c0_17 = arith.constant 0 : index
    %c0_18 = arith.constant 0 : index
    %26 = vector.load %arg8[%c0_17, %c0_18] : memref<1x400xf32, #tpu.memory_space<vmem>>, vector<1x400xf32>
    %27 = vector.broadcast %26 : vector<1x400xf32> to vector<128x400xf32>
    %28 = arith.addf %25, %27 : vector<128x400xf32>
    %cst_19 = arith.constant 0.000000e+00 : f32
    %29 = vector.broadcast %cst_19 : f32 to vector<128x400xf32>
    %30 = arith.maximumf %28, %29 : vector<128x400xf32>
    %31 = arith.truncf %30 : vector<128x400xf32> to vector<128x400xbf16>
    %c0_20 = arith.constant 0 : index
    %c0_21 = arith.constant 0 : index
    %32 = vector.load %arg9[%c0_20, %c0_21] : memref<400x896xbf16, #tpu.memory_space<vmem>>, vector<400x896xbf16>
    %cst_22 = arith.constant dense<0.000000e+00> : vector<128x896xf32>
    %33 = tpu.matmul %31, %32, %cst_22 {dimension_numbers = #tpu.dot_dimension_numbers<[1], [0], [0], [1], [0, 0, 1, 1], [], []>} : vector<128x400xbf16>, vector<400x896xbf16>, vector<128x896xf32> -> vector<128x896xf32>
    %c0_23 = arith.constant 0 : index
    %c0_24 = arith.constant 0 : index
    %34 = vector.load %arg10[%c0_23, %c0_24] : memref<1x896xf32, #tpu.memory_space<vmem>>, vector<1x896xf32>
    %35 = vector.broadcast %34 : vector<1x896xf32> to vector<128x896xf32>
    %36 = arith.addf %33, %35 : vector<128x896xf32>
    %37 = arith.negf %36 : vector<128x896xf32>
    %38 = math.exp %37 : vector<128x896xf32>
    %cst_25 = arith.constant 1.000000e+00 : f32
    %39 = vector.broadcast %cst_25 : f32 to vector<128x896xf32>
    %40 = arith.addf %39, %38 : vector<128x896xf32>
    %41 = arith.divf %39, %40 : vector<128x896xf32>
    %c0_26 = arith.constant 0 : index
    %c0_27 = arith.constant 0 : index
    %42 = vector.load %arg11[%c0_26, %c0_27] : memref<128x896xf32, #tpu.memory_space<vmem>>, vector<128x896xf32>
    tpu.vector_store %arg11[%c0_26, %c0_27], %41 {strides = array<i32>} : memref<128x896xf32, #tpu.memory_space<vmem>>, vector<128x896xf32>,
    %c0_28 = arith.constant 0 : index
    %c0_29 = arith.constant 0 : index
    %43 = vector.load %arg12[%c0_28, %c0_29] : memref<128x128xf32, #tpu.memory_space<vmem>>, vector<128x128xf32>
    tpu.vector_store %arg12[%c0_28, %c0_29], %15 {strides = array<i32>} : memref<128x128xf32, #tpu.memory_space<vmem>>, vector<128x128xf32>,
    %c0_30 = arith.constant 0 : index
    %c0_31 = arith.constant 0 : index
    %44 = vector.load %arg13[%c0_30, %c0_31] : memref<128x128xf32, #tpu.memory_space<vmem>>, vector<128x128xf32>
    tpu.vector_store %arg13[%c0_30, %c0_31], %16 {strides = array<i32>} : memref<128x128xf32, #tpu.memory_space<vmem>>, vector<128x128xf32>,
    return
  }
  func.func @transform_0(%arg0: i32) -> (i32, i32) {
    %c0_i32 = arith.constant 0 : i32
    %c0_i32_0 = arith.constant 0 : i32
    return %arg0, %c0_i32 : i32, i32
  }
  func.func @transform_1(%arg0: i32) -> (i32, i32) {
    %c0_i32 = arith.constant 0 : i32
    %c0_i32_0 = arith.constant 0 : i32
    return %arg0, %c0_i32 : i32, i32
  }
  func.func @transform_2(%arg0: i32) -> (i32, i32) {
    %c0_i32 = arith.constant 0 : i32
    %c0_i32_0 = arith.constant 0 : i32
    %c0_i32_1 = arith.constant 0 : i32
    return %c0_i32, %c0_i32_0 : i32, i32
  }
  func.func @transform_3(%arg0: i32) -> (i32, i32) {
    %c0_i32 = arith.constant 0 : i32
    %c0_i32_0 = arith.constant 0 : i32
    %c0_i32_1 = arith.constant 0 : i32
    return %c0_i32, %c0_i32_0 : i32, i32
  }
  func.func @transform_4(%arg0: i32) -> (i32, i32) {
    %c0_i32 = arith.constant 0 : i32
    %c0_i32_0 = arith.constant 0 : i32
    %c0_i32_1 = arith.constant 0 : i32
    return %c0_i32, %c0_i32_0 : i32, i32
  }
  func.func @transform_5(%arg0: i32) -> (i32, i32) {
    %c0_i32 = arith.constant 0 : i32
    %c0_i32_0 = arith.constant 0 : i32
    %c0_i32_1 = arith.constant 0 : i32
    return %c0_i32, %c0_i32_0 : i32, i32
  }
  func.func @transform_6(%arg0: i32) -> (i32, i32) {
    %c0_i32 = arith.constant 0 : i32
    %c0_i32_0 = arith.constant 0 : i32
    %c0_i32_1 = arith.constant 0 : i32
    return %c0_i32, %c0_i32_0 : i32, i32
  }
  func.func @transform_7(%arg0: i32) -> (i32, i32) {
    %c0_i32 = arith.constant 0 : i32
    %c0_i32_0 = arith.constant 0 : i32
    %c0_i32_1 = arith.constant 0 : i32
    return %c0_i32, %c0_i32_0 : i32, i32
  }
  func.func @transform_8(%arg0: i32) -> (i32, i32) {
    %c0_i32 = arith.constant 0 : i32
    %c0_i32_0 = arith.constant 0 : i32
    %c0_i32_1 = arith.constant 0 : i32
    return %c0_i32, %c0_i32_0 : i32, i32
  }
  func.func @transform_9(%arg0: i32) -> (i32, i32) {
    %c0_i32 = arith.constant 0 : i32
    %c0_i32_0 = arith.constant 0 : i32
    %c0_i32_1 = arith.constant 0 : i32
    return %c0_i32, %c0_i32_0 : i32, i32
  }
  func.func @transform_10(%arg0: i32) -> (i32, i32) {
    %c0_i32 = arith.constant 0 : i32
    %c0_i32_0 = arith.constant 0 : i32
    return %arg0, %c0_i32 : i32, i32
  }
  func.func @transform_11(%arg0: i32) -> (i32, i32) {
    %c0_i32 = arith.constant 0 : i32
    %c0_i32_0 = arith.constant 0 : i32
    return %arg0, %c0_i32 : i32, i32
  }
  func.func @transform_12(%arg0: i32) -> (i32, i32) {
    %c0_i32 = arith.constant 0 : i32
    %c0_i32_0 = arith.constant 0 : i32
    return %arg0, %c0_i32 : i32, i32
  }
}

</mosaic_0001>

<bundles_post_ra>
// kernel: vae_forward.1
= control target key start
LH: loop header
LB: loop body
LE: loop exit
PB: predicated region body
PF: predicated region fallthrough
CT: control target
= control target key end

     0   :  { %vm2885_vm0 = vcmask 130048   ;;  %s12122_s2 = inlined_call_operand.vmem [shape: bf16[896,400], index: 2, kind: input, shape index: {}]   ;;  %s12123_s0 = inlined_call_operand.vmem [shape: f32[128,896], index: 0, kind: input, shape index: {}]   ;;  %s12124_s4 = inlined_call_operand.vmem [shape: bf16[400,256], index: 4, kind: input, shape index: {}]   ;;  %s12125_s3 = inlined_call_operand.vmem [shape: f32[1,400], index: 3, kind: input, shape index: {}]   ;;  %s12126_s6 = inlined_call_operand.vmem [shape: bf16[128,400], index: 6, kind: input, shape index: {}]   ;;  %s12127_s8 = inlined_call_operand.vmem [shape: bf16[400,896], index: 8, kind: input, shape index: {}]   ;;  %s12128_s5 = inlined_call_operand.vmem [shape: f32[1,256], index: 5, kind: input, shape index: {}]   ;;  %s12129_s11 = inlined_call_operand.vmem [shape: f32[128,128], index: 11, kind: output, shape index: {1}]   ;;  %s12130_s12 = inlined_call_operand.vmem [shape: f32[128,128], index: 12, kind: output, shape index: {2}]   ;;  %s12131_s1 = inlined_call_operand.vmem [shape: f32[128,128], index: 1, kind: input, shape index: {}]   ;;  %s12132_s7 = inlined_call_operand.vmem [shape: f32[1,400], index: 7, kind: input, shape index: {}]   ;;  %s12133_s9 = inlined_call_operand.vmem [shape: f32[1,896], index: 9, kind: input, shape index: {}]   ;;  %s12134_s10 = inlined_call_operand.vmem [shape: f32[128,896], index: 10, kind: output, shape index: {0}]  }
   0x1   :  { %v7335_v0 = vld [vmem:[%s12122_s2 + $0xe4] ss:$16 sps:$4 sm:$0xff]   ;;  %v7339_v2 = vld [vmem:[%s12122_s2 + $0xe0] ss:$16 sps:$4 sm:$0xff]   ;;  %v40_v46 = vld [vmem:[%s12123_s0 + $0x8] sm:$0xff] }
   0x2   :  { %v7337_v1 = vld [vmem:[%s12122_s2 + $0x2e4] ss:$16 sps:$4 sm:$0xff]   ;;  %1573 = vmatprep.subr.bf16.mxu0 %v7335_v0  ;;  %v7340_v3 = vld [vmem:[%s12122_s2 + $0x2e0] ss:$16 sps:$4 sm:$0xff]   ;;  %v42_v48 = vld [vmem:[%s12123_s0 + $0x18] sm:$0xff] }
   0x3   :  { %1686 = vmatprep.subr.bf16.mxu1 %v7337_v1  ;;  %v7341_v4 = vld [vmem:[%s12122_s2 + $0xc4] ss:$16 sps:$4 sm:$0xff]   ;;  %1574 = vmatpush1.bf16.msra.mxu0 %v7339_v2  ;;  %v7345_v6 = vld [vmem:[%s12122_s2 + $0xc0] ss:$16 sps:$4 sm:$0xff]  }
   0x4   :  { %1687 = vmatpush1.bf16.msra.mxu1 %v7340_v3  ;;  %v7343_v5 = vld [vmem:[%s12122_s2 + $0x2c4] ss:$16 sps:$4 sm:$0xff]   ;;  %1575 = vmatprep.subr.bf16.mxu0 %v7341_v4  ;;  %v7346_v7 = vld [vmem:[%s12122_s2 + $0x2c0] ss:$16 sps:$4 sm:$0xff]  }
   0x5   :  { %1688 = vmatprep.subr.bf16.mxu1 %v7343_v5  ;;  %v7347_v8 = vld [vmem:[%s12122_s2 + $0xa4] ss:$16 sps:$4 sm:$0xff]   ;;  %v7351_v10 = vld [vmem:[%s12122_s2 + $0xa0] ss:$16 sps:$4 sm:$0xff]  }
   0x6   :  { %v7349_v9 = vld [vmem:[%s12122_s2 + $0x2a4] ss:$16 sps:$4 sm:$0xff]   ;;  %v7352_v11 = vld [vmem:[%s12122_s2 + $0x2a0] ss:$16 sps:$4 sm:$0xff]  }
   0x7   :  { %1576 = vmatpush1.bf16.msra.mxu0 %v7345_v6  ;;  %v7353_v12 = vld [vmem:[%s12122_s2 + $0x84] ss:$16 sps:$4 sm:$0xff]   ;;  %v7357_v14 = vld [vmem:[%s12122_s2 + $0x80] ss:$16 sps:$4 sm:$0xff]  }
   0x8   :  { %1689 = vmatpush1.bf16.msra.mxu1 %v7346_v7  ;;  %1577 = vmatprep.subr.bf16.mxu0 %v7347_v8  ;;  %v7355_v13 = vld [vmem:[%s12122_s2 + $0x284] ss:$16 sps:$4 sm:$0xff]   ;;  %v7358_v15 = vld [vmem:[%s12122_s2 + $0x280] ss:$16 sps:$4 sm:$0xff]   ;;  %v46_v7 = vld [vmem:[%s12123_s0 + $0x38] sm:$0xff] }
   0x9   :  { %1690 = vmatprep.subr.bf16.mxu1 %v7349_v9  ;;  %v7359_v16 = vld [vmem:[%s12122_s2 + $0x64] ss:$16 sps:$4 sm:$0xff]   ;;  %v7363_v18 = vld [vmem:[%s12122_s2 + $0x60] ss:$16 sps:$4 sm:$0xff]   ;;  %v48_v9 = vld [vmem:[%s12123_s0 + $0x48] sm:$0xff] }
   0xa   :  { %v7361_v17 = vld [vmem:[%s12122_s2 + $0x264] ss:$16 sps:$4 sm:$0xff]   ;;  %v7364_v19 = vld [vmem:[%s12122_s2 + $0x260] ss:$16 sps:$4 sm:$0xff]  }
   0xb   :  { %1578 = vmatpush1.bf16.msra.mxu0 %v7351_v10  ;;  %v7365_v20 = vld [vmem:[%s12122_s2 + $0x44] ss:$16 sps:$4 sm:$0xff]   ;;  %v7369_v22 = vld [vmem:[%s12122_s2 + $0x40] ss:$16 sps:$4 sm:$0xff]  }
   0xc   :  { %1691 = vmatpush1.bf16.msra.mxu1 %v7352_v11  ;;  %1579 = vmatprep.subr.bf16.mxu0 %v7353_v12  ;;  %v7367_v21 = vld [vmem:[%s12122_s2 + $0x244] ss:$16 sps:$4 sm:$0xff]   ;;  %v7370_v23 = vld [vmem:[%s12122_s2 + $0x240] ss:$16 sps:$4 sm:$0xff]   ;;  %v54_v12 = vld [vmem:[%s12123_s0 + $0x78] sm:$0xff] }
   0xd   :  { %1692 = vmatprep.subr.bf16.mxu1 %v7355_v13  ;;  %v7371_v24 = vld [vmem:[%s12122_s2 + $0x24] ss:$16 sps:$4 sm:$0xff]   ;;  %v7375_v26 = vld [vmem:[%s12122_s2 + $0x20] ss:$16 sps:$4 sm:$0xff]  }
   0xe   :  { %v7373_v25 = vld [vmem:[%s12122_s2 + $0x224] ss:$16 sps:$4 sm:$0xff]   ;;  %v7376_v27 = vld [vmem:[%s12122_s2 + $0x220] ss:$16 sps:$4 sm:$0xff]  }
   0xf   :  { %1580 = vmatpush1.bf16.msra.mxu0 %v7357_v14  ;;  %v7377_v28 = vld [vmem:[%s12122_s2 + $0x4] ss:$16 sps:$4 sm:$0xff]   ;;  %v7381_v30 = vld [vmem:[%s12122_s2] ss:$16 sps:$4 sm:$0xff]  }
  0x10   :  { %1693 = vmatpush1.bf16.msra.mxu1 %v7358_v15  ;;  %1581 = vmatprep.subr.bf16.mxu0 %v7359_v16  ;;  %v7379_v29 = vld [vmem:[%s12122_s2 + $0x204] ss:$16 sps:$4 sm:$0xff]   ;;  %v7382_v31 = vld [vmem:[%s12122_s2 + $0x200] ss:$16 sps:$4 sm:$0xff]   ;;  %v56_v16 = vld [vmem:[%s12123_s0 + $0x88] sm:$0xff] }
  0x11   :  { %1694 = vmatprep.subr.bf16.mxu1 %v7361_v17  ;;  %v7383_v32 = vld [vmem:[%s12122_s2 + $0x1e4] ss:$16 sps:$4 sm:$0xff]   ;;  %v7387_v34 = vld [vmem:[%s12122_s2 + $0x1e0] ss:$16 sps:$4 sm:$0xff]  }
  0x12   :  { %v7385_v33 = vld [vmem:[%s12122_s2 + $0x3e4] ss:$16 sps:$4 sm:$0xff]   ;;  %v7388_v35 = vld [vmem:[%s12122_s2 + $0x3e0] ss:$16 sps:$4 sm:$0xff]  }
  0x13   :  { %1582 = vmatpush1.bf16.msra.mxu0 %v7363_v18  ;;  %v7389_v36 = vld [vmem:[%s12122_s2 + $0x1c4] ss:$16 sps:$4 sm:$0xff]   ;;  %v7393_v38 = vld [vmem:[%s12122_s2 + $0x1c0] ss:$16 sps:$4 sm:$0xff]  }
  0x14   :  { %1695 = vmatpush1.bf16.msra.mxu1 %v7364_v19  ;;  %1583 = vmatprep.subr.bf16.mxu0 %v7365_v20  ;;  %v7391_v37 = vld [vmem:[%s12122_s2 + $0x3c4] ss:$16 sps:$4 sm:$0xff]   ;;  %v7394_v39 = vld [vmem:[%s12122_s2 + $0x3c0] ss:$16 sps:$4 sm:$0xff]  }
  0x15   :  { %1696 = vmatprep.subr.bf16.mxu1 %v7367_v21  ;;  %v7395_v40 = vld [vmem:[%s12122_s2 + $0x1a4] ss:$16 sps:$4 sm:$0xff]   ;;  %v7399_v42 = vld [vmem:[%s12122_s2 + $0x1a0] ss:$16 sps:$4 sm:$0xff]  }
  0x16   :  { %v7397_v41 = vld [vmem:[%s12122_s2 + $0x3a4] ss:$16 sps:$4 sm:$0xff]   ;;  %v7400_v43 = vld [vmem:[%s12122_s2 + $0x3a0] ss:$16 sps:$4 sm:$0xff]  }
  0x17   :  { %1584 = vmatpush1.bf16.msra.mxu0 %v7369_v22  ;;  %v7401_v44 = vld [vmem:[%s12122_s2 + $0x184] ss:$16 sps:$4 sm:$0xff]   ;;  %v7405_v50 = vld [vmem:[%s12122_s2 + $0x180] ss:$16 sps:$4 sm:$0xff]  }
  0x18   :  { %1697 = vmatpush1.bf16.msra.mxu1 %v7370_v23  ;;  %1585 = vmatprep.subr.bf16.mxu0 %v7371_v24  ;;  %v7403_v45 = vld [vmem:[%s12122_s2 + $0x384] ss:$16 sps:$4 sm:$0xff]   ;;  %v7406_v51 = vld [vmem:[%s12122_s2 + $0x380] ss:$16 sps:$4 sm:$0xff]  }
  0x19   :  { %1698 = vmatprep.subr.bf16.mxu1 %v7373_v25  ;;  %v47_v47 = vld [vmem:[%s12123_s0 + $0x40] sm:$0xff]  ;;  %v49_v49 = vld [vmem:[%s12123_s0 + $0x50] sm:$0xff]  ;;  %v60_v25 = vld [vmem:[%s12123_s0 + $0xa8] sm:$0xff] }
  0x1a   :  { %v7407_v52 = vld [vmem:[%s12122_s2 + $0x164] ss:$16 sps:$4 sm:$0xff]   ;;  %v8750_v53 = vpack.c.bf16 %v47_v47, %v40_v46  ;;  %v8752_v54 = vpack.c.bf16 %v49_v49, %v42_v48  ;;  %v7411_v56 = vld [vmem:[%s12122_s2 + $0x160] ss:$16 sps:$4 sm:$0xff]   ;;  %v76_v48 = vld [vmem:[%s12123_s0 + $0x128] sm:$0xff] }
  0x1b   :  { %1586 = vmatpush1.bf16.msra.mxu0 %v7375_v26  ;;  %v7409_v55 = vld [vmem:[%s12122_s2 + $0x364] ss:$16 sps:$4 sm:$0xff]   ;;  %v7412_v57 = vld [vmem:[%s12122_s2 + $0x360] ss:$16 sps:$4 sm:$0xff]  }
  0x1c   :  { %1699 = vmatpush1.bf16.msra.mxu1 %v7376_v27  ;;  %1587 = vmatprep.subr.bf16.mxu0 %v7377_v28  ;;  %v7413_v58 = vld [vmem:[%s12122_s2 + $0x144] ss:$16 sps:$4 sm:$0xff]   ;;  %v7417_v60 = vld [vmem:[%s12122_s2 + $0x140] ss:$16 sps:$4 sm:$0xff]   ;;  %v62_v28 = vld [vmem:[%s12123_s0 + $0xb8] sm:$0xff] }
  0x1d   :  { %1700 = vmatprep.subr.bf16.mxu1 %v7379_v29  ;;  %1605 = vmatprep.mubr.bf16.mxu0 %v8750_v53  ;;  %v7415_v59 = vld [vmem:[%s12122_s2 + $0x344] ss:$16 sps:$4 sm:$0xff]   ;;  %v7418_v61 = vld [vmem:[%s12122_s2 + $0x340] ss:$16 sps:$4 sm:$0xff]  }
  0x1e   :  { %1718 = vmatprep.mubr.bf16.mxu1 %v8752_v54  ;;  %v7419_v62 = vld [vmem:[%s12122_s2 + $0x124] ss:$16 sps:$4 sm:$0xff]   ;;  %v7423_v0 = vld [vmem:[%s12122_s2 + $0x120] ss:$16 sps:$4 sm:$0xff]  }
  0x1f   :  { %1588 = vmatpush1.bf16.msra.mxu0 %v7381_v30  ;;  %v7421_v63 = vld [vmem:[%s12122_s2 + $0x324] ss:$16 sps:$4 sm:$0xff]   ;;  %v7424_v1 = vld [vmem:[%s12122_s2 + $0x320] ss:$16 sps:$4 sm:$0xff]  }
  0x20   :  { %1701 = vmatpush1.bf16.msra.mxu1 %v7382_v31  ;;  %1589 = vmatprep.subr.bf16.mxu0 %v7383_v32  ;;  %v7425_v2 = vld [vmem:[%s12122_s2 + $0x104] ss:$16 sps:$4 sm:$0xff]   ;;  %v7429_v4 = vld [vmem:[%s12122_s2 + $0x100] ss:$16 sps:$4 sm:$0xff]   ;;  %v68_v31 = vld [vmem:[%s12123_s0 + $0xe8] sm:$0xff] }
  0x21   :  { %1702 = vmatprep.subr.bf16.mxu1 %v7385_v33  ;;  %v7427_v3 = vld [vmem:[%s12122_s2 + $0x304] ss:$16 sps:$4 sm:$0xff]   ;;  %v7430_v5 = vld [vmem:[%s12122_s2 + $0x300] ss:$16 sps:$4 sm:$0xff]  }
  0x22   :  { %v39_v6 = vld [vmem:[%s12123_s0] sm:$0xff]  ;;  %v41_v8 = vld [vmem:[%s12123_s0 + $0x10] sm:$0xff] }
  0x23   :  { %1590 = vmatpush2.bf16.msra.mxu0 %v7387_v34  ;;  %v7433_v10 = vld [vmem:[%s12122_s2 + $0x4e4] ss:$16 sps:$4 sm:$0xff]   ;;  %v8825_v14 = vpack.c.bf16 %v46_v7, %v39_v6  ;;  %v8827_v15 = vpack.c.bf16 %v48_v9, %v41_v8  ;;  %v7431_v18 = vld [vmem:[%s12122_s2 + $0x4e0] ss:$16 sps:$4 sm:$0xff]   ;;  %v70_v34 = vld [vmem:[%s12123_s0 + $0xf8] sm:$0xff] }
  0x24   :  { %1703 = vmatpush2.bf16.msra.mxu1 %v7388_v35  ;;  %1591 = vmatprep.subr.bf16.mxu0 %v7389_v36  ;;  %v7436_v11 = vld [vmem:[%s12122_s2 + $0x6e4] ss:$16 sps:$4 sm:$0xff]   ;;  %v7434_v19 = vld [vmem:[%s12122_s2 + $0x6e0] ss:$16 sps:$4 sm:$0xff]   ;;  %v96_v7 = vld [vmem:[%s12123_s0 + $0x1c8] sm:$0xff] }
  0x25   :  { %1704 = vmatprep.subr.bf16.mxu1 %v7391_v37  ;;  %v61_v13 = vld [vmem:[%s12123_s0 + $0xb0] sm:$0xff]  ;;  %v63_v17 = vld [vmem:[%s12123_s0 + $0xc0] sm:$0xff] }
  0x26   :  { %v7439_v20 = vld [vmem:[%s12122_s2 + $0x4c4] ss:$16 sps:$4 sm:$0xff]   ;;  %v8844_v21 = vpack.c.bf16 %v61_v13, %v54_v12  ;;  %v7437_v22 = vld [vmem:[%s12122_s2 + $0x4c0] ss:$16 sps:$4 sm:$0xff]   ;;  %v8849_v23 = vpack.c.bf16 %v63_v17, %v56_v16 }
  0x27   :  { %1592 = vmatpush2.bf16.msra.mxu0 %v7393_v38  ;;  %v53_v24 = vld [vmem:[%s12123_s0 + $0x70] sm:$0xff]  ;;  %v55_v26 = vld [vmem:[%s12123_s0 + $0x80] sm:$0xff] }
  0x28   :  { %1705 = vmatpush2.bf16.msra.mxu1 %v7394_v39  ;;  %1593 = vmatprep.subr.bf16.mxu0 %v7395_v40  ;;  %v7445_v27 = vld [vmem:[%s12122_s2 + $0x6c4] ss:$16 sps:$4 sm:$0xff]   ;;  %v7443_v30 = vld [vmem:[%s12122_s2 + $0x6c0] ss:$16 sps:$4 sm:$0xff]   ;;  %v8891_v36 = vpack.c.bf16 %v60_v25, %v53_v24  ;;  %v8893_v37 = vpack.c.bf16 %v62_v28, %v55_v26  ;;  %v102_v24 = vld [vmem:[%s12123_s0 + $0x1f8] sm:$0xff] }
  0x29   :  { %1706 = vmatprep.subr.bf16.mxu1 %v7397_v41  ;;  %v7442_v29 = vld [vmem:[%s12122_s2 + $0x4a4] ss:$16 sps:$4 sm:$0xff]   ;;  %v7440_v38 = vld [vmem:[%s12122_s2 + $0x4a0] ss:$16 sps:$4 sm:$0xff]   ;;  %v104_v26 = vld [vmem:[%s12123_s0 + $0x208] sm:$0xff] }
  0x2a   :  { %v75_v32 = vld [vmem:[%s12123_s0 + $0x120] sm:$0xff]  ;;  %v77_v35 = vld [vmem:[%s12123_s0 + $0x130] sm:$0xff] }
  0x2b   :  { %1594 = vmatpush2.bf16.msra.mxu0 %v7399_v42  ;;  %v7454_v33 = vld [vmem:[%s12122_s2 + $0x6a4] ss:$16 sps:$4 sm:$0xff]   ;;  %v8898_v39 = vpack.c.bf16 %v75_v32, %v68_v31  ;;  %v8903_v41 = vpack.c.bf16 %v77_v35, %v70_v34  ;;  %v7446_v42 = vld [vmem:[%s12122_s2 + $0x480] ss:$16 sps:$4 sm:$0xff]   ;;  %v112_v32 = vld [vmem:[%s12123_s0 + $0x248] sm:$0xff] }
  0x2c   :  { %1707 = vmatpush2.bf16.msra.mxu1 %v7400_v43  ;;  %1595 = vmatprep.subr.bf16.mxu0 %v7401_v44  ;;  %v7448_v40 = vld [vmem:[%s12122_s2 + $0x484] ss:$16 sps:$4 sm:$0xff]   ;;  %v7452_v44 = vld [vmem:[%s12122_s2 + $0x6a0] ss:$16 sps:$4 sm:$0xff]  }
  0x2d   :  { %1708 = vmatprep.subr.bf16.mxu1 %v7403_v45  ;;  %v67_v43 = vld [vmem:[%s12123_s0 + $0xe0] sm:$0xff]  ;;  %v74_v45 = vld [vmem:[%s12123_s0 + $0x118] sm:$0xff]  ;;  %v69_v47 = vld [vmem:[%s12123_s0 + $0xf0] sm:$0xff] }
  0x2e   :  { %v7463_v46 = vld [vmem:[%s12122_s2 + $0x684] ss:$16 sps:$4 sm:$0xff]   ;;  %v7458_v16 = vld [vmem:[%s12122_s2 + $0x420] ss:$16 sps:$4 sm:$0xff]  }
  0x2f   :  { %1596 = vmatpush2.bf16.msra.mxu0 %v7405_v50  ;;  %v7451_v49 = vld [vmem:[%s12122_s2 + $0x464] ss:$16 sps:$4 sm:$0xff]   ;;  %v82_v50 = vld [vmem:[%s12123_s0 + $0x158] sm:$0xff]  ;;  %v7488_v34 = vld [vmem:[%s12122_s2 + $0x620] ss:$16 sps:$4 sm:$0xff]  }
  0x30   :  { %1709 = vmatpush2.bf16.msra.mxu1 %v7406_v51  ;;  %1597 = vmatprep.subr.bf16.mxu0 %v7407_v52  ;;  %v89_v51 = vld [vmem:[%s12123_s0 + $0x190] sm:$0xff]  ;;  %v84_v52 = vld [vmem:[%s12123_s0 + $0x168] sm:$0xff]  ;;  %v103_v9 = vld [vmem:[%s12123_s0 + $0x200] sm:$0xff] }
  0x31   :  { %1710 = vmatprep.subr.bf16.mxu1 %v7409_v55  ;;  %v91_v55 = vld [vmem:[%s12123_s0 + $0x1a0] sm:$0xff]  ;;  %v9012_v17 = vpack.c.bf16 %v103_v9, %v96_v7  ;;  %v97_v25 = vld [vmem:[%s12123_s0 + $0x1d0] sm:$0xff] }
  0x32   :  { %v7460_v6 = vld [vmem:[%s12122_s2 + $0x424] ss:$16 sps:$4 sm:$0xff]  }
  0x33   :  { %1598 = vmatpush2.bf16.msra.mxu0 %v7411_v56  ;;  %v7461_v56 = vld [vmem:[%s12122_s2 + $0x680] ss:$16 sps:$4 sm:$0xff]   ;;  %v7481_v8 = vld [vmem:[%s12122_s2 + $0x644] ss:$16 sps:$4 sm:$0xff]  }
  0x34   :  { %1711 = vmatpush2.bf16.msra.mxu1 %v7412_v57  ;;  %1599 = vmatprep.subr.bf16.mxu0 %v7413_v58  ;;  %v8948_v57 = vpack.c.bf16 %v74_v45, %v67_v43  ;;  %v8950_v58 = vpack.c.bf16 %v76_v48, %v69_v47  ;;  %v7469_v28 = vld [vmem:[%s12122_s2 + $0x5e4] ss:$16 sps:$4 sm:$0xff]   ;;  %v7473_v45 = vld [vmem:[%s12122_s2 + $0x5c0] ss:$16 sps:$4 sm:$0xff]   ;;  %v116_v47 = vld [vmem:[%s12123_s0 + $0x268] sm:$0xff] }
  0x35   :  { %1712 = vmatprep.subr.bf16.mxu1 %v7415_v59  ;;  %v7449_v59 = vld [vmem:[%s12122_s2 + $0x460] ss:$16 sps:$4 sm:$0xff]   ;;  %v7475_v43 = vld [vmem:[%s12122_s2 + $0x5c4] ss:$16 sps:$4 sm:$0xff]  }
  0x36   :  { %v117_v31 = vld [vmem:[%s12123_s0 + $0x270] sm:$0xff]  ;;  %v111_v48 = vld [vmem:[%s12123_s0 + $0x240] sm:$0xff] }
  0x37   :  { %1600 = vmatpush2.bf16.msra.mxu0 %v7417_v60  ;;  %v8955_v60 = vpack.c.bf16 %v89_v51, %v82_v50  ;;  %v7499_v50 = vld [vmem:[%s12122_s2 + $0x604] ss:$16 sps:$4 sm:$0xff]  }
  0x38   :  { %1713 = vmatpush2.bf16.msra.mxu1 %v7418_v61  ;;  %1601 = vmatprep.subr.bf16.mxu0 %v7419_v62  ;;  %v7457_v61 = vld [vmem:[%s12122_s2 + $0x444] ss:$16 sps:$4 sm:$0xff]   ;;  %v8960_v62 = vpack.c.bf16 %v91_v55, %v84_v52  ;;  %v7497_v52 = vld [vmem:[%s12122_s2 + $0x600] ss:$16 sps:$4 sm:$0xff]   ;;  %v124_v55 = vld [vmem:[%s12123_s0 + $0x2a8] sm:$0xff] }
  0x39   :  { %1714 = vmatprep.subr.bf16.mxu1 %v7421_v63  ;;  %v7455_v63 = vld [vmem:[%s12122_s2 + $0x440] ss:$16 sps:$4 sm:$0xff]   ;;  %v7478_v51 = vld [vmem:[%s12122_s2 + $0x5a4] ss:$16 sps:$4 sm:$0xff]  }
  0x3a   :  { %v123_v7 = vld [vmem:[%s12123_s0 + $0x2a0] sm:$0xff]  ;;  %v125_v9 = vld [vmem:[%s12123_s0 + $0x2b0] sm:$0xff] }
  0x3b   :  { %1602 = vmatpush2.bf16.msra.mxu0 %v7423_v0  ;;  %v81_v0 = vld [vmem:[%s12123_s0 + $0x150] sm:$0xff] }
  0x3c   :  { %1715 = vmatpush2.bf16.msra.mxu1 %v7424_v1  ;;  %1603 = vmatprep.subr.bf16.mxu0 %v7425_v2  ;;  %v88_v1 = vld [vmem:[%s12123_s0 + $0x188] sm:$0xff]  ;;  %v7472_v2 = vld [vmem:[%s12122_s2 + $0x664] ss:$16 sps:$4 sm:$0xff]  }
  0x3d   :  { %1716 = vmatprep.subr.bf16.mxu1 %v7427_v3  ;;  %v83_v3 = vld [vmem:[%s12123_s0 + $0x160] sm:$0xff]  ;;  %v9005_v12 = vpack.c.bf16 %v88_v1, %v81_v0 }
  0x3f   :  { %1604 = vmatpush2.bf16.msra.mxu0 %v7429_v4  ;;  %v90_v4 = vld [vmem:[%s12123_s0 + $0x198] sm:$0xff] }
  0x40   :  { %1717 = vmatpush2.bf16.msra.mxu1 %v7430_v5  ;;  %1799 = vmatprep.subr.bf16.mxu0 %v7433_v10  ;;  %v7470_v5 = vld [vmem:[%s12122_s2 + $0x660] ss:$16 sps:$4 sm:$0xff]   ;;  %v98_v10 = vld [vmem:[%s12123_s0 + $0x1d8] sm:$0xff]  ;;  %v9007_v13 = vpack.c.bf16 %v90_v4, %v83_v3  ;;  %v7484_v4 = vld [vmem:[%s12122_s2 + $0x584] ss:$16 sps:$4 sm:$0xff]  }
  0x41   :  { %1912 = vmatprep.subr.bf16.mxu1 %v7436_v11  ;;  %v105_v11 = vld [vmem:[%s12123_s0 + $0x210] sm:$0xff] }
  0x42   :  { %1606 = vmatmul.mubr.bf16.vlgmr.msra.gmra.mxu0 %v8825_v14 }
  0x43   :  { %1719 = vmatmul.mubr.bf16.vlgmr.msra.gmra.mxu1 %v8827_v15  ;;  %1800 = vmatpush1.bf16.msra.mxu0 %v7431_v18  ;;  %v7466_v18 = vld [vmem:[%s12122_s2 + $0x404] ss:$16 sps:$4 sm:$0xff]  }
  0x44   :  { %1913 = vmatpush1.bf16.msra.mxu1 %v7434_v19  ;;  %1801 = vmatprep.subr.bf16.mxu0 %v7439_v20  ;;  %v9017_v19 = vpack.c.bf16 %v105_v11, %v98_v10  ;;  %v7464_v20 = vld [vmem:[%s12122_s2 + $0x400] ss:$16 sps:$4 sm:$0xff]   ;;  %v132_v10 = vld [vmem:[%s12123_s0 + $0x2e8] sm:$0xff]  ;;  %v7487_v11 = vld [vmem:[%s12122_s2 + $0x564] ss:$16 sps:$4 sm:$0xff]  }
  0x45   :  { %1615 = vmatprep.mubr.bf16.mxu0 %v8844_v21  ;;  %1728 = vmatprep.mubr.bf16.mxu1 %v8849_v23 }
  0x46   :  { %1914 = vmatprep.subr.bf16.mxu1 %v7445_v27  ;;  %v7479_v27 = vld [vmem:[%s12122_s2 + $0x640] ss:$16 sps:$4 sm:$0xff]  }
  0x47   :  { %1802 = vmatpush1.bf16.msra.mxu0 %v7437_v22  ;;  %v95_v22 = vld [vmem:[%s12123_s0 + $0x1c0] sm:$0xff] }
  0x48   :  { %1915 = vmatpush1.bf16.msra.mxu1 %v7443_v30  ;;  %1803 = vmatprep.subr.bf16.mxu0 %v7442_v29  ;;  %v110_v29 = vld [vmem:[%s12123_s0 + $0x238] sm:$0xff]  ;;  %v7490_v30 = vld [vmem:[%s12122_s2 + $0x624] ss:$16 sps:$4 sm:$0xff]   ;;  %v9062_v35 = vpack.c.bf16 %v102_v24, %v95_v22 }
  0x49   :  { %1916 = vmatprep.subr.bf16.mxu1 %v7454_v33  ;;  %v119_v33 = vld [vmem:[%s12123_s0 + $0x280] sm:$0xff] }
  0x4a   :  { %1616 = vmatmul.mubr.bf16.gmra.mxu0 %v8891_v36  ;;  %v147_v22 = vld [vmem:[%s12123_s0 + $0x360] sm:$0xff] }
  0x4b   :  { %1729 = vmatmul.mubr.bf16.gmra.mxu1 %v8893_v37  ;;  %1804 = vmatpush1.bf16.msra.mxu0 %v7440_v38  ;;  %v9064_v38 = vpack.c.bf16 %v104_v26, %v97_v25  ;;  %v9169_v25 = vpack.c.bf16 %v132_v10, %v125_v9  ;;  %v7485_v26 = vld [vmem:[%s12122_s2 + $0x560] ss:$16 sps:$4 sm:$0xff]   ;;  %v7506_v9 = vld [vmem:[%s12122_s2 + $0x2e8] ss:$16 sps:$4 sm:$0xff]   ;;  %v7511_v10 = vld [vmem:[%s12122_s2 + $0xcc] ss:$16 sps:$4 sm:$0xff]  }
  0x4c   :  { %1625 = vmatprep.mubr.bf16.mxu0 %v8898_v39  ;;  %1805 = vmatprep.subr.bf16.mxu0 %v7448_v40  ;;  %v7467_v40 = vld [vmem:[%s12122_s2 + $0x5e0] ss:$16 sps:$4 sm:$0xff]  }
  0x4d   :  { %1738 = vmatprep.mubr.bf16.mxu1 %v8903_v41  ;;  %1917 = vmatpush1.bf16.msra.mxu1 %v7452_v44  ;;  %v9074_v44 = vpack.c.bf16 %v119_v33, %v112_v32  ;;  %v144_v32 = vld [vmem:[%s12123_s0 + $0x348] sm:$0xff]  ;;  %v139_v33 = vld [vmem:[%s12123_s0 + $0x320] sm:$0xff] }
  0x4e   :  { %1918 = vmatprep.subr.bf16.mxu1 %v7463_v46  ;;  %v109_v46 = vld [vmem:[%s12123_s0 + $0x230] sm:$0xff] }
  0x4f   :  { %1806 = vmatpush1.bf16.msra.mxu0 %v7446_v42  ;;  %v9069_v42 = vpack.c.bf16 %v117_v31, %v110_v29  ;;  %v9119_v0 = vpack.c.bf16 %v116_v47, %v109_v46  ;;  %v137_v31 = vld [vmem:[%s12123_s0 + $0x310] sm:$0xff] }
  0x50   :  { %1807 = vmatprep.subr.bf16.mxu0 %v7451_v49  ;;  %v118_v49 = vld [vmem:[%s12123_s0 + $0x278] sm:$0xff]  ;;  %v9209_v46 = vpack.c.bf16 %v144_v32, %v137_v31 }
  0x51   :  { %1919 = vmatpush1.bf16.msra.mxu1 %v7461_v56  ;;  %v7508_v56 = vld [vmem:[%s12122_s2 + $0x2ec] ss:$16 sps:$4 sm:$0xff]   ;;  %v9121_v1 = vpack.c.bf16 %v118_v49, %v111_v48  ;;  %v7494_v48 = vld [vmem:[%s12122_s2 + $0x520] ss:$16 sps:$4 sm:$0xff]  }
  0x52   :  { %1626 = vmatmul.mubr.bf16.gmra.mxu0 %v8948_v57  ;;  %1920 = vmatprep.subr.bf16.mxu1 %v7472_v2  ;;  %v7476_v2 = vld [vmem:[%s12122_s2 + $0x5a0] ss:$16 sps:$4 sm:$0xff]   ;;  %v7517_v31 = vld [vmem:[%s12122_s2 + $0xac] ss:$16 sps:$4 sm:$0xff]  }
  0x53   :  { %1739 = vmatmul.mubr.bf16.gmra.mxu1 %v8950_v58  ;;  %1808 = vmatpush1.bf16.msra.mxu0 %v7449_v59  ;;  %v131_v59 = vld [vmem:[%s12123_s0 + $0x2e0] sm:$0xff]  ;;  %v7520_v32 = vld [vmem:[%s12122_s2 + $0x2ac] ss:$16 sps:$4 sm:$0xff]  }
  0x54   :  { %1635 = vmatprep.mubr.bf16.mxu0 %v8955_v60  ;;  %1809 = vmatprep.subr.bf16.mxu0 %v7457_v61  ;;  %v126_v61 = vld [vmem:[%s12123_s0 + $0x2b8] sm:$0xff]  ;;  %v9126_v3 = vpack.c.bf16 %v131_v59, %v124_v55  ;;  %v52_v59 = vld [vmem:[%s12123_s0 + $0x68] sm:$0xff] }
  0x55   :  { %1748 = vmatprep.mubr.bf16.mxu1 %v8960_v62  ;;  %1921 = vmatpush1.bf16.msra.mxu1 %v7470_v5  ;;  %v50_v55 = vld [vmem:[%s12123_s0 + $0x58] sm:$0xff] }
  0x56   :  { %1922 = vmatprep.subr.bf16.mxu1 %v7481_v8  ;;  %v130_v8 = vld [vmem:[%s12123_s0 + $0x2d8] sm:$0xff] }
  0x57   :  { %1810 = vmatpush1.bf16.msra.mxu0 %v7455_v63  ;;  %v133_v63 = vld [vmem:[%s12123_s0 + $0x2f0] sm:$0xff]  ;;  %v9167_v24 = vpack.c.bf16 %v130_v8, %v123_v7  ;;  %v7503_v8 = vld [vmem:[%s12122_s2 + $0xe8] ss:$16 sps:$4 sm:$0xff]  }
  0x58   :  { %1811 = vmatprep.subr.bf16.mxu0 %v7460_v6  ;;  %v9131_v5 = vpack.c.bf16 %v133_v63, %v126_v61  ;;  %v7482_v6 = vld [vmem:[%s12122_s2 + $0x580] ss:$16 sps:$4 sm:$0xff]   ;;  %v12136_v61 = vmov 0   ;;  %v7505_v63 = vld [vmem:[%s12122_s2 + $0xec] ss:$16 sps:$4 sm:$0xff]  }
  0x59   :  { %1923 = vmatpush1.bf16.msra.mxu1 %v7479_v27  ;;  %v65_v7 = vld [vmem:[%s12123_s0 + $0xd0] sm:$0xff] }
  0x5a   :  { %1636 = vmatmul.mubr.bf16.gmra.mxu0 %v9005_v12  ;;  %1924 = vmatprep.subr.bf16.mxu1 %v7490_v30  ;;  %v7491_v30 = vld [vmem:[%s12122_s2 + $0x540] ss:$16 sps:$4 sm:$0xff]  }
  0x5b   :  { %1749 = vmatmul.mubr.bf16.gmra.mxu1 %v9007_v13  ;;  %1812 = vmatpush1.bf16.msra.mxu0 %v7458_v16  ;;  %v138_v16 = vld [vmem:[%s12123_s0 + $0x318] sm:$0xff] }
  0x5c   :  { %1645 = vmatprep.mubr.bf16.mxu0 %v9012_v17  ;;  %1813 = vmatprep.subr.bf16.mxu0 %v7466_v18  ;;  %v145_v18 = vld [vmem:[%s12123_s0 + $0x350] sm:$0xff] }
  0x5d   :  { %1758 = vmatprep.mubr.bf16.mxu1 %v9017_v19  ;;  %1925 = vmatpush1.bf16.msra.mxu1 %v7488_v34  ;;  %v9174_v27 = vpack.c.bf16 %v145_v18, %v138_v16  ;;  %v146_v34 = vld [vmem:[%s12123_s0 + $0x358] sm:$0xff] }
  0x5e   :  { %1926 = vmatprep.subr.bf16.mxu1 %v7499_v50  ;;  %v9211_v47 = vpack.c.bf16 %v146_v34, %v139_v33  ;;  %v7502_v50 = vld [vmem:[%s12122_s2 + $0x504] ss:$16 sps:$4 sm:$0xff]   ;;  %v7509_v16 = vld [vmem:[%s12122_s2 + $0xc8] ss:$16 sps:$4 sm:$0xff]  }
  0x5f   :  { %1814 = vmatpush1.bf16.msra.mxu0 %v7464_v20  ;;  %v140_v20 = vld [vmem:[%s12123_s0 + $0x328] sm:$0xff] }
  0x60   :  { %1815 = vmatprep.subr.bf16.mxu0 %v7469_v28  ;;  %v7493_v28 = vld [vmem:[%s12122_s2 + $0x544] ss:$16 sps:$4 sm:$0xff]   ;;  %v9179_v29 = vpack.c.bf16 %v147_v22, %v140_v20  ;;  %v7512_v18 = vld [vmem:[%s12122_s2 + $0x2c8] ss:$16 sps:$4 sm:$0xff]  }
  0x61   :  { %1927 = vmatpush1.bf16.msra.mxu1 %v7497_v52  ;;  %v43_v52 = vld [vmem:[%s12123_s0 + $0x20] sm:$0xff]  ;;  %v57_v22 = vld [vmem:[%s12123_s0 + $0x90] sm:$0xff]  ;;  %v7515_v33 = vld [vmem:[%s12122_s2 + $0xa8] ss:$16 sps:$4 sm:$0xff]  }
  0x62   :  { %1646 = vmatmul.mubr.bf16.gmra.mxu0 %v9062_v35  ;;  %2138 = vmatprep.subr.bf16.mxu1 %v7508_v56  ;;  %v45_v56 = vld [vmem:[%s12123_s0 + $0x30] sm:$0xff]  ;;  %v7518_v34 = vld [vmem:[%s12122_s2 + $0x2a8] ss:$16 sps:$4 sm:$0xff]  }
  0x63   :  { %1759 = vmatmul.mubr.bf16.gmra.mxu1 %v9064_v38  ;;  %1816 = vmatpush2.bf16.msra.mxu0 %v7467_v40  ;;  %v7496_v40 = vld [vmem:[%s12122_s2 + $0x524] ss:$16 sps:$4 sm:$0xff]  }
  0x64   :  { %1655 = vmatprep.mubr.bf16.mxu0 %v9069_v42  ;;  %1817 = vmatprep.subr.bf16.mxu0 %v7475_v43  ;;  %v44_v43 = vld [vmem:[%s12123_s0 + $0x28] sm:$0xff] }
  0x65   :  { %1768 = vmatprep.mubr.bf16.mxu1 %v9074_v44 }
  0x67   :  { %1818 = vmatpush2.bf16.msra.mxu0 %v7473_v45  ;;  %v51_v45 = vld [vmem:[%s12123_s0 + $0x60] sm:$0xff] }
  0x68   :  { %1819 = vmatprep.subr.bf16.mxu0 %v7478_v51  ;;  %v9216_v49 = vpack.c.bf16 %v51_v45, %v44_v43  ;;  %v7500_v51 = vld [vmem:[%s12122_s2 + $0x500] ss:$16 sps:$4 sm:$0xff]   ;;  %v72_v45 = vld [vmem:[%s12123_s0 + $0x108] sm:$0xff] }
  0x6a   :  { %1656 = vmatmul.mubr.bf16.gmra.mxu0 %v9119_v0 }
  0x6b   :  { %1769 = vmatmul.mubr.bf16.gmra.mxu1 %v9121_v1  ;;  %1820 = vmatpush2.bf16.msra.mxu0 %v7476_v2  ;;  %v58_v2 = vld [vmem:[%s12123_s0 + $0x98] sm:$0xff] }
  0x6c   :  { %1665 = vmatprep.mubr.bf16.mxu0 %v9126_v3  ;;  %1821 = vmatprep.subr.bf16.mxu0 %v7484_v4  ;;  %v9246_v4 = vpack.c.bf16 %v50_v55, %v43_v52  ;;  %v9271_v20 = vpack.c.bf16 %v65_v7, %v58_v2  ;;  %v7521_v52 = vld [vmem:[%s12122_s2 + $0x88] ss:$16 sps:$4 sm:$0xff]   ;;  %v73_v2 = vld [vmem:[%s12123_s0 + $0x110] sm:$0xff] }
  0x6d   :  { %1778 = vmatprep.mubr.bf16.mxu1 %v9131_v5  ;;  %v80_v7 = vld [vmem:[%s12123_s0 + $0x148] sm:$0xff] }
  0x6f   :  { %1822 = vmatpush2.bf16.msra.mxu0 %v7482_v6  ;;  %v9248_v6 = vpack.c.bf16 %v52_v59, %v45_v56  ;;  %v7524_v56 = vld [vmem:[%s12122_s2 + $0x288] ss:$16 sps:$4 sm:$0xff]   ;;  %v71_v59 = vld [vmem:[%s12123_s0 + $0x100] sm:$0xff] }
  0x70   :  { %1823 = vmatprep.subr.bf16.mxu0 %v7487_v11  ;;  %v7514_v11 = vld [vmem:[%s12122_s2 + $0x2cc] ss:$16 sps:$4 sm:$0xff]  }
  0x72   :  { %1666 = vmatmul.mubr.bf16.gmra.mxu0 %v9167_v24 }
  0x73   :  { %1779 = vmatmul.mubr.bf16.gmra.mxu1 %v9169_v25  ;;  %1824 = vmatpush2.bf16.msra.mxu0 %v7485_v26  ;;  %v64_v26 = vld [vmem:[%s12123_s0 + $0xc8] sm:$0xff] }
  0x74   :  { %1675 = vmatprep.mubr.bf16.mxu0 %v9174_v27  ;;  %1825 = vmatprep.subr.bf16.mxu0 %v7493_v28  ;;  %v59_v28 = vld [vmem:[%s12123_s0 + $0xa0] sm:$0xff] }
  0x75   :  { %1788 = vmatprep.mubr.bf16.mxu1 %v9179_v29 }
  0x77   :  { %1826 = vmatpush2.bf16.msra.mxu0 %v7491_v30  ;;  %v66_v30 = vld [vmem:[%s12123_s0 + $0xd8] sm:$0xff] }
  0x78   :  { %1827 = vmatprep.subr.bf16.mxu0 %v7496_v40  ;;  %v9301_v40 = vpack.c.bf16 %v64_v26, %v57_v22  ;;  %v9303_v43 = vpack.c.bf16 %v66_v30, %v59_v28  ;;  %v7527_v22 = vld [vmem:[%s12122_s2 + $0x68] ss:$16 sps:$4 sm:$0xff]   ;;  %v7535_v28 = vld [vmem:[%s12122_s2 + $0x4c] ss:$16 sps:$4 sm:$0xff]  }
  0x79   :  { %v7530_v26 = vld [vmem:[%s12122_s2 + $0x268] ss:$16 sps:$4 sm:$0xff]   ;;  %v7538_v30 = vld [vmem:[%s12122_s2 + $0x24c] ss:$16 sps:$4 sm:$0xff]  }
  0x7a   :  { %1676 = vmatmul.mubr.bf16.gmra.mxu0 %v9209_v46 }
  0x7b   :  { %1789 = vmatmul.mubr.bf16.gmra.mxu1 %v9211_v47  ;;  %1828 = vmatpush2.bf16.msra.mxu0 %v7494_v48  ;;  %v79_v48 = vld [vmem:[%s12123_s0 + $0x140] sm:$0xff] }
  0x7c   :  { %1831 = vmatprep.mubr.bf16.mxu0 %v9216_v49  ;;  %1829 = vmatprep.subr.bf16.mxu0 %v7502_v50  ;;  %v7523_v50 = vld [vmem:[%s12122_s2 + $0x8c] ss:$16 sps:$4 sm:$0xff]   ;;  %v9320_v55 = vpack.c.bf16 %v79_v48, %v72_v45  ;;  %v87_v48 = vld [vmem:[%s12123_s0 + $0x180] sm:$0xff] }
  0x7d   :  { %1944 = vmatprep.mubr.bf16.mxu1 %v12136_v61  ;;  %v92_v45 = vld [vmem:[%s12123_s0 + $0x1a8] sm:$0xff] }
  0x7f   :  { %1830 = vmatpush2.bf16.msra.mxu0 %v7500_v51  ;;  %v7526_v51 = vld [vmem:[%s12122_s2 + $0x28c] ss:$16 sps:$4 sm:$0xff]  }
  0x80   :  { %2025 = vmatprep.subr.bf16.mxu0 %v7505_v63  ;;  %v78_v63 = vld [vmem:[%s12123_s0 + $0x138] sm:$0xff] }
  0x82   :  { %1832 = vmatmul.mubr.bf16.vlgmr.msra.gmra.mxu0 %v9246_v4 }
  0x83   :  { %1945 = vmatmul.mubr.bf16.vlgmr.msra.gmra.mxu1 %v9248_v6  ;;  %2026 = vmatpush1.bf16.msra.mxu0 %v7503_v8  ;;  %v7529_v8 = vld [vmem:[%s12122_s2 + $0x6c] ss:$16 sps:$4 sm:$0xff]  }
  0x84   :  { %2139 = vmatpush1.bf16.msra.mxu1 %v7506_v9  ;;  %2027 = vmatprep.subr.bf16.mxu0 %v7511_v10  ;;  %v7532_v9 = vld [vmem:[%s12122_s2 + $0x26c] ss:$16 sps:$4 sm:$0xff]  }
  0x85   :  { %2140 = vmatprep.subr.bf16.mxu1 %v7514_v11  ;;  %1841 = vmatprep.mubr.bf16.mxu0 %v9271_v20  ;;  %v86_v10 = vld [vmem:[%s12123_s0 + $0x178] sm:$0xff]  ;;  %v9350_v11 = vpack.c.bf16 %v78_v63, %v71_v59 }
  0x86   :  { %1954 = vmatprep.mubr.bf16.mxu1 %v12136_v61  ;;  %v7542_v59 = vld [vmem:[%s12122_s2 + $0x228] ss:$16 sps:$4 sm:$0xff]  }
  0x87   :  { %2028 = vmatpush1.bf16.msra.mxu0 %v7509_v16  ;;  %v9352_v16 = vpack.c.bf16 %v80_v7, %v73_v2  ;;  %v100_v7 = vld [vmem:[%s12123_s0 + $0x1e8] sm:$0xff] }
  0x88   :  { %2141 = vmatpush1.bf16.msra.mxu1 %v7512_v18  ;;  %2029 = vmatprep.subr.bf16.mxu0 %v7517_v31  ;;  %v93_v18 = vld [vmem:[%s12123_s0 + $0x1b0] sm:$0xff]  ;;  %v7533_v31 = vld [vmem:[%s12122_s2 + $0x48] ss:$16 sps:$4 sm:$0xff]  }
  0x89   :  { %2142 = vmatprep.subr.bf16.mxu1 %v7520_v32  ;;  %v9372_v32 = vpack.c.bf16 %v93_v18, %v86_v10  ;;  %v7550_v10 = vld [vmem:[%s12122_s2 + $0x20c] ss:$16 sps:$4 sm:$0xff]   ;;  %v7545_v18 = vld [vmem:[%s12122_s2 + $0x8] ss:$16 sps:$4 sm:$0xff]  }
  0x8a   :  { %1842 = vmatmul.mubr.bf16.gmra.mxu0 %v9301_v40 }
  0x8b   :  { %1955 = vmatmul.mubr.bf16.gmra.mxu1 %v9303_v43  ;;  %2030 = vmatpush1.bf16.msra.mxu0 %v7515_v33  ;;  %v7536_v33 = vld [vmem:[%s12122_s2 + $0x248] ss:$16 sps:$4 sm:$0xff]  }
  0x8c   :  { %2143 = vmatpush1.bf16.msra.mxu1 %v7518_v34  ;;  %2031 = vmatprep.subr.bf16.mxu0 %v7523_v50  ;;  %v85_v34 = vld [vmem:[%s12123_s0 + $0x170] sm:$0xff]  ;;  %v94_v50 = vld [vmem:[%s12123_s0 + $0x1b8] sm:$0xff] }
  0x8d   :  { %2144 = vmatprep.subr.bf16.mxu1 %v7526_v51  ;;  %1851 = vmatprep.mubr.bf16.mxu0 %v9320_v55  ;;  %v7541_v51 = vld [vmem:[%s12122_s2 + $0x2c] ss:$16 sps:$4 sm:$0xff]   ;;  %v9405_v63 = vpack.c.bf16 %v92_v45, %v85_v34  ;;  %v9407_v2 = vpack.c.bf16 %v94_v50, %v87_v48  ;;  %v7551_v48 = vld [vmem:[%s12122_s2 + $0x1e8] ss:$16 sps:$4 sm:$0xff]  }
  0x8e   :  { %1964 = vmatprep.mubr.bf16.mxu1 %v12136_v61  ;;  %v7553_v34 = vld [vmem:[%s12122_s2 + $0x1ec] ss:$16 sps:$4 sm:$0xff]   ;;  %v7554_v50 = vld [vmem:[%s12122_s2 + $0x3e8] ss:$16 sps:$4 sm:$0xff]  }
  0x8f   :  { %2032 = vmatpush1.bf16.msra.mxu0 %v7521_v52  ;;  %v7544_v52 = vld [vmem:[%s12122_s2 + $0x22c] ss:$16 sps:$4 sm:$0xff]  }
  0x90   :  { %2145 = vmatpush1.bf16.msra.mxu1 %v7524_v56  ;;  %2033 = vmatprep.subr.bf16.mxu0 %v7529_v8  ;;  %v7539_v56 = vld [vmem:[%s12122_s2 + $0x28] ss:$16 sps:$4 sm:$0xff]   ;;  %v107_v8 = vld [vmem:[%s12123_s0 + $0x220] sm:$0xff]  ;;  %v7556_v45 = vld [vmem:[%s12122_s2 + $0x3ec] ss:$16 sps:$4 sm:$0xff]  }
  0x91   :  { %2146 = vmatprep.subr.bf16.mxu1 %v7532_v9  ;;  %v7547_v9 = vld [vmem:[%s12122_s2 + $0xc] ss:$16 sps:$4 sm:$0xff]  }
  0x92   :  { %1852 = vmatmul.mubr.bf16.gmra.mxu0 %v9350_v11 }
  0x93   :  { %1965 = vmatmul.mubr.bf16.gmra.mxu1 %v9352_v16  ;;  %2034 = vmatpush1.bf16.msra.mxu0 %v7527_v22  ;;  %v7548_v22 = vld [vmem:[%s12122_s2 + $0x208] ss:$16 sps:$4 sm:$0xff]  }
  0x94   :  { %2147 = vmatpush1.bf16.msra.mxu1 %v7530_v26  ;;  %2035 = vmatprep.subr.bf16.mxu0 %v7535_v28  ;;  %v9427_v26 = vpack.c.bf16 %v107_v8, %v100_v7  ;;  %v99_v28 = vld [vmem:[%s12123_s0 + $0x1e0] sm:$0xff]  ;;  %v7559_v7 = vld [vmem:[%s12122_s2 + $0x1cc] ss:$16 sps:$4 sm:$0xff]  }
  0x95   :  { %2148 = vmatprep.subr.bf16.mxu1 %v7538_v30  ;;  %1861 = vmatprep.mubr.bf16.mxu0 %v9372_v32  ;;  %v106_v30 = vld [vmem:[%s12123_s0 + $0x218] sm:$0xff] }
  0x96   :  { %1974 = vmatprep.mubr.bf16.mxu1 %v12136_v61  ;;  %v7562_v8 = vld [vmem:[%s12122_s2 + $0x3cc] ss:$16 sps:$4 sm:$0xff]  }
  0x97   :  { %2036 = vmatpush1.bf16.msra.mxu0 %v7533_v31  ;;  %v101_v31 = vld [vmem:[%s12123_s0 + $0x1f0] sm:$0xff] }
  0x98   :  { %2149 = vmatpush1.bf16.msra.mxu1 %v7536_v33  ;;  %2037 = vmatprep.subr.bf16.mxu0 %v7541_v51  ;;  %v108_v33 = vld [vmem:[%s12123_s0 + $0x228] sm:$0xff]  ;;  %v9457_v51 = vpack.c.bf16 %v106_v30, %v99_v28  ;;  %v115_v30 = vld [vmem:[%s12123_s0 + $0x260] sm:$0xff] }
  0x99   :  { %2150 = vmatprep.subr.bf16.mxu1 %v7544_v52  ;;  %v9459_v52 = vpack.c.bf16 %v108_v33, %v101_v31  ;;  %v120_v28 = vld [vmem:[%s12123_s0 + $0x288] sm:$0xff]  ;;  %v122_v31 = vld [vmem:[%s12123_s0 + $0x298] sm:$0xff] }
  0x9a   :  { %1862 = vmatmul.mubr.bf16.gmra.mxu0 %v9405_v63  ;;  %v7565_v33 = vld [vmem:[%s12122_s2 + $0x1ac] ss:$16 sps:$4 sm:$0xff]  }
  0x9b   :  { %1975 = vmatmul.mubr.bf16.gmra.mxu1 %v9407_v2  ;;  %2038 = vmatpush1.bf16.msra.mxu0 %v7539_v56  ;;  %v114_v56 = vld [vmem:[%s12123_s0 + $0x258] sm:$0xff] }
  0x9c   :  { %2151 = vmatpush1.bf16.msra.mxu1 %v7542_v59  ;;  %2039 = vmatprep.subr.bf16.mxu0 %v7547_v9  ;;  %v121_v59 = vld [vmem:[%s12123_s0 + $0x290] sm:$0xff]  ;;  %v7557_v9 = vld [vmem:[%s12122_s2 + $0x1c8] ss:$16 sps:$4 sm:$0xff]  }
  0x9d   :  { %2152 = vmatprep.subr.bf16.mxu1 %v7550_v10  ;;  %1871 = vmatprep.mubr.bf16.mxu0 %v9427_v26  ;;  %v7560_v10 = vld [vmem:[%s12122_s2 + $0x3c8] ss:$16 sps:$4 sm:$0xff]  }
  0x9e   :  { %1984 = vmatprep.mubr.bf16.mxu1 %v12136_v61 }
  0x9f   :  { %2040 = vmatpush1.bf16.msra.mxu0 %v7545_v18  ;;  %v9479_v18 = vpack.c.bf16 %v121_v59, %v114_v56  ;;  %v9511_v56 = vpack.c.bf16 %v122_v31, %v115_v30  ;;  %v128_v59 = vld [vmem:[%s12123_s0 + $0x2c8] sm:$0xff]  ;;  %v134_v31 = vld [vmem:[%s12123_s0 + $0x2f8] sm:$0xff] }
  0xa0   :  { %2153 = vmatpush1.bf16.msra.mxu1 %v7548_v22  ;;  %2041 = vmatprep.subr.bf16.mxu0 %v7553_v34  ;;  %v113_v22 = vld [vmem:[%s12123_s0 + $0x250] sm:$0xff]  ;;  %v7568_v34 = vld [vmem:[%s12122_s2 + $0x3ac] ss:$16 sps:$4 sm:$0xff]   ;;  %v7572_v30 = vld [vmem:[%s12122_s2 + $0x388] ss:$16 sps:$4 sm:$0xff]  }
  0xa1   :  { %2154 = vmatprep.subr.bf16.mxu1 %v7556_v45  ;;  %v7563_v45 = vld [vmem:[%s12122_s2 + $0x1a8] ss:$16 sps:$4 sm:$0xff]   ;;  %12156 = vst [vmem:[#allocation3_spill] sm:$0xff] %v9511_v56 }
  0xa2   :  { %1872 = vmatmul.mubr.bf16.gmra.mxu0 %v9457_v51 }
  0xa3   :  { %1985 = vmatmul.mubr.bf16.gmra.mxu1 %v9459_v52  ;;  %2042 = vmatpush2.bf16.msra.mxu0 %v7551_v48  ;;  %v7566_v48 = vld [vmem:[%s12122_s2 + $0x3a8] ss:$16 sps:$4 sm:$0xff]  }
  0xa4   :  { %2155 = vmatpush2.bf16.msra.mxu1 %v7554_v50  ;;  %2043 = vmatprep.subr.bf16.mxu0 %v7559_v7  ;;  %v9509_v50 = vpack.c.bf16 %v120_v28, %v113_v22  ;;  %v135_v7 = vld [vmem:[%s12123_s0 + $0x300] sm:$0xff]  ;;  %v7574_v22 = vld [vmem:[%s12122_s2 + $0x38c] ss:$16 sps:$4 sm:$0xff]   ;;  %v7569_v28 = vld [vmem:[%s12122_s2 + $0x188] ss:$16 sps:$4 sm:$0xff]  }
  0xa5   :  { %2156 = vmatprep.subr.bf16.mxu1 %v7562_v8  ;;  %1881 = vmatprep.mubr.bf16.mxu0 %v9479_v18  ;;  %v7571_v8 = vld [vmem:[%s12122_s2 + $0x18c] ss:$16 sps:$4 sm:$0xff]  }
  0xa6   :  { %1994 = vmatprep.mubr.bf16.mxu1 %v12136_v61  ;;  %12155 = vst [vmem:[#allocation2_spill] sm:$0xff] %v9509_v50 }
  0xa7   :  { %2044 = vmatpush2.bf16.msra.mxu0 %v7557_v9  ;;  %v9531_v9 = vpack.c.bf16 %v135_v7, %v128_v59  ;;  %v7577_v59 = vld [vmem:[%s12122_s2 + $0x16c] ss:$16 sps:$4 sm:$0xff]  }
  0xa8   :  { %2157 = vmatpush2.bf16.msra.mxu1 %v7560_v10  ;;  %2045 = vmatprep.subr.bf16.mxu0 %v7565_v33  ;;  %v127_v10 = vld [vmem:[%s12123_s0 + $0x2c0] sm:$0xff]  ;;  %v129_v33 = vld [vmem:[%s12123_s0 + $0x2d0] sm:$0xff]  ;;  %v7580_v7 = vld [vmem:[%s12122_s2 + $0x36c] ss:$16 sps:$4 sm:$0xff]  }
  0xa9   :  { %2158 = vmatprep.subr.bf16.mxu1 %v7568_v34  ;;  %12157 = vst [vmem:[#allocation4_spill] sm:$0xff] %v9531_v9  ;;  %v136_v34 = vld [vmem:[%s12123_s0 + $0x308] sm:$0xff] }
  0xaa   :  { %1882 = vmatmul.mubr.bf16.gmra.mxu0 %v9509_v50 }
  0xab   :  { %1995 = vmatmul.mubr.bf16.gmra.mxu1 %v9511_v56  ;;  %2046 = vmatpush2.bf16.msra.mxu0 %v7563_v45  ;;  %v7575_v56 = vld [vmem:[%s12122_s2 + $0x168] ss:$16 sps:$4 sm:$0xff]  }
  0xac   :  { %2159 = vmatpush2.bf16.msra.mxu1 %v7566_v48  ;;  %2047 = vmatprep.subr.bf16.mxu0 %v7571_v8  ;;  %v7578_v45 = vld [vmem:[%s12122_s2 + $0x368] ss:$16 sps:$4 sm:$0xff]   ;;  %v9561_v48 = vpack.c.bf16 %v134_v31, %v127_v10  ;;  %v9563_v8 = vpack.c.bf16 %v136_v34, %v129_v33  ;;  %v7586_v10 = vld [vmem:[%s12122_s2 + $0x34c] ss:$16 sps:$4 sm:$0xff]  }
  0xad   :  { %2160 = vmatprep.subr.bf16.mxu1 %v7574_v22  ;;  %1891 = vmatprep.mubr.bf16.mxu0 %v9531_v9  ;;  %v142_v22 = vld [vmem:[%s12123_s0 + $0x338] sm:$0xff]  ;;  %v148_v34 = vld [vmem:[%s12123_s0 + $0x368] sm:$0xff] }
  0xae   :  { %2004 = vmatprep.mubr.bf16.mxu1 %v12136_v61  ;;  %12158 = vst [vmem:[#allocation5_spill] sm:$0xff] %v9561_v48  ;;  %12159 = vst [vmem:[#allocation6_spill] sm:$0xff] %v9563_v8  ;;  %v149_v61 = vld [vmem:[%s12123_s0 + $0x370] sm:$0xff]  ;;  %v7583_v9 = vld [vmem:[%s12122_s2 + $0x14c] ss:$16 sps:$4 sm:$0xff]  }
  0xaf   :  { %2048 = vmatpush2.bf16.msra.mxu0 %v7569_v28  ;;  %v7581_v31 = vld [vmem:[%s12122_s2 + $0x148] ss:$16 sps:$4 sm:$0xff]   ;;  %v9583_v28 = vpack.c.bf16 %v149_v61, %v142_v22  ;;  %v7592_v22 = vld [vmem:[%s12122_s2 + $0x32c] ss:$16 sps:$4 sm:$0xff]  }
  0xb0   :  { %2161 = vmatpush2.bf16.msra.mxu1 %v7572_v30  ;;  %2049 = vmatprep.subr.bf16.mxu0 %v7577_v59  ;;  %v7584_v33 = vld [vmem:[%s12122_s2 + $0x348] ss:$16 sps:$4 sm:$0xff]   ;;  %v141_v30 = vld [vmem:[%s12123_s0 + $0x330] sm:$0xff]  ;;  %v143_v59 = vld [vmem:[%s12123_s0 + $0x340] sm:$0xff] }
  0xb1   :  { %2162 = vmatprep.subr.bf16.mxu1 %v7580_v7  ;;  %v150_v61 = vld [vmem:[%s12123_s0 + $0x378] sm:$0xff] }
  0xb2   :  { %1892 = vmatmul.mubr.bf16.gmra.mxu0 %v9561_v48  ;;  %v7589_v7 = vld [vmem:[%s12122_s2 + $0x12c] ss:$16 sps:$4 sm:$0xff]   ;;  %v9607_v48 = vpack.c.bf16 %v148_v34, %v141_v30  ;;  %v9609_v50 = vpack.c.bf16 %v150_v61, %v143_v59  ;;  %v7593_v30 = vld [vmem:[%s12122_s2 + $0x108] ss:$16 sps:$4 sm:$0xff]  }
  0xb3   :  { %2005 = vmatmul.mubr.bf16.gmra.mxu1 %v9563_v8  ;;  %2050 = vmatpush2.bf16.msra.mxu0 %v7575_v56  ;;  %v12160_v8 = vmov 0   ;;  %v7587_v56 = vld [vmem:[%s12122_s2 + $0x128] ss:$16 sps:$4 sm:$0xff]   ;;  %v7604_v34 = vld [vmem:[%s12122_s2 + $0x6ec] ss:$16 sps:$4 sm:$0xff]  }
  0xb4   :  { %2163 = vmatpush2.bf16.msra.mxu1 %v7578_v45  ;;  %2051 = vmatprep.subr.bf16.mxu0 %v7583_v9  ;;  %v7590_v9 = vld [vmem:[%s12122_s2 + $0x328] ss:$16 sps:$4 sm:$0xff]   ;;  %v7595_v45 = vld [vmem:[%s12122_s2 + $0x10c] ss:$16 sps:$4 sm:$0xff]  }
  0xb5   :  { %2164 = vmatprep.subr.bf16.mxu1 %v7586_v10  ;;  %1901 = vmatprep.mubr.bf16.mxu0 %v9583_v28  ;;  %v7598_v10 = vld [vmem:[%s12122_s2 + $0x30c] ss:$16 sps:$4 sm:$0xff]   ;;  %v7599_v59 = vld [vmem:[%s12122_s2 + $0x4e8] ss:$16 sps:$4 sm:$0xff]  }
  0xb6   :  { %2014 = vmatprep.mubr.bf16.mxu1 %v12160_v8  ;;  %v7602_v61 = vld [vmem:[%s12122_s2 + $0x6e8] ss:$16 sps:$4 sm:$0xff]  }
  0xb7   :  { %2052 = vmatpush2.bf16.msra.mxu0 %v7581_v31  ;;  %v7596_v31 = vld [vmem:[%s12122_s2 + $0x308] ss:$16 sps:$4 sm:$0xff]  }
  0xb8   :  { %2165 = vmatpush2.bf16.msra.mxu1 %v7584_v33  ;;  %2053 = vmatprep.subr.bf16.mxu0 %v7589_v7  ;;  %v7601_v33 = vld [vmem:[%s12122_s2 + $0x4ec] ss:$16 sps:$4 sm:$0xff]  }
  0xb9   :  { %2166 = vmatprep.subr.bf16.mxu1 %v7592_v22  ;;  %v7607_v7 = vld [vmem:[%s12122_s2 + $0x4cc] ss:$16 sps:$4 sm:$0xff]   ;;  %v7611_v22 = vld [vmem:[%s12122_s2 + $0x6c8] ss:$16 sps:$4 sm:$0xff]  }
  0xba   :  { %1902 = vmatmul.mubr.bf16.gmra.mxu0 %v9607_v48 }
  0xbb   :  { %2015 = vmatmul.mubr.bf16.gmra.mxu1 %v9609_v50  ;;  %2054 = vmatpush2.bf16.msra.mxu0 %v7587_v56  ;;  %v7610_v56 = vld [vmem:[%s12122_s2 + $0x4ac] ss:$16 sps:$4 sm:$0xff]  }
  0xbc   :  { %2167 = vmatpush2.bf16.msra.mxu1 %v7590_v9  ;;  %2055 = vmatprep.subr.bf16.mxu0 %v7595_v45  ;;  %v7620_v9 = vld [vmem:[%s12122_s2 + $0x6a8] ss:$16 sps:$4 sm:$0xff]  }
  0xbd   :  { %2168 = vmatprep.subr.bf16.mxu1 %v7598_v10  ;;  %2057 = vmatprep.mubr.bf16.mxu0 %v8750_v53  ;;  %v7613_v53 = vld [vmem:[%s12122_s2 + $0x6cc] ss:$16 sps:$4 sm:$0xff]   ;;  %v7614_v45 = vld [vmem:[%s12122_s2 + $0x488] ss:$16 sps:$4 sm:$0xff]  }
  0xbe   :  { %2170 = vmatprep.mubr.bf16.mxu1 %v8752_v54  ;;  %v7605_v54 = vld [vmem:[%s12122_s2 + $0x4c8] ss:$16 sps:$4 sm:$0xff]  }
  0xbf   :  { %2056 = vmatpush2.bf16.msra.mxu0 %v7593_v30  ;;  %v7629_v10 = vld [vmem:[%s12122_s2 + $0x688] ss:$16 sps:$4 sm:$0xff]  }
  0xc0   :  { %2169 = vmatpush2.bf16.msra.mxu1 %v7596_v31  ;;  %2251 = vmatprep.subr.bf16.mxu0 %v7601_v33  ;;  %v7638_v30 = vld [vmem:[%s12122_s2 + $0x668] ss:$16 sps:$4 sm:$0xff]   ;;  %v7649_v33 = vld [vmem:[%s12122_s2 + $0x64c] ss:$16 sps:$4 sm:$0xff]  }
  0xc1   :  { %2364 = vmatprep.subr.bf16.mxu1 %v7604_v34  ;;  %v7623_v31 = vld [vmem:[%s12122_s2 + $0x448] ss:$16 sps:$4 sm:$0xff]   ;;  %v7628_v34 = vld [vmem:[%s12122_s2 + $0x42c] ss:$16 sps:$4 sm:$0xff]  }
  0xc2   :  { %2058 = vmatmul.mubr.bf16.vlgmr.msra.gmra.mxu0 %v8825_v14  ;;  %v7622_v14 = vld [vmem:[%s12122_s2 + $0x6ac] ss:$16 sps:$4 sm:$0xff]  }
  0xc3   :  { %2171 = vmatmul.mubr.bf16.vlgmr.msra.gmra.mxu1 %v8827_v15  ;;  %2252 = vmatpush1.bf16.msra.mxu0 %v7599_v59  ;;  %v7608_v15 = vld [vmem:[%s12122_s2 + $0x4a8] ss:$16 sps:$4 sm:$0xff]  }
  0xc4   :  { %2365 = vmatpush1.bf16.msra.mxu1 %v7602_v61  ;;  %2253 = vmatprep.subr.bf16.mxu0 %v7607_v7  ;;  %v7626_v59 = vld [vmem:[%s12122_s2 + $0x428] ss:$16 sps:$4 sm:$0xff]  }
  0xc5   :  { %2067 = vmatprep.mubr.bf16.mxu0 %v8844_v21  ;;  %2180 = vmatprep.mubr.bf16.mxu1 %v8849_v23  ;;  %v7616_v21 = vld [vmem:[%s12122_s2 + $0x48c] ss:$16 sps:$4 sm:$0xff]   ;;  %v7635_v61 = vld [vmem:[%s12122_s2 + $0x5e8] ss:$16 sps:$4 sm:$0xff]  }
  0xc6   :  { %2366 = vmatprep.subr.bf16.mxu1 %v7613_v53  ;;  %v7631_v23 = vld [vmem:[%s12122_s2 + $0x68c] ss:$16 sps:$4 sm:$0xff]   ;;  %v7665_v7 = vld [vmem:[%s12122_s2 + $0x608] ss:$16 sps:$4 sm:$0xff]  }
  0xc7   :  { %2254 = vmatpush1.bf16.msra.mxu0 %v7605_v54  ;;  %v7641_v53 = vld [vmem:[%s12122_s2 + $0x5c8] ss:$16 sps:$4 sm:$0xff]   ;;  %v7652_v54 = vld [vmem:[%s12122_s2 + $0x58c] ss:$16 sps:$4 sm:$0xff]  }
  0xc8   :  { %2367 = vmatpush1.bf16.msra.mxu1 %v7611_v22  ;;  %2255 = vmatprep.subr.bf16.mxu0 %v7610_v56  ;;  %v7664_v22 = vld [vmem:[%s12122_s2 + $0x52c] ss:$16 sps:$4 sm:$0xff]  }
  0xc9   :  { %2368 = vmatprep.subr.bf16.mxu1 %v7622_v14  ;;  %v9817_v14 = vld [vmem:[%s12125_s3] sm:$0xf] }
  0xca   :  { %2068 = vmatmul.mubr.bf16.gmra.mxu0 %v8891_v36  ;;  %v7619_v36 = vld [vmem:[%s12122_s2 + $0x46c] ss:$16 sps:$4 sm:$0xff]   ;;  %12163 = vst [vmem:[#allocation9_spill] sm:$0xff] %v9817_v14 }
  0xcb   :  { %2181 = vmatmul.mubr.bf16.gmra.mxu1 %v8893_v37  ;;  %2256 = vmatpush1.bf16.msra.mxu0 %v7608_v15  ;;  %v7617_v37 = vld [vmem:[%s12122_s2 + $0x468] ss:$16 sps:$4 sm:$0xff]  }
  0xcc   :  { %2077 = vmatprep.mubr.bf16.mxu0 %v8898_v39  ;;  %2257 = vmatprep.subr.bf16.mxu0 %v7616_v21  ;;  %v7625_v39 = vld [vmem:[%s12122_s2 + $0x44c] ss:$16 sps:$4 sm:$0xff]   ;;  %v7671_v15 = vld [vmem:[%s12124_s4 + $0x70] ss:$8 sps:$4 sm:$0xff]  }
  0xcd   :  { %2190 = vmatprep.mubr.bf16.mxu1 %v8903_v41  ;;  %2369 = vmatpush1.bf16.msra.mxu1 %v7620_v9  ;;  %v7640_v41 = vld [vmem:[%s12122_s2 + $0x66c] ss:$16 sps:$4 sm:$0xff]  }
  0xce   :  { %2370 = vmatprep.subr.bf16.mxu1 %v7631_v23  ;;  %v7676_v9 = vld [vmem:[%s12124_s4 + $0x64] ss:$8 sps:$4 sm:$0xff]  }
  0xcf   :  { %2258 = vmatpush1.bf16.msra.mxu0 %v7614_v45 }
  0xd0   :  { %2259 = vmatprep.subr.bf16.mxu0 %v7619_v36 }
  0xd1   :  { %2371 = vmatpush1.bf16.msra.mxu1 %v7629_v10 }
  0xd2   :  { %2078 = vmatmul.mubr.bf16.gmra.mxu0 %v8948_v57  ;;  %2372 = vmatprep.subr.bf16.mxu1 %v7640_v41  ;;  %v7634_v57 = vld [vmem:[%s12122_s2 + $0x40c] ss:$16 sps:$4 sm:$0xff]  }
  0xd3   :  { %2191 = vmatmul.mubr.bf16.gmra.mxu1 %v8950_v58  ;;  %2260 = vmatpush1.bf16.msra.mxu0 %v7617_v37  ;;  %v7647_v58 = vld [vmem:[%s12122_s2 + $0x648] ss:$16 sps:$4 sm:$0xff]  }
  0xd4   :  { %2087 = vmatprep.mubr.bf16.mxu0 %v8955_v60  ;;  %2261 = vmatprep.subr.bf16.mxu0 %v7625_v39  ;;  %v7658_v60 = vld [vmem:[%s12122_s2 + $0x62c] ss:$16 sps:$4 sm:$0xff]   ;;  %v7674_v39 = vld [vmem:[%s12124_s4 + $0x60] ss:$8 sps:$4 sm:$0xff]  }
  0xd5   :  { %2200 = vmatprep.mubr.bf16.mxu1 %v8960_v62  ;;  %2373 = vmatpush1.bf16.msra.mxu1 %v7638_v30  ;;  %v7632_v62 = vld [vmem:[%s12122_s2 + $0x408] ss:$16 sps:$4 sm:$0xff]  }
  0xd6   :  { %2374 = vmatprep.subr.bf16.mxu1 %v7649_v33 }
  0xd7   :  { %2262 = vmatpush1.bf16.msra.mxu0 %v7623_v31 }
  0xd8   :  { %2263 = vmatprep.subr.bf16.mxu0 %v7628_v34 }
  0xd9   :  { %2375 = vmatpush1.bf16.msra.mxu1 %v7647_v58 }
  0xda   :  { %2088 = vmatmul.mubr.bf16.gmra.mxu0 %v9005_v12  ;;  %v7637_v12 = vld [vmem:[%s12122_s2 + $0x5ec] ss:$16 sps:$4 sm:$0xff]   ;;  %2376 = vmatprep.subr.bf16.mxu1 %v7658_v60 }
  0xdb   :  { %2201 = vmatmul.mubr.bf16.gmra.mxu1 %v9007_v13  ;;  %2264 = vmatpush1.bf16.msra.mxu0 %v7626_v59  ;;  %v7656_v13 = vld [vmem:[%s12122_s2 + $0x628] ss:$16 sps:$4 sm:$0xff]  }
  0xdc   :  { %2097 = vmatprep.mubr.bf16.mxu0 %v9012_v17  ;;  %2265 = vmatprep.subr.bf16.mxu0 %v7634_v57  ;;  %v7643_v17 = vld [vmem:[%s12122_s2 + $0x5cc] ss:$16 sps:$4 sm:$0xff]   ;;  %v7677_v59 = vld [vmem:[%s12124_s4 + $0x50] ss:$8 sps:$4 sm:$0xff]  }
  0xdd   :  { %2210 = vmatprep.mubr.bf16.mxu1 %v9017_v19  ;;  %2377 = vmatpush1.bf16.msra.mxu1 %v7656_v13  ;;  %v7667_v19 = vld [vmem:[%s12122_s2 + $0x60c] ss:$16 sps:$4 sm:$0xff]  }
  0xde   :  { %2378 = vmatprep.subr.bf16.mxu1 %v7667_v19  ;;  %v7682_v57 = vld [vmem:[%s12124_s4 + $0x44] ss:$8 sps:$4 sm:$0xff]  }
  0xdf   :  { %2266 = vmatpush1.bf16.msra.mxu0 %v7632_v62 }
  0xe0   :  { %2267 = vmatprep.subr.bf16.mxu0 %v7637_v12 }
  0xe1   :  { %2379 = vmatpush1.bf16.msra.mxu1 %v7665_v7 }
  0xe2   :  { %2098 = vmatmul.mubr.bf16.gmra.mxu0 %v9062_v35  ;;  %v7646_v35 = vld [vmem:[%s12122_s2 + $0x5ac] ss:$16 sps:$4 sm:$0xff]  }
  0xe3   :  { %2211 = vmatmul.mubr.bf16.gmra.mxu1 %v9064_v38  ;;  %2268 = vmatpush2.bf16.msra.mxu0 %v7635_v61  ;;  %v7644_v38 = vld [vmem:[%s12122_s2 + $0x5a8] ss:$16 sps:$4 sm:$0xff]  }
  0xe4   :  { %2107 = vmatprep.mubr.bf16.mxu0 %v9069_v42  ;;  %2269 = vmatprep.subr.bf16.mxu0 %v7643_v17  ;;  %v7650_v42 = vld [vmem:[%s12122_s2 + $0x588] ss:$16 sps:$4 sm:$0xff]  }
  0xe5   :  { %2220 = vmatprep.mubr.bf16.mxu1 %v9074_v44  ;;  %v7655_v44 = vld [vmem:[%s12122_s2 + $0x56c] ss:$16 sps:$4 sm:$0xff]   ;;  %v7680_v61 = vld [vmem:[%s12124_s4 + $0x40] ss:$8 sps:$4 sm:$0xff]  }
  0xe7   :  { %2270 = vmatpush2.bf16.msra.mxu0 %v7641_v53 }
  0xe8   :  { %2271 = vmatprep.subr.bf16.mxu0 %v7646_v35 }
  0xea   :  { %2108 = vmatmul.mubr.bf16.gmra.mxu0 %v9119_v0  ;;  %v7653_v0 = vld [vmem:[%s12122_s2 + $0x568] ss:$16 sps:$4 sm:$0xff]  }
  0xeb   :  { %2221 = vmatmul.mubr.bf16.gmra.mxu1 %v9121_v1  ;;  %2272 = vmatpush2.bf16.msra.mxu0 %v7644_v38  ;;  %v7661_v1 = vld [vmem:[%s12122_s2 + $0x54c] ss:$16 sps:$4 sm:$0xff]   ;;  %v7683_v38 = vld [vmem:[%s12124_s4 + $0x30] ss:$8 sps:$4 sm:$0xff]  }
  0xec   :  { %2117 = vmatprep.mubr.bf16.mxu0 %v9126_v3  ;;  %2273 = vmatprep.subr.bf16.mxu0 %v7652_v54  ;;  %v7659_v3 = vld [vmem:[%s12122_s2 + $0x548] ss:$16 sps:$4 sm:$0xff]   ;;  %v7688_v54 = vld [vmem:[%s12124_s4 + $0x24] ss:$8 sps:$4 sm:$0xff]  }
  0xed   :  { %2230 = vmatprep.mubr.bf16.mxu1 %v9131_v5  ;;  %v433_v5 = vlaneseq }
  0xef   :  { %2274 = vmatpush2.bf16.msra.mxu0 %v7650_v42 }
  0xf0   :  { %2275 = vmatprep.subr.bf16.mxu0 %v7655_v44 }
  0xf2   :  { %2118 = vmatmul.mubr.bf16.gmra.mxu0 %v9167_v24  ;;  %v7662_v24 = vld [vmem:[%s12122_s2 + $0x528] ss:$16 sps:$4 sm:$0xff]  }
  0xf3   :  { %2231 = vmatmul.mubr.bf16.gmra.mxu1 %v9169_v25  ;;  %2276 = vmatpush2.bf16.msra.mxu0 %v7653_v0  ;;  %v9799_v25 = vshrl.u32 %v433_v5, 7  ;;  %v7686_v5 = vld [vmem:[%s12124_s4 + $0x20] ss:$8 sps:$4 sm:$0xff]  }
  0xf4   :  { %2127 = vmatprep.mubr.bf16.mxu0 %v9174_v27  ;;  %2277 = vmatprep.subr.bf16.mxu0 %v7661_v1  ;;  %v7670_v27 = vld [vmem:[%s12122_s2 + $0x50c] ss:$16 sps:$4 sm:$0xff]  }
  0xf5   :  { %2240 = vmatprep.mubr.bf16.mxu1 %v9179_v29  ;;  %12161 = vst [vmem:[#allocation7_spill] sm:$0xff] %v9799_v25  ;;  %v7668_v29 = vld [vmem:[%s12122_s2 + $0x508] ss:$16 sps:$4 sm:$0xff]   ;;  %v9811_v56 = vsub.s32 0, %v9799_v25 }
  0xf7   :  { %2278 = vmatpush2.bf16.msra.mxu0 %v7659_v3  ;;  %12162 = vst [vmem:[#allocation8_spill] sm:$0xff] %v9811_v56 }
  0xf8   :  { %2279 = vmatprep.subr.bf16.mxu0 %v7664_v22 }
  0xfa   :  { %2128 = vmatmul.mubr.bf16.gmra.mxu0 %v9209_v46  ;;  %v7673_v46 = vld [vmem:[%s12124_s4 + $0x74] ss:$8 sps:$4 sm:$0xff]  }
  0xfb   :  { %2241 = vmatmul.mubr.bf16.gmra.mxu1 %v9211_v47  ;;  %2280 = vmatpush2.bf16.msra.mxu0 %v7662_v24  ;;  %v9823_v47 = vsub.s32 1, %v9799_v25 }
  0xfc   :  { %2283 = vmatprep.mubr.bf16.mxu0 %v9216_v49  ;;  %2281 = vmatprep.subr.bf16.mxu0 %v7670_v27  ;;  %v9827_v49 = vrot.slane %v9817_v14, %v9811_v56 }
  0xfd   :  { %2396 = vmatprep.mubr.bf16.mxu1 %v12160_v8  ;;  %12164 = vst [vmem:[#allocation10_spill] sm:$0xff] %v9823_v47  ;;  %v9834_v21 = vrot.slane %v9817_v14, %v9823_v47 }
  0xff   :  { %2282 = vmatpush2.bf16.msra.mxu0 %v7668_v29 }
 0x100   :  { %2910 = vmatprep.subr.bf16.mxu0 %v7673_v46 }
 0x102   :  { %v1607_v23 = vpop.f32.mrf.mxu0  ;;  %2284 = vmatmul.mubr.bf16.vlgmr.msra.gmra.mxu0 %v9246_v4  ;;  %v7679_v4 = vld [vmem:[%s12124_s4 + $0x54] ss:$8 sps:$4 sm:$0xff]  }
 0x103   :  { %v1720_v45 = vpop.f32.mrf.mxu1  ;;  %2397 = vmatmul.mubr.bf16.vlgmr.msra.gmra.mxu1 %v9248_v6  ;;  %v1608_v36 = vadd.f32 %v1607_v23, %v9827_v49  ;;  %2293 = vmatprep.mubr.bf16.mxu0 %v9271_v20  ;;  %v7689_v23 = vld [vmem:[%s12124_s4 + $0x10] ss:$8 sps:$4 sm:$0xff]  }
 0x104   :  { %2406 = vmatprep.mubr.bf16.mxu1 %v12160_v8  ;;  %v1609_v37 = vpop.f32.mrf.mxu0  ;;  %2911 = vmatpush1.bf16.msra.mxu0 %v7671_v15 }
 0x105   :  { %v1722_v10 = vpop.f32.mrf.mxu1  ;;  %v9847_v41 = vadd.f32 %v1720_v45, %v1608_v36  ;;  %v1610_v30 = vadd.f32 %v1609_v37, %v9834_v21  ;;  %2912 = vmatprep.subr.bf16.mxu0 %v7676_v9  ;;  %v7694_v45 = vld [vmem:[%s12124_s4 + $0x4] ss:$8 sps:$4 sm:$0xff]  }
 0x106   :  { %v9853_v6 = vpop.f32.mrf.mxu0 }
 0x107   :  { %v9855_v20 = vpop.f32.mrf.mxu1  ;;  %v9857_v31 = vadd.f32 %v1722_v10, %v1610_v30 }
 0x108   :  { %v9859_v33 = vpop.f32.mrf.mxu0  ;;  %2913 = vmatpush1.bf16.msra.mxu0 %v7674_v39 }
 0x109   :  { %v9861_v34 = vpop.f32.mrf.mxu1  ;;  %2914 = vmatprep.subr.bf16.mxu0 %v7679_v4  ;;  %v7692_v4 = vld [vmem:[%s12124_s4] ss:$8 sps:$4 sm:$0xff]  }
 0x10a   :  { %v1617_v58 = vpop.f32.mrf.mxu0  ;;  %2294 = vmatmul.mubr.bf16.gmra.mxu0 %v9301_v40  ;;  %v7685_v40 = vld [vmem:[%s12124_s4 + $0x34] ss:$8 sps:$4 sm:$0xff]  }
 0x10b   :  { %v1730_v60 = vpop.f32.mrf.mxu1  ;;  %2407 = vmatmul.mubr.bf16.gmra.mxu1 %v9303_v43  ;;  %v1618_v62 = vadd.f32 %v1617_v58, %v9827_v49  ;;  %2303 = vmatprep.mubr.bf16.mxu0 %v9320_v55 }
 0x10c   :  { %2416 = vmatprep.mubr.bf16.mxu1 %v12160_v8  ;;  %v1619_v12 = vpop.f32.mrf.mxu0  ;;  %2915 = vmatpush1.bf16.msra.mxu0 %v7677_v59 }
 0x10d   :  { %v1732_v13 = vpop.f32.mrf.mxu1  ;;  %v9877_v17 = vadd.f32 %v1730_v60, %v1618_v62  ;;  %v1620_v19 = vadd.f32 %v1619_v12, %v9834_v21  ;;  %2916 = vmatprep.subr.bf16.mxu0 %v7682_v57 }
 0x10e   :  { %v9883_v43 = vpop.f32.mrf.mxu0 }
 0x10f   :  { %v9885_v55 = vpop.f32.mrf.mxu1  ;;  %v9887_v7 = vadd.f32 %v1732_v13, %v1620_v19  ;;  %v7700_v19 = vld [vmem:[%s12124_s4 + $0xe4] ss:$8 sps:$4 sm:$0xff]  }
 0x110   :  { %v9889_v53 = vpop.f32.mrf.mxu0  ;;  %2917 = vmatpush1.bf16.msra.mxu0 %v7680_v61  ;;  %v7695_v61 = vld [vmem:[%s12124_s4 + $0xf0] ss:$8 sps:$4 sm:$0xff]  }
 0x111   :  { %v9891_v35 = vpop.f32.mrf.mxu1  ;;  %2918 = vmatprep.subr.bf16.mxu0 %v7685_v40 }
 0x112   :  { %v1627_v42 = vpop.f32.mrf.mxu0  ;;  %2304 = vmatmul.mubr.bf16.gmra.mxu0 %v9350_v11  ;;  %v7691_v11 = vld [vmem:[%s12124_s4 + $0x14] ss:$8 sps:$4 sm:$0xff]  }
 0x113   :  { %v1740_v44 = vpop.f32.mrf.mxu1  ;;  %2417 = vmatmul.mubr.bf16.gmra.mxu1 %v9352_v16  ;;  %v1628_v0 = vadd.f32 %v1627_v42, %v9827_v49  ;;  %2313 = vmatprep.mubr.bf16.mxu0 %v9372_v32  ;;  %v7719_v16 = vld [vmem:[%s12124_s4 + $0x170] ss:$8 sps:$4 sm:$0xff]   ;;  %v7721_v32 = vld [vmem:[%s12124_s4 + $0x174] ss:$8 sps:$4 sm:$0xff]  }
 0x114   :  { %2426 = vmatprep.mubr.bf16.mxu1 %v12160_v8  ;;  %v1629_v1 = vpop.f32.mrf.mxu0  ;;  %2919 = vmatpush1.bf16.msra.mxu0 %v7683_v38  ;;  %v7725_v42 = vld [vmem:[%s12124_s4 + $0x150] ss:$8 sps:$4 sm:$0xff]  }
 0x115   :  { %v1742_v3 = vpop.f32.mrf.mxu1  ;;  %v9907_v22 = vadd.f32 %v1740_v44, %v1628_v0  ;;  %v1630_v24 = vadd.f32 %v1629_v1, %v9834_v21  ;;  %2920 = vmatprep.subr.bf16.mxu0 %v7688_v54  ;;  %3023 = vmatprep.subr.bf16.mxu1 %v7721_v32  ;;  %v7727_v44 = vld [vmem:[%s12124_s4 + $0x154] ss:$8 sps:$4 sm:$0xff]  }
 0x116   :  { %v9919_v27 = vpop.f32.mrf.mxu0  ;;  %3024 = vmatpush1.bf16.msra.mxu1 %v7719_v16 }
 0x117   :  { %v9921_v29 = vpop.f32.mrf.mxu1  ;;  %v9923_v46 = vadd.f32 %v1742_v3, %v1630_v24  ;;  %v7703_v3 = vld [vmem:[%s12124_s4 + $0xd4] ss:$8 sps:$4 sm:$0xff]  }
 0x118   :  { %v9925_v15 = vpop.f32.mrf.mxu0  ;;  %2921 = vmatpush1.bf16.msra.mxu0 %v7686_v5 }
 0x119   :  { %v9927_v9 = vpop.f32.mrf.mxu1  ;;  %2922 = vmatprep.subr.bf16.mxu0 %v7691_v11 }
 0x11a   :  { %v1637_v36 = vpop.f32.mrf.mxu0  ;;  %2314 = vmatmul.mubr.bf16.gmra.mxu0 %v9405_v63  ;;  %v7697_v63 = vld [vmem:[%s12124_s4 + $0xf4] ss:$8 sps:$4 sm:$0xff]  }
 0x11b   :  { %v1750_v37 = vpop.f32.mrf.mxu1  ;;  %2427 = vmatmul.mubr.bf16.gmra.mxu1 %v9407_v2  ;;  %v1638_v10 = vadd.f32 %v1637_v36, %v9827_v49  ;;  %2323 = vmatprep.mubr.bf16.mxu0 %v9427_v26  ;;  %v7722_v2 = vld [vmem:[%s12124_s4 + $0x160] ss:$8 sps:$4 sm:$0xff]   ;;  %v7724_v26 = vld [vmem:[%s12124_s4 + $0x164] ss:$8 sps:$4 sm:$0xff]  }
 0x11c   :  { %2436 = vmatprep.mubr.bf16.mxu1 %v12160_v8  ;;  %v1639_v39 = vpop.f32.mrf.mxu0  ;;  %2923 = vmatpush1.bf16.msra.mxu0 %v7689_v23  ;;  %v7701_v23 = vld [vmem:[%s12124_s4 + $0xd0] ss:$8 sps:$4 sm:$0xff]  }
 0x11d   :  { %v1752_v30 = vpop.f32.mrf.mxu1  ;;  %v9943_v59 = vadd.f32 %v1750_v37, %v1638_v10  ;;  %v1640_v57 = vadd.f32 %v1639_v39, %v9834_v21  ;;  %2924 = vmatprep.subr.bf16.mxu0 %v7694_v45  ;;  %3025 = vmatprep.subr.bf16.mxu1 %v7724_v26  ;;  %v7706_v45 = vld [vmem:[%s12124_s4 + $0xc4] ss:$8 sps:$4 sm:$0xff]  }
 0x11e   :  { %v9955_v58 = vpop.f32.mrf.mxu0  ;;  %3026 = vmatpush1.bf16.msra.mxu1 %v7722_v2  ;;  %v12165_v10 = vld [vmem:[#allocation2_spill] sm:$0xff]  ;;  %v12166_v39 = vld [vmem:[#allocation3_spill] sm:$0xff] }
 0x11f   :  { %v9957_v60 = vpop.f32.mrf.mxu1  ;;  %v9959_v62 = vadd.f32 %v1752_v30, %v1640_v57  ;;  %3027 = vmatprep.subr.bf16.mxu1 %v7727_v44  ;;  %v7728_v57 = vld [vmem:[%s12124_s4 + $0x140] ss:$8 sps:$4 sm:$0xff]  }
 0x120   :  { %v9961_v12 = vpop.f32.mrf.mxu0  ;;  %2925 = vmatpush1.bf16.msra.mxu0 %v7692_v4  ;;  %v12167_v4 = vld [vmem:[#allocation4_spill] sm:$0xff] }
 0x121   :  { %v9963_v13 = vpop.f32.mrf.mxu1  ;;  %2926 = vmatprep.subr.bf16.mxu0 %v7697_v63  ;;  %v7730_v63 = vld [vmem:[%s12124_s4 + $0x144] ss:$8 sps:$4 sm:$0xff]  }
 0x122   :  { %v1647_v40 = vpop.f32.mrf.mxu0  ;;  %2324 = vmatmul.mubr.bf16.gmra.mxu0 %v9457_v51  ;;  %v7698_v51 = vld [vmem:[%s12124_s4 + $0xe0] ss:$8 sps:$4 sm:$0xff]   ;;  %3028 = vmatpush1.bf16.msra.mxu1 %v7725_v42 }
 0x123   :  { %v1760_v38 = vpop.f32.mrf.mxu1  ;;  %2437 = vmatmul.mubr.bf16.gmra.mxu1 %v9459_v52  ;;  %v1648_v54 = vadd.f32 %v1647_v40, %v9827_v49  ;;  %2333 = vmatprep.mubr.bf16.mxu0 %v9479_v18 }
 0x124   :  { %2446 = vmatprep.mubr.bf16.mxu1 %v12160_v8  ;;  %v1649_v0 = vpop.f32.mrf.mxu0  ;;  %2927 = vmatpush2.bf16.msra.mxu0 %v7695_v61  ;;  %v7704_v61 = vld [vmem:[%s12124_s4 + $0xc0] ss:$8 sps:$4 sm:$0xff]  }
 0x125   :  { %v1762_v1 = vpop.f32.mrf.mxu1  ;;  %v9985_v52 = vadd.f32 %v1760_v38, %v1648_v54  ;;  %v1650_v18 = vadd.f32 %v1649_v0, %v9834_v21  ;;  %2928 = vmatprep.subr.bf16.mxu0 %v7700_v19  ;;  %v7709_v38 = vld [vmem:[%s12124_s4 + $0xb4] ss:$8 sps:$4 sm:$0xff]   ;;  %3029 = vmatprep.subr.bf16.mxu1 %v7730_v63 }
 0x126   :  { %v9991_v5 = vpop.f32.mrf.mxu0  ;;  %3030 = vmatpush1.bf16.msra.mxu1 %v7728_v57  ;;  %v7710_v57 = vld [vmem:[%s12124_s4 + $0xa0] ss:$8 sps:$4 sm:$0xff]  }
 0x127   :  { %v9993_v24 = vpop.f32.mrf.mxu1  ;;  %v9995_v11 = vadd.f32 %v1762_v1, %v1650_v18  ;;  %v7712_v18 = vld [vmem:[%s12124_s4 + $0xa4] ss:$8 sps:$4 sm:$0xff]  }
 0x128   :  { %v9997_v16 = vpop.f32.mrf.mxu0  ;;  %2929 = vmatpush2.bf16.msra.mxu0 %v7698_v51  ;;  %v7707_v51 = vld [vmem:[%s12124_s4 + $0xb0] ss:$8 sps:$4 sm:$0xff]  }
 0x129   :  { %v9999_v32 = vpop.f32.mrf.mxu1  ;;  %2930 = vmatprep.subr.bf16.mxu0 %v7703_v3  ;;  %v7731_v3 = vld [vmem:[%s12124_s4 + $0x130] ss:$8 sps:$4 sm:$0xff]  }
 0x12a   :  { %v1657_v36 = vpop.f32.mrf.mxu0  ;;  %2334 = vmatmul.mubr.bf16.gmra.mxu0 %v12165_v10  ;;  %v12169_v10 = vld [vmem:[#allocation6_spill] sm:$0xff] }
 0x12b   :  { %v1770_v37 = vpop.f32.mrf.mxu1  ;;  %2447 = vmatmul.mubr.bf16.gmra.mxu1 %v12166_v39  ;;  %v1658_v30 = vadd.f32 %v1657_v36, %v9827_v49  ;;  %2343 = vmatprep.mubr.bf16.mxu0 %v12167_v4 }
 0x12c   :  { %2456 = vmatprep.mubr.bf16.mxu1 %v12160_v8  ;;  %v1659_v2 = vpop.f32.mrf.mxu0  ;;  %2931 = vmatpush2.bf16.msra.mxu0 %v7701_v23  ;;  %v7733_v23 = vld [vmem:[%s12124_s4 + $0x134] ss:$8 sps:$4 sm:$0xff]  }
 0x12d   :  { %v1772_v26 = vpop.f32.mrf.mxu1  ;;  %v10021_v19 = vadd.f32 %v1770_v37, %v1658_v30  ;;  %v1660_v40 = vadd.f32 %v1659_v2, %v9834_v21  ;;  %2932 = vmatprep.subr.bf16.mxu0 %v7706_v45  ;;  %v12168_v37 = vld [vmem:[#allocation5_spill] sm:$0xff]  ;;  %3031 = vmatprep.subr.bf16.mxu1 %v7733_v23  ;;  %v7734_v23 = vld [vmem:[%s12124_s4 + $0x120] ss:$8 sps:$4 sm:$0xff]  }
 0x12e   :  { %v10027_v54 = vpop.f32.mrf.mxu0  ;;  %3032 = vmatpush1.bf16.msra.mxu1 %v7731_v3  ;;  %v7718_v3 = vld [vmem:[%s12124_s4 + $0x84] ss:$8 sps:$4 sm:$0xff]  }
 0x12f   :  { %v10029_v42 = vpop.f32.mrf.mxu1  ;;  %v10031_v44 = vadd.f32 %v1772_v26, %v1660_v40  ;;  %v7715_v26 = vld [vmem:[%s12124_s4 + $0x94] ss:$8 sps:$4 sm:$0xff]  }
 0x130   :  { %v10033_v0 = vpop.f32.mrf.mxu0  ;;  %2933 = vmatpush2.bf16.msra.mxu0 %v7704_v61 }
 0x131   :  { %v10035_v1 = vpop.f32.mrf.mxu1  ;;  %2934 = vmatprep.subr.bf16.mxu0 %v7709_v38 }
 0x132   :  { %v1667_v45 = vpop.f32.mrf.mxu0  ;;  %2344 = vmatmul.mubr.bf16.gmra.mxu0 %v12168_v37 }
 0x133   :  { %v1780_v36 = vpop.f32.mrf.mxu1  ;;  %2457 = vmatmul.mubr.bf16.gmra.mxu1 %v12169_v10  ;;  %v1668_v39 = vadd.f32 %v1667_v45, %v9827_v49  ;;  %2353 = vmatprep.mubr.bf16.mxu0 %v9583_v28  ;;  %v7736_v45 = vld [vmem:[%s12124_s4 + $0x124] ss:$8 sps:$4 sm:$0xff]  }
 0x134   :  { %2466 = vmatprep.mubr.bf16.mxu1 %v12160_v8  ;;  %v1669_v30 = vpop.f32.mrf.mxu0  ;;  %2935 = vmatpush2.bf16.msra.mxu0 %v7707_v51 }
 0x135   :  { %v1782_v4 = vpop.f32.mrf.mxu1  ;;  %v10057_v63 = vadd.f32 %v1780_v36, %v1668_v39  ;;  %v1670_v2 = vadd.f32 %v1669_v30, %v9834_v21  ;;  %2936 = vmatprep.subr.bf16.mxu0 %v7712_v18  ;;  %v7713_v18 = vld [vmem:[%s12124_s4 + $0x90] ss:$8 sps:$4 sm:$0xff]   ;;  %3033 = vmatprep.subr.bf16.mxu1 %v7736_v45  ;;  %v7739_v45 = vld [vmem:[%s12124_s4 + $0x114] ss:$8 sps:$4 sm:$0xff]  }
 0x136   :  { %v10063_v28 = vpop.f32.mrf.mxu0  ;;  %3034 = vmatpush1.bf16.msra.mxu1 %v7734_v23 }
 0x137   :  { %v10065_v61 = vpop.f32.mrf.mxu1  ;;  %v10067_v40 = vadd.f32 %v1782_v4, %v1670_v2  ;;  %v7716_v4 = vld [vmem:[%s12124_s4 + $0x80] ss:$8 sps:$4 sm:$0xff]   ;;  %3035 = vmatprep.subr.bf16.mxu1 %v7739_v45 }
 0x138   :  { %v10069_v38 = vpop.f32.mrf.mxu0  ;;  %2937 = vmatpush2.bf16.msra.mxu0 %v7710_v57 }
 0x139   :  { %v10071_v51 = vpop.f32.mrf.mxu1  ;;  %2938 = vmatprep.subr.bf16.mxu0 %v7715_v26 }
 0x13a   :  { %v1677_v36 = vpop.f32.mrf.mxu0  ;;  %2354 = vmatmul.mubr.bf16.gmra.mxu0 %v9607_v48 }
 0x13b   :  { %v1790_v37 = vpop.f32.mrf.mxu1  ;;  %2467 = vmatmul.mubr.bf16.gmra.mxu1 %v9609_v50  ;;  %v1678_v10 = vadd.f32 %v1677_v36, %v9827_v49 }
 0x13c   :  { %v1679_v39 = vpop.f32.mrf.mxu0  ;;  %2939 = vmatpush2.bf16.msra.mxu0 %v7713_v18  ;;  %v7737_v18 = vld [vmem:[%s12124_s4 + $0x110] ss:$8 sps:$4 sm:$0xff]  }
 0x13d   :  { %v1792_v30 = vpop.f32.mrf.mxu1  ;;  %v10091_v57 = vadd.f32 %v1790_v37, %v1678_v10  ;;  %v1680_v2 = vadd.f32 %v1679_v39, %v9834_v21  ;;  %2940 = vmatprep.subr.bf16.mxu0 %v7718_v3  ;;  %v1612_v3 = vadd.f32 %v9853_v6, %v9827_v49  ;;  %3036 = vmatpush1.bf16.msra.mxu1 %v7737_v18  ;;  %v7742_v18 = vld [vmem:[%s12124_s4 + $0x104] ss:$8 sps:$4 sm:$0xff]  }
 0x13e   :  { %v10094_v26 = vpop.f32.mrf.mxu0  ;;  %v1614_v39 = vadd.f32 %v9859_v33, %v9834_v21  ;;  %v1622_v33 = vadd.f32 %v9883_v43, %v9827_v49  ;;  %3037 = vmatprep.subr.bf16.mxu1 %v7742_v18 }
 0x13f   :  { %12170 = vst [vmem:[#allocation2_spill] sm:$0xff] %v10091_v57  ;;  %v10096_v48 = vpop.f32.mrf.mxu1  ;;  %v10098_v50 = vadd.f32 %v1792_v30, %v1680_v2  ;;  %v1725_v47 = vadd.f32 %v9855_v20, %v1612_v3 }
 0x140   :  { %12171 = vst [vmem:[#allocation3_spill] sm:$0xff] %v10096_v48  ;;  %v10106_v23 = vpop.f32.mrf.mxu0  ;;  %2941 = vmatpush2.bf16.msra.mxu0 %v7716_v4  ;;  %v1735_v43 = vadd.f32 %v9885_v55, %v1622_v33 }
 0x141   :  { %12172 = vst [vmem:[#allocation4_spill] sm:$0xff] %v10098_v50  ;;  %v10108_v36 = vpop.f32.mrf.mxu1 }
 0x142   :  { %12173 = vst [vmem:[#allocation5_spill] sm:$0xff] %v10108_v36  ;;  %v1833_v37 = vpop.f32.mrf.mxu0  ;;  %v1727_v36 = vadd.f32 %v9861_v34, %v1614_v39 }
 0x143   :  { %v1946_v10 = vpop.f32.mrf.mxu1  ;;  %v1834_v8 = vadd.f32 %v1833_v37, %v9847_v41  ;;  %v7740_v41 = vld [vmem:[%s12124_s4 + $0x100] ss:$8 sps:$4 sm:$0xff]  }
 0x144   :  { %v1835_v30 = vpop.f32.mrf.mxu0  ;;  %3038 = vmatpush1.bf16.msra.mxu1 %v7740_v41 }
 0x145   :  { %v1948_v2 = vpop.f32.mrf.mxu1  ;;  %v1836_v56 = vadd.f32 %v1835_v30, %v9857_v31  ;;  %v1947_v31 = vadd.f32 %v1946_v10, %v1834_v8  ;;  %v7743_v10 = vld [vmem:[%s12124_s4 + $0x180] ss:$8 sps:$4 sm:$0xff]  }
 0x146   :  { %v1837_v14 = vpop.f32.mrf.mxu0 }
 0x147   :  { %v1950_v4 = vpop.f32.mrf.mxu1  ;;  %v1838_v6 = vadd.f32 %v1837_v14, %v1725_v47  ;;  %v1949_v50 = vadd.f32 %v1948_v2, %v1836_v56  ;;  %v1624_v14 = vadd.f32 %v9889_v53, %v9834_v21  ;;  %v7745_v56 = vld [vmem:[%s12124_s4 + $0x184] ss:$8 sps:$4 sm:$0xff]   ;;  %v2477_v53 = vmax.f32 %v1947_v31, 0.0 }
 0x148   :  { %v1839_v45 = vpop.f32.mrf.mxu0  ;;  %3053 = vmatprep.subr.bf16.mxu1 %v7745_v56 }
 0x149   :  { %v1952_v57 = vpop.f32.mrf.mxu1  ;;  %v1951_v20 = vadd.f32 %v1950_v4, %v1838_v6  ;;  %v1840_v3 = vadd.f32 %v1839_v45, %v1727_v36  ;;  %v2478_v36 = vmax.f32 %v1949_v50, 0.0  ;;  %v1737_v45 = vadd.f32 %v9891_v35, %v1624_v14  ;;  %3054 = vmatpush2.bf16.msra.mxu1 %v7743_v10 }
 0x14a   :  { %v1843_v37 = vpop.f32.mrf.mxu0  ;;  %v1634_v35 = vadd.f32 %v9925_v15, %v9834_v21 }
 0x14b   :  { %v1956_v34 = vpop.f32.mrf.mxu1  ;;  %v1953_v47 = vadd.f32 %v1952_v57, %v1840_v3  ;;  %v2481_v39 = vmax.f32 %v1951_v20, 0.0  ;;  %v1844_v57 = vadd.f32 %v1843_v37, %v9877_v17 }
 0x14c   :  { %v1845_v30 = vpop.f32.mrf.mxu0 }
 0x14d   :  { %v1958_v48 = vpop.f32.mrf.mxu1  ;;  %v2482_v2 = vmax.f32 %v1953_v47, 0.0  ;;  %v1846_v8 = vadd.f32 %v1845_v30, %v9887_v7  ;;  %v2541_v55 = vpack.c.bf16 %v2481_v39, %v2477_v53  ;;  %v1632_v7 = vadd.f32 %v9919_v27, %v9827_v49 }
 0x14e   :  { %v1847_v4 = vpop.f32.mrf.mxu0  ;;  %v1957_v31 = vadd.f32 %v1956_v34, %v1844_v57  ;;  %v1747_v53 = vadd.f32 %v9927_v9, %v1634_v35 }
 0x14f   :  { %v1960_v6 = vpop.f32.mrf.mxu1  ;;  %v1848_v18 = vadd.f32 %v1847_v4, %v1735_v43  ;;  %v2542_v20 = vpack.c.bf16 %v2482_v2, %v2478_v36  ;;  %v1959_v3 = vadd.f32 %v1958_v48, %v1846_v8  ;;  %v1745_v43 = vadd.f32 %v9921_v29, %v1632_v7 }
 0x150   :  { %v1849_v50 = vpop.f32.mrf.mxu0  ;;  %v2485_v48 = vmax.f32 %v1957_v31, 0.0 }
 0x151   :  { %v1962_v33 = vpop.f32.mrf.mxu1  ;;  %v1961_v41 = vadd.f32 %v1960_v6, %v1848_v18  ;;  %v1850_v47 = vadd.f32 %v1849_v50, %v1737_v45  ;;  %2942 = vmatprep.mubr.bf16.mxu0 %v2542_v20  ;;  %v2486_v36 = vmax.f32 %v1959_v3, 0.0  ;;  %v1642_v18 = vadd.f32 %v9955_v58, %v9827_v49 }
 0x152   :  { %v1853_v17 = vpop.f32.mrf.mxu0  ;;  %2943 = vmatmul.mubr.bf16.vlgmr.msra.gmra.mxu0 %v2541_v55 }
 0x153   :  { %v1966_v37 = vpop.f32.mrf.mxu1  ;;  %v1963_v14 = vadd.f32 %v1962_v33, %v1850_v47  ;;  %v2489_v30 = vmax.f32 %v1961_v41, 0.0  ;;  %v1854_v8 = vadd.f32 %v1853_v17, %v9907_v22  ;;  %v1644_v22 = vadd.f32 %v9961_v12, %v9834_v21 }
 0x154   :  { %v1855_v56 = vpop.f32.mrf.mxu0  ;;  %v1755_v47 = vadd.f32 %v9957_v60, %v1642_v18 }
 0x155   :  { %v1968_v39 = vpop.f32.mrf.mxu1  ;;  %v2490_v2 = vmax.f32 %v1963_v14, 0.0  ;;  %v1856_v27 = vadd.f32 %v1855_v56, %v9923_v46  ;;  %v2545_v15 = vpack.c.bf16 %v2489_v30, %v2485_v48  ;;  %v1967_v46 = vadd.f32 %v1966_v37, %v1854_v8 }
 0x156   :  { %v1857_v34 = vpop.f32.mrf.mxu0  ;;  %v1757_v56 = vadd.f32 %v9963_v13, %v1644_v22 }
 0x157   :  { %v1970_v10 = vpop.f32.mrf.mxu1  ;;  %v1858_v57 = vadd.f32 %v1857_v34, %v1745_v43  ;;  %v2546_v4 = vpack.c.bf16 %v2490_v2, %v2486_v36  ;;  %v1969_v29 = vadd.f32 %v1968_v39, %v1856_v27  ;;  %v2493_v35 = vmax.f32 %v1967_v46, 0.0 }
 0x158   :  { %v1859_v6 = vpop.f32.mrf.mxu0  ;;  %v1652_v27 = vadd.f32 %v9991_v5, %v9827_v49 }
 0x159   :  { %v1972_v45 = vpop.f32.mrf.mxu1  ;;  %v1971_v20 = vadd.f32 %v1970_v10, %v1858_v57  ;;  %v1860_v55 = vadd.f32 %v1859_v6, %v1747_v53  ;;  %2952 = vmatprep.mubr.bf16.mxu0 %v2546_v4  ;;  %v2494_v31 = vmax.f32 %v1969_v29, 0.0 }
 0x15a   :  { %v1863_v50 = vpop.f32.mrf.mxu0  ;;  %2953 = vmatmul.mubr.bf16.gmra.mxu0 %v2545_v15  ;;  %v1765_v15 = vadd.f32 %v9993_v24, %v1652_v27 }
 0x15b   :  { %v1976_v33 = vpop.f32.mrf.mxu1  ;;  %v1973_v9 = vadd.f32 %v1972_v45, %v1860_v55  ;;  %v2497_v7 = vmax.f32 %v1971_v20, 0.0  ;;  %v1864_v14 = vadd.f32 %v1863_v50, %v9943_v59  ;;  %v1654_v59 = vadd.f32 %v9997_v16, %v9834_v21 }
 0x15c   :  { %v1865_v3 = vpop.f32.mrf.mxu0 }
 0x15d   :  { %v1978_v41 = vpop.f32.mrf.mxu1  ;;  %v2498_v17 = vmax.f32 %v1973_v9, 0.0  ;;  %v1866_v58 = vadd.f32 %v1865_v3, %v9959_v62  ;;  %v2549_v12 = vpack.c.bf16 %v2497_v7, %v2493_v35  ;;  %v1977_v62 = vadd.f32 %v1976_v33, %v1864_v14 }
 0x15e   :  { %v1867_v37 = vpop.f32.mrf.mxu0  ;;  %v1767_v46 = vadd.f32 %v9999_v32, %v1654_v59  ;;  %v1662_v7 = vadd.f32 %v10027_v54, %v9827_v49 }
 0x15f   :  { %v1980_v30 = vpop.f32.mrf.mxu1  ;;  %v1868_v39 = vadd.f32 %v1867_v37, %v1755_v47  ;;  %v2550_v43 = vpack.c.bf16 %v2498_v17, %v2494_v31  ;;  %v1979_v60 = vadd.f32 %v1978_v41, %v1866_v58  ;;  %v2501_v18 = vmax.f32 %v1977_v62, 0.0 }
 0x160   :  { %v1869_v36 = vpop.f32.mrf.mxu0  ;;  %v1775_v14 = vadd.f32 %v10029_v42, %v1662_v7 }
 0x161   :  { %v1982_v2 = vpop.f32.mrf.mxu1  ;;  %v1981_v48 = vadd.f32 %v1980_v30, %v1868_v39  ;;  %v1870_v8 = vadd.f32 %v1869_v36, %v1757_v56  ;;  %2962 = vmatprep.mubr.bf16.mxu0 %v2550_v43  ;;  %v2502_v6 = vmax.f32 %v1979_v60, 0.0 }
 0x162   :  { %v1873_v34 = vpop.f32.mrf.mxu0  ;;  %2963 = vmatmul.mubr.bf16.gmra.mxu0 %v2549_v12 }
 0x163   :  { %v1986_v10 = vpop.f32.mrf.mxu1  ;;  %v1983_v13 = vadd.f32 %v1982_v2, %v1870_v8  ;;  %v2505_v53 = vmax.f32 %v1981_v48, 0.0  ;;  %v1874_v29 = vadd.f32 %v1873_v34, %v9985_v52  ;;  %v1664_v52 = vadd.f32 %v10033_v0, %v9834_v21 }
 0x164   :  { %v1875_v57 = vpop.f32.mrf.mxu0  ;;  %v1672_v8 = vadd.f32 %v10063_v28, %v9827_v49 }
 0x165   :  { %v1988_v4 = vpop.f32.mrf.mxu1  ;;  %v2506_v45 = vmax.f32 %v1983_v13, 0.0  ;;  %v1876_v5 = vadd.f32 %v1875_v57, %v9995_v11  ;;  %v2553_v16 = vpack.c.bf16 %v2505_v53, %v2501_v18  ;;  %v1987_v11 = vadd.f32 %v1986_v10, %v1874_v29 }
 0x166   :  { %v1877_v20 = vpop.f32.mrf.mxu0  ;;  %v1777_v36 = vadd.f32 %v10035_v1, %v1664_v52 }
 0x167   :  { %v1990_v55 = vpop.f32.mrf.mxu1  ;;  %v1878_v50 = vadd.f32 %v1877_v20, %v1765_v15  ;;  %v2554_v33 = vpack.c.bf16 %v2506_v45, %v2502_v6  ;;  %v1989_v24 = vadd.f32 %v1988_v4, %v1876_v5  ;;  %v2509_v56 = vmax.f32 %v1987_v11, 0.0 }
 0x168   :  { %v1879_v22 = vpop.f32.mrf.mxu0  ;;  %v1785_v4 = vadd.f32 %v10065_v61, %v1672_v8 }
 0x169   :  { %v1992_v9 = vpop.f32.mrf.mxu1  ;;  %v1991_v3 = vadd.f32 %v1990_v55, %v1878_v50  ;;  %v1880_v41 = vadd.f32 %v1879_v22, %v1767_v46  ;;  %2972 = vmatprep.mubr.bf16.mxu0 %v2554_v33  ;;  %v2510_v37 = vmax.f32 %v1989_v24, 0.0 }
 0x16a   :  { %v1883_v47 = vpop.f32.mrf.mxu0  ;;  %2973 = vmatmul.mubr.bf16.gmra.mxu0 %v2553_v16  ;;  %v1682_v16 = vadd.f32 %v10094_v26, %v9827_v49  ;;  %v10186_v49 = vsub.s32 3, %v9799_v25  ;;  %v12176_v26 = vld [vmem:[#allocation3_spill] sm:$0xff] }
 0x16b   :  { %v1996_v31 = vpop.f32.mrf.mxu1  ;;  %v1993_v32 = vadd.f32 %v1992_v9, %v1880_v41  ;;  %v2513_v17 = vmax.f32 %v1991_v3, 0.0  ;;  %v1884_v39 = vadd.f32 %v1883_v47, %v10021_v19  ;;  %v1674_v19 = vadd.f32 %v10069_v38, %v9834_v21 }
 0x16c   :  { %v1885_v58 = vpop.f32.mrf.mxu0  ;;  %v10183_v3 = vsub.s32 2, %v9799_v25  ;;  %12175 = vst [vmem:[#allocation11_spill] sm:$0xff] %v10186_v49 }
 0x16d   :  { %v1998_v35 = vpop.f32.mrf.mxu1  ;;  %v2514_v30 = vmax.f32 %v1993_v32, 0.0  ;;  %v1886_v54 = vadd.f32 %v1885_v58, %v10031_v44  ;;  %v2557_v0 = vpack.c.bf16 %v2513_v17, %v2509_v56  ;;  %v1997_v44 = vadd.f32 %v1996_v31, %v1884_v39  ;;  %v12177_v17 = vld [vmem:[#allocation4_spill] sm:$0xff] }
 0x16e   :  { %v1887_v43 = vpop.f32.mrf.mxu0  ;;  %v1787_v20 = vadd.f32 %v10071_v51, %v1674_v19  ;;  %12174 = vst [vmem:[#allocation6_spill] sm:$0xff] %v10183_v3  ;;  %v1795_v31 = vadd.f32 %v12176_v26, %v1682_v16 }
 0x16f   :  { %v2000_v12 = vpop.f32.mrf.mxu1  ;;  %v1888_v2 = vadd.f32 %v1887_v43, %v1775_v14  ;;  %v2558_v27 = vpack.c.bf16 %v2514_v30, %v2510_v37  ;;  %v1999_v42 = vadd.f32 %v1998_v35, %v1886_v54  ;;  %v2517_v45 = vmax.f32 %v1997_v44, 0.0  ;;  %v12178_v14 = vld [vmem:[#allocation2_spill] sm:$0xff]  ;;  %v12179_v30 = vld [vmem:[#allocation5_spill] sm:$0xff] }
 0x170   :  { %v1889_v60 = vpop.f32.mrf.mxu0  ;;  %v12180_v43 = vld [vmem:[#allocation9_spill] sm:$0xff] }
 0x171   :  { %v2002_v48 = vpop.f32.mrf.mxu1  ;;  %v2001_v62 = vadd.f32 %v2000_v12, %v1888_v2  ;;  %v1890_v34 = vadd.f32 %v1889_v60, %v1777_v36  ;;  %2982 = vmatprep.mubr.bf16.mxu0 %v2558_v27  ;;  %v2518_v15 = vmax.f32 %v1999_v42, 0.0  ;;  %v10194_v12 = vrot.slane %v12180_v43, %v10183_v3 }
 0x172   :  { %v1893_v10 = vpop.f32.mrf.mxu0  ;;  %2983 = vmatmul.mubr.bf16.gmra.mxu0 %v2557_v0  ;;  %v10198_v8 = vrot.slane %v12180_v43, %v10186_v49 }
 0x173   :  { %v2006_v59 = vpop.f32.mrf.mxu1  ;;  %v2003_v1 = vadd.f32 %v2002_v48, %v1890_v34  ;;  %v2521_v13 = vmax.f32 %v2001_v62, 0.0  ;;  %v1894_v5 = vadd.f32 %v1893_v10, %v10057_v63  ;;  %v1684_v63 = vadd.f32 %v10106_v23, %v9834_v21 }
 0x174   :  { %v1895_v53 = vpop.f32.mrf.mxu0 }
 0x175   :  { %v2008_v57 = vpop.f32.mrf.mxu1  ;;  %v2522_v6 = vmax.f32 %v2003_v1, 0.0  ;;  %v1896_v28 = vadd.f32 %v1895_v53, %v10067_v40  ;;  %v2561_v38 = vpack.c.bf16 %v2521_v13, %v2517_v45  ;;  %v2007_v40 = vadd.f32 %v2006_v59, %v1894_v5 }
 0x176   :  { %v1897_v18 = vpop.f32.mrf.mxu0  ;;  %v1797_v54 = vadd.f32 %v12179_v30, %v1684_v63 }
 0x177   :  { %v2010_v29 = vpop.f32.mrf.mxu1  ;;  %v1898_v55 = vadd.f32 %v1897_v18, %v1785_v4  ;;  %v2562_v46 = vpack.c.bf16 %v2522_v6, %v2518_v15  ;;  %v2009_v61 = vadd.f32 %v2008_v57, %v1896_v28  ;;  %v2525_v35 = vmax.f32 %v2007_v40, 0.0 }
 0x178   :  { %v1899_v50 = vpop.f32.mrf.mxu0 }
 0x179   :  { %v2012_v33 = vpop.f32.mrf.mxu1  ;;  %v2011_v22 = vadd.f32 %v2010_v29, %v1898_v55  ;;  %v1900_v9 = vadd.f32 %v1899_v50, %v1787_v20  ;;  %2992 = vmatprep.mubr.bf16.mxu0 %v2562_v46  ;;  %v2526_v52 = vmax.f32 %v2009_v61, 0.0  ;;  %v12181_v50 = vmov 0  }
 0x17a   :  { %v1903_v7 = vpop.f32.mrf.mxu0  ;;  %2993 = vmatmul.mubr.bf16.gmra.mxu0 %v2561_v38 }
 0x17b   :  { %v2016_v24 = vpop.f32.mrf.mxu1  ;;  %v2013_v51 = vadd.f32 %v2012_v33, %v1900_v9  ;;  %v2529_v41 = vmax.f32 %v2011_v22, 0.0  ;;  %v1904_v37 = vadd.f32 %v1903_v7, %v12178_v14 }
 0x17c   :  { %v1905_v11 = vpop.f32.mrf.mxu0 }
 0x17d   :  { %v2018_v47 = vpop.f32.mrf.mxu1  ;;  %v2530_v32 = vmax.f32 %v2013_v51, 0.0  ;;  %v1906_v58 = vadd.f32 %v1905_v11, %v12177_v17  ;;  %v2565_v36 = vpack.c.bf16 %v2529_v41, %v2525_v35  ;;  %v2017_v42 = vadd.f32 %v2016_v24, %v1904_v37 }
 0x17e   :  { %v1907_v21 = vpop.f32.mrf.mxu0 }
 0x17f   :  { %v2020_v23 = vpop.f32.mrf.mxu1  ;;  %v1908_v56 = vadd.f32 %v1907_v21, %v1795_v31  ;;  %v2566_v39 = vpack.c.bf16 %v2530_v32, %v2526_v52  ;;  %v2019_v0 = vadd.f32 %v2018_v47, %v1906_v58  ;;  %v2533_v15 = vmax.f32 %v2017_v42, 0.0 }
 0x180   :  { %v1909_v2 = vpop.f32.mrf.mxu0 }
 0x181   :  { %v2022_v27 = vpop.f32.mrf.mxu1  ;;  %v2021_v60 = vadd.f32 %v2020_v23, %v1908_v56  ;;  %v1910_v48 = vadd.f32 %v1909_v2, %v1797_v54  ;;  %3002 = vmatprep.mubr.bf16.mxu0 %v2566_v39  ;;  %v2534_v13 = vmax.f32 %v2019_v0, 0.0 }
 0x182   :  { %v2059_v62 = vpop.f32.mrf.mxu0  ;;  %3003 = vmatmul.mubr.bf16.gmra.mxu0 %v2565_v36 }
 0x183   :  { %v2172_v34 = vpop.f32.mrf.mxu1  ;;  %v2023_v44 = vadd.f32 %v2022_v27, %v1910_v48  ;;  %v2060_v10 = vadd.f32 %v2059_v62, %v10194_v12  ;;  %v2537_v59 = vmax.f32 %v2021_v60, 0.0 }
 0x184   :  { %v2061_v19 = vpop.f32.mrf.mxu0 }
 0x185   :  { %v2174_v1 = vpop.f32.mrf.mxu1  ;;  %v2538_v53 = vmax.f32 %v2023_v44, 0.0  ;;  %v10201_v57 = vadd.f32 %v2172_v34, %v2060_v10  ;;  %v2062_v4 = vadd.f32 %v2061_v19, %v10198_v8  ;;  %v2569_v18 = vpack.c.bf16 %v2537_v59, %v2533_v15 }
 0x186   :  { %v10204_v6 = vpop.f32.mrf.mxu0 }
 0x187   :  { %v10206_v28 = vpop.f32.mrf.mxu1  ;;  %v10208_v45 = vadd.f32 %v2174_v1, %v2062_v4  ;;  %v2570_v5 = vpack.c.bf16 %v2538_v53, %v2534_v13 }
 0x188   :  { %v10210_v29 = vpop.f32.mrf.mxu0 }
 0x189   :  { %v10212_v20 = vpop.f32.mrf.mxu1  ;;  %3012 = vmatprep.mubr.bf16.mxu0 %v2570_v5 }
 0x18a   :  { %v2069_v55 = vpop.f32.mrf.mxu0  ;;  %3013 = vmatmul.mubr.bf16.gmra.mxu0 %v2569_v18 }
 0x18b   :  { %v2182_v46 = vpop.f32.mrf.mxu1  ;;  %v2070_v38 = vadd.f32 %v2069_v55, %v10194_v12  ;;  %3486 = vmatprep.mubr.bf16.mxu0 %v12181_v50 }
 0x18c   :  { %v2071_v33 = vpop.f32.mrf.mxu0 }
 0x18d   :  { %v2184_v16 = vpop.f32.mrf.mxu1  ;;  %v10216_v61 = vadd.f32 %v2182_v46, %v2070_v38  ;;  %v2072_v22 = vadd.f32 %v2071_v33, %v10198_v8 }
 0x18e   :  { %v10219_v9 = vpop.f32.mrf.mxu0 }
 0x18f   :  { %v10221_v40 = vpop.f32.mrf.mxu1  ;;  %v10223_v7 = vadd.f32 %v2184_v16, %v2072_v22 }
 0x190   :  { %v10225_v24 = vpop.f32.mrf.mxu0 }
 0x191   :  { %v10227_v63 = vpop.f32.mrf.mxu1 }
 0x192   :  { %v2079_v51 = vpop.f32.mrf.mxu0 }
 0x193   :  { %v2192_v41 = vpop.f32.mrf.mxu1  ;;  %v2080_v11 = vadd.f32 %v2079_v51, %v10194_v12 }
 0x194   :  { %v2081_v47 = vpop.f32.mrf.mxu0 }
 0x195   :  { %v2194_v26 = vpop.f32.mrf.mxu1  ;;  %v10230_v31 = vadd.f32 %v2192_v41, %v2080_v11  ;;  %v2082_v52 = vadd.f32 %v2081_v47, %v10198_v8 }
 0x196   :  { %v10233_v32 = vpop.f32.mrf.mxu0 }
 0x197   :  { %v10235_v17 = vpop.f32.mrf.mxu1  ;;  %v10237_v58 = vadd.f32 %v2194_v26, %v2082_v52 }
 0x198   :  { %v10239_v35 = vpop.f32.mrf.mxu0 }
 0x199   :  { %v10241_v14 = vpop.f32.mrf.mxu1 }
 0x19a   :  { %v2089_v37 = vpop.f32.mrf.mxu0 }
 0x19b   :  { %v2202_v21 = vpop.f32.mrf.mxu1  ;;  %v2090_v23 = vadd.f32 %v2089_v37, %v10194_v12 }
 0x19c   :  { %v2091_v30 = vpop.f32.mrf.mxu0 }
 0x19d   :  { %v2204_v54 = vpop.f32.mrf.mxu1  ;;  %v10244_v56 = vadd.f32 %v2202_v21, %v2090_v23  ;;  %v2092_v39 = vadd.f32 %v2091_v30, %v10198_v8 }
 0x19e   :  { %v10247_v43 = vpop.f32.mrf.mxu0 }
 0x19f   :  { %v10249_v36 = vpop.f32.mrf.mxu1  ;;  %v10251_v2 = vadd.f32 %v2204_v54, %v2092_v39 }
 0x1a0   :  { %v10253_v27 = vpop.f32.mrf.mxu0 }
 0x1a1   :  { %v10255_v0 = vpop.f32.mrf.mxu1 }
 0x1a2   :  { %v2099_v60 = vpop.f32.mrf.mxu0 }
 0x1a3   :  { %v2212_v48 = vpop.f32.mrf.mxu1  ;;  %v2100_v42 = vadd.f32 %v2099_v60, %v10194_v12 }
 0x1a4   :  { %v2101_v62 = vpop.f32.mrf.mxu0 }
 0x1a5   :  { %v2214_v34 = vpop.f32.mrf.mxu1  ;;  %v10258_v44 = vadd.f32 %v2212_v48, %v2100_v42  ;;  %v2102_v10 = vadd.f32 %v2101_v62, %v10198_v8 }
 0x1a6   :  { %v10261_v59 = vpop.f32.mrf.mxu0 }
 0x1a7   :  { %v10263_v19 = vpop.f32.mrf.mxu1  ;;  %v10265_v1 = vadd.f32 %v2214_v34, %v2102_v10 }
 0x1a8   :  { %v10267_v13 = vpop.f32.mrf.mxu0 }
 0x1a9   :  { %v10269_v53 = vpop.f32.mrf.mxu1 }
 0x1aa   :  { %v2109_v4 = vpop.f32.mrf.mxu0 }
 0x1ab   :  { %v2222_v15 = vpop.f32.mrf.mxu1  ;;  %v2110_v5 = vadd.f32 %v2109_v4, %v10194_v12 }
 0x1ac   :  { %v2111_v18 = vpop.f32.mrf.mxu0 }
 0x1ad   :  { %v2224_v55 = vpop.f32.mrf.mxu1  ;;  %v10272_v46 = vadd.f32 %v2222_v15, %v2110_v5  ;;  %v2112_v38 = vadd.f32 %v2111_v18, %v10198_v8 }
 0x1ae   :  { %v10275_v33 = vpop.f32.mrf.mxu0 }
 0x1af   :  { %v10277_v16 = vpop.f32.mrf.mxu1  ;;  %v10279_v22 = vadd.f32 %v2224_v55, %v2112_v38 }
 0x1b0   :  { %v10281_v51 = vpop.f32.mrf.mxu0 }
 0x1b1   :  { %v10283_v41 = vpop.f32.mrf.mxu1 }
 0x1b2   :  { %v2119_v11 = vpop.f32.mrf.mxu0 }
 0x1b3   :  { %v2232_v47 = vpop.f32.mrf.mxu1  ;;  %v2120_v26 = vadd.f32 %v2119_v11, %v10194_v12 }
 0x1b4   :  { %v2121_v52 = vpop.f32.mrf.mxu0 }
 0x1b5   :  { %v2234_v37 = vpop.f32.mrf.mxu1  ;;  %v10286_v21 = vadd.f32 %v2232_v47, %v2120_v26  ;;  %v2122_v23 = vadd.f32 %v2121_v52, %v10198_v8  ;;  %v2064_v26 = vadd.f32 %v10204_v6, %v10194_v12 }
 0x1b6   :  { %v10289_v30 = vpop.f32.mrf.mxu0 }
 0x1b7   :  { %v10291_v54 = vpop.f32.mrf.mxu1  ;;  %v10293_v39 = vadd.f32 %v2234_v37, %v2122_v23  ;;  %v2066_v23 = vadd.f32 %v10210_v29, %v10198_v8 }
 0x1b8   :  { %v10295_v60 = vpop.f32.mrf.mxu0 }
 0x1b9   :  { %v10297_v48 = vpop.f32.mrf.mxu1  ;;  %v2179_v3 = vadd.f32 %v10212_v20, %v2066_v23 }
 0x1ba   :  { %v2129_v42 = vpop.f32.mrf.mxu0 }
 0x1bb   :  { %v2242_v62 = vpop.f32.mrf.mxu1  ;;  %v2130_v34 = vadd.f32 %v2129_v42, %v10194_v12 }
 0x1bc   :  { %v2131_v10 = vpop.f32.mrf.mxu0 }
 0x1bd   :  { %v2244_v4 = vpop.f32.mrf.mxu1  ;;  %v10300_v15 = vadd.f32 %v2242_v62, %v2130_v34  ;;  %v2132_v5 = vadd.f32 %v2131_v10, %v10198_v8  ;;  %v2177_v34 = vadd.f32 %v10206_v28, %v2064_v26 }
 0x1be   :  { %v10303_v18 = vpop.f32.mrf.mxu0 }
 0x1bf   :  { %12182 = vst [vmem:[#allocation3_spill] sm:$0xff] %v10300_v15  ;;  %v10305_v55 = vpop.f32.mrf.mxu1  ;;  %v10307_v38 = vadd.f32 %v2244_v4, %v2132_v5 }
 0x1c0   :  { %12183 = vst [vmem:[#allocation4_spill] sm:$0xff] %v10305_v55  ;;  %v10309_v11 = vpop.f32.mrf.mxu0 }
 0x1c1   :  { %12184 = vst [vmem:[#allocation2_spill] sm:$0xff] %v10307_v38  ;;  %12185 = vst [vmem:[#allocation5_spill] sm:$0xff] %v10309_v11  ;;  %v10311_v47 = vpop.f32.mrf.mxu1 }
 0x1c2   :  { %12186 = vst [vmem:[#allocation9_spill] sm:$0xff] %v10311_v47  ;;  %v2285_v52 = vpop.f32.mrf.mxu0  ;;  %v2074_v47 = vadd.f32 %v10219_v9, %v10194_v12 }
 0x1c3   :  { %v2398_v37 = vpop.f32.mrf.mxu1  ;;  %v2286_v4 = vadd.f32 %v2285_v52, %v10201_v57 }
 0x1c4   :  { %v2287_v42 = vpop.f32.mrf.mxu0  ;;  %v2187_v20 = vadd.f32 %v10221_v40, %v2074_v47  ;;  %v2084_v40 = vadd.f32 %v10233_v32, %v10194_v12  ;;  %v7748_v32 = vld [vmem:[%s12126_s6 + $0xe4] ss:$16 sps:$4 sm:$0xff]  }
 0x1c5   :  { %v2400_v62 = vpop.f32.mrf.mxu1  ;;  %v2288_v10 = vadd.f32 %v2287_v42, %v10208_v45  ;;  %v2399_v55 = vadd.f32 %v2398_v37, %v2286_v4  ;;  %v2076_v45 = vadd.f32 %v10225_v24, %v10198_v8  ;;  %3454 = vmatprep.subr.bf16.mxu0 %v7748_v32 }
 0x1c6   :  { %v2289_v5 = vpop.f32.mrf.mxu0 }
 0x1c7   :  { %v2402_v25 = vpop.f32.mrf.mxu1  ;;  %v2290_v49 = vadd.f32 %v2289_v5, %v2177_v34  ;;  %v2401_v15 = vadd.f32 %v2400_v62, %v2288_v10  ;;  %v2479_v9 = vmax.f32 %v2399_v55, 0.0 }
 0x1c8   :  { %v2291_v50 = vpop.f32.mrf.mxu0 }
 0x1c9   :  { %v2404_v6 = vpop.f32.mrf.mxu1  ;;  %v2403_v29 = vadd.f32 %v2402_v25, %v2290_v49  ;;  %v2292_v38 = vadd.f32 %v2291_v50, %v2179_v3  ;;  %v2480_v23 = vmax.f32 %v2401_v15, 0.0  ;;  %v2189_v50 = vadd.f32 %v10227_v63, %v2076_v45  ;;  %v7746_v63 = vld [vmem:[%s12126_s6 + $0xe0] ss:$16 sps:$4 sm:$0xff]  }
 0x1ca   :  { %v2295_v11 = vpop.f32.mrf.mxu0  ;;  %3455 = vmatpush1.bf16.msra.mxu0 %v7746_v63  ;;  %v7761_v63 = vld [vmem:[%s12126_s6 + $0xa8] ss:$16 sps:$4 sm:$0xff]  }
 0x1cb   :  { %v2408_v28 = vpop.f32.mrf.mxu1  ;;  %v2405_v57 = vadd.f32 %v2404_v6, %v2292_v38  ;;  %v2483_v26 = vmax.f32 %v2403_v29, 0.0  ;;  %v2296_v25 = vadd.f32 %v2295_v11, %v10216_v61  ;;  %v2086_v11 = vadd.f32 %v10239_v35, %v10198_v8 }
 0x1cc   :  { %v2297_v52 = vpop.f32.mrf.mxu0 }
 0x1cd   :  { %v2410_v42 = vpop.f32.mrf.mxu1  ;;  %v2484_v34 = vmax.f32 %v2405_v57, 0.0  ;;  %v2298_v5 = vadd.f32 %v2297_v52, %v10223_v7  ;;  %v2543_v62 = vpack.c.bf16 %v2483_v26, %v2479_v9  ;;  %v2409_v7 = vadd.f32 %v2408_v28, %v2296_v25  ;;  %v7749_v28 = vld [vmem:[%s12126_s6 + $0xe8] ss:$16 sps:$4 sm:$0xff]   ;;  %v7751_v52 = vld [vmem:[%s12126_s6 + $0xec] ss:$16 sps:$4 sm:$0xff]  }
 0x1ce   :  { %v2299_v3 = vpop.f32.mrf.mxu0  ;;  %3567 = vmatprep.subr.bf16.mxu1 %v7751_v52 }
 0x1cf   :  { %v2412_v49 = vpop.f32.mrf.mxu1  ;;  %v2544_v37 = vpack.c.bf16 %v2484_v34, %v2480_v23  ;;  %v2411_v24 = vadd.f32 %v2410_v42, %v2298_v5  ;;  %v2300_v38 = vadd.f32 %v2299_v3, %v2187_v20  ;;  %v2197_v42 = vadd.f32 %v10235_v17, %v2084_v40  ;;  %v7752_v23 = vld [vmem:[%s12126_s6 + $0xc0] ss:$16 sps:$4 sm:$0xff]   ;;  %v7754_v34 = vld [vmem:[%s12126_s6 + $0xc4] ss:$16 sps:$4 sm:$0xff]   ;;  %v7755_v17 = vld [vmem:[%s12126_s6 + $0xc8] ss:$16 sps:$4 sm:$0xff]  }
 0x1d0   :  { %v2301_v10 = vpop.f32.mrf.mxu0  ;;  %v2487_v5 = vmax.f32 %v2409_v7, 0.0  ;;  %3456 = vmatprep.subr.bf16.mxu0 %v7754_v34 }
 0x1d1   :  { %v2414_v4 = vpop.f32.mrf.mxu1  ;;  %v2413_v15 = vadd.f32 %v2412_v49, %v2300_v38  ;;  %v2302_v47 = vadd.f32 %v2301_v10, %v2189_v50  ;;  %6911 = vmatprep.mubr.msk.bf16.mxu1 %vm2885_vm0, %v2544_v37  ;;  %v2488_v6 = vmax.f32 %v2411_v24, 0.0  ;;  %v7757_v37 = vld [vmem:[%s12126_s6 + $0xcc] ss:$16 sps:$4 sm:$0xff]   ;;  %v7760_v10 = vld [vmem:[%s12126_s6 + $0xa4] ss:$16 sps:$4 sm:$0xff]   ;;  %3457 = vmatpush1.bf16.msra.mxu0 %v7752_v23 }
 0x1d2   :  { %v2305_v61 = vpop.f32.mrf.mxu0  ;;  %3056 = vmatmul.mubr.bf16.vlgmr.msra.gmra.mxu1 %v2543_v62  ;;  %3458 = vmatprep.subr.bf16.mxu0 %v7760_v10 }
 0x1d3   :  { %v2418_v55 = vpop.f32.mrf.mxu1  ;;  %v2415_v29 = vadd.f32 %v2414_v4, %v2302_v47  ;;  %v2491_v45 = vmax.f32 %v2413_v15, 0.0  ;;  %v2306_v9 = vadd.f32 %v2305_v61, %v10230_v31  ;;  %3568 = vmatpush1.bf16.msra.mxu1 %v7749_v28  ;;  %v2094_v31 = vadd.f32 %v10247_v43, %v10194_v12  ;;  %v7758_v15 = vld [vmem:[%s12126_s6 + $0xa0] ss:$16 sps:$4 sm:$0xff]   ;;  %v7763_v43 = vld [vmem:[%s12126_s6 + $0xac] ss:$16 sps:$4 sm:$0xff]  }
 0x1d4   :  { %v2307_v57 = vpop.f32.mrf.mxu0  ;;  %3569 = vmatprep.subr.bf16.mxu1 %v7757_v37 }
 0x1d5   :  { %v2420_v26 = vpop.f32.mrf.mxu1  ;;  %v2492_v35 = vmax.f32 %v2415_v29, 0.0  ;;  %v2308_v20 = vadd.f32 %v2307_v57, %v10237_v58  ;;  %v2199_v58 = vadd.f32 %v10241_v14, %v2086_v11  ;;  %v2547_v24 = vpack.c.bf16 %v2491_v45, %v2487_v5  ;;  %v7766_v29 = vld [vmem:[%s12126_s6 + $0x84] ss:$16 sps:$4 sm:$0xff]   ;;  %v7764_v57 = vld [vmem:[%s12126_s6 + $0x80] ss:$16 sps:$4 sm:$0xff]   ;;  %3459 = vmatpush1.bf16.msra.mxu0 %v7758_v15 }
 0x1d6   :  { %v2309_v25 = vpop.f32.mrf.mxu0  ;;  %v2419_v47 = vadd.f32 %v2418_v55, %v2306_v9  ;;  %v2096_v11 = vadd.f32 %v10253_v27, %v10198_v8  ;;  %v2207_v27 = vadd.f32 %v10249_v36, %v2094_v31  ;;  %3460 = vmatprep.subr.bf16.mxu0 %v7766_v29 }
 0x1d7   :  { %v2422_v3 = vpop.f32.mrf.mxu1  ;;  %v2548_v49 = vpack.c.bf16 %v2492_v35, %v2488_v6  ;;  %v2310_v50 = vadd.f32 %v2309_v25, %v2197_v42  ;;  %v2421_v4 = vadd.f32 %v2420_v26, %v2308_v20  ;;  %3570 = vmatpush1.bf16.msra.mxu1 %v7755_v17  ;;  %v7769_v26 = vld [vmem:[%s12126_s6 + $0x8c] ss:$16 sps:$4 sm:$0xff]   ;;  %v7767_v35 = vld [vmem:[%s12126_s6 + $0x88] ss:$16 sps:$4 sm:$0xff]  }
 0x1d8   :  { %v2311_v38 = vpop.f32.mrf.mxu0  ;;  %3571 = vmatprep.subr.bf16.mxu1 %v7763_v43  ;;  %v2495_v20 = vmax.f32 %v2419_v47, 0.0  ;;  %v2209_v9 = vadd.f32 %v10255_v0, %v2096_v11  ;;  %v2106_v0 = vadd.f32 %v10267_v13, %v10198_v8 }
 0x1d9   :  { %v2424_v62 = vpop.f32.mrf.mxu1  ;;  %v2423_v14 = vadd.f32 %v2422_v3, %v2310_v50  ;;  %v2312_v40 = vadd.f32 %v2311_v38, %v2199_v58  ;;  %6912 = vmatprep.mubr.msk.bf16.mxu1 %vm2885_vm0, %v2548_v49  ;;  %v2496_v28 = vmax.f32 %v2421_v4, 0.0  ;;  %3461 = vmatpush1.bf16.msra.mxu0 %v7764_v57 }
 0x1da   :  { %v2315_v7 = vpop.f32.mrf.mxu0  ;;  %3066 = vmatmul.mubr.bf16.gmra.mxu1 %v2547_v24 }
 0x1db   :  { %v2428_v61 = vpop.f32.mrf.mxu1  ;;  %v2425_v6 = vadd.f32 %v2424_v62, %v2312_v40  ;;  %v2499_v32 = vmax.f32 %v2423_v14, 0.0  ;;  %v2316_v23 = vadd.f32 %v2315_v7, %v10244_v56  ;;  %3572 = vmatpush1.bf16.msra.mxu1 %v7761_v63  ;;  %v2219_v63 = vadd.f32 %v10269_v53, %v2106_v0 }
 0x1dc   :  { %v2317_v55 = vpop.f32.mrf.mxu0  ;;  %3573 = vmatprep.subr.bf16.mxu1 %v7769_v26  ;;  %v2116_v53 = vadd.f32 %v10281_v51, %v10198_v8 }
 0x1dd   :  { %v2430_v45 = vpop.f32.mrf.mxu1  ;;  %v2500_v52 = vmax.f32 %v2425_v6, 0.0  ;;  %v2318_v42 = vadd.f32 %v2317_v55, %v10251_v2  ;;  %v2551_v36 = vpack.c.bf16 %v2499_v32, %v2495_v20  ;;  %v2104_v2 = vadd.f32 %v10261_v59, %v10194_v12 }
 0x1de   :  { %v2319_v34 = vpop.f32.mrf.mxu0  ;;  %v2429_v56 = vadd.f32 %v2428_v61, %v2316_v23  ;;  %v2114_v55 = vadd.f32 %v10275_v33, %v10194_v12 }
 0x1df   :  { %v2432_v5 = vpop.f32.mrf.mxu1  ;;  %v2552_v25 = vpack.c.bf16 %v2500_v52, %v2496_v28  ;;  %v2320_v3 = vadd.f32 %v2319_v34, %v2207_v27  ;;  %v2431_v49 = vadd.f32 %v2430_v45, %v2318_v42  ;;  %3574 = vmatpush1.bf16.msra.mxu1 %v7767_v35  ;;  %v2217_v59 = vadd.f32 %v10263_v19, %v2104_v2 }
 0x1e0   :  { %v2321_v17 = vpop.f32.mrf.mxu0  ;;  %v2503_v43 = vmax.f32 %v2429_v56, 0.0  ;;  %v2227_v35 = vadd.f32 %v10277_v16, %v2114_v55 }
 0x1e1   :  { %v2434_v58 = vpop.f32.mrf.mxu1  ;;  %v2433_v50 = vadd.f32 %v2432_v5, %v2320_v3  ;;  %v2322_v37 = vadd.f32 %v2321_v17, %v2209_v9  ;;  %6913 = vmatprep.mubr.msk.bf16.mxu1 %vm2885_vm0, %v2552_v25  ;;  %v2504_v14 = vmax.f32 %v2431_v49, 0.0  ;;  %v2229_v3 = vadd.f32 %v10283_v41, %v2116_v53 }
 0x1e2   :  { %v2325_v31 = vpop.f32.mrf.mxu0  ;;  %3076 = vmatmul.mubr.bf16.gmra.mxu1 %v2551_v36  ;;  %v2124_v49 = vadd.f32 %v10289_v30, %v10194_v12  ;;  %v2126_v41 = vadd.f32 %v10295_v60, %v10198_v8 }
 0x1e3   :  { %v2438_v24 = vpop.f32.mrf.mxu1  ;;  %v2435_v38 = vadd.f32 %v2434_v58, %v2322_v37  ;;  %v2507_v62 = vmax.f32 %v2433_v50, 0.0  ;;  %v2326_v47 = vadd.f32 %v2325_v31, %v10258_v44 }
 0x1e4   :  { %v2327_v10 = vpop.f32.mrf.mxu0 }
 0x1e5   :  { %v2440_v4 = vpop.f32.mrf.mxu1  ;;  %v2508_v40 = vmax.f32 %v2435_v38, 0.0  ;;  %v2328_v15 = vadd.f32 %v2327_v10, %v10265_v1  ;;  %v2555_v6 = vpack.c.bf16 %v2507_v62, %v2503_v43  ;;  %v2439_v1 = vadd.f32 %v2438_v24, %v2326_v47 }
 0x1e6   :  { %v2329_v7 = vpop.f32.mrf.mxu0  ;;  %v2237_v62 = vadd.f32 %v10291_v54, %v2124_v49  ;;  %v2239_v43 = vadd.f32 %v10297_v48, %v2126_v41  ;;  %v7775_v41 = vld [vmem:[%s12126_s6 + $0x6c] ss:$16 sps:$4 sm:$0xff]  }
 0x1e7   :  { %v2442_v61 = vpop.f32.mrf.mxu1  ;;  %v2556_v11 = vpack.c.bf16 %v2508_v40, %v2504_v14  ;;  %v2330_v13 = vadd.f32 %v2329_v7, %v2217_v59  ;;  %v2441_v19 = vadd.f32 %v2440_v4, %v2328_v15  ;;  %v2511_v34 = vmax.f32 %v2439_v1, 0.0  ;;  %v12188_v1 = vld [vmem:[#allocation4_spill] sm:$0xff]  ;;  %3575 = vmatprep.subr.bf16.mxu1 %v7775_v41 }
 0x1e8   :  { %v2331_v29 = vpop.f32.mrf.mxu0 }
 0x1e9   :  { %v2444_v32 = vpop.f32.mrf.mxu1  ;;  %v2443_v45 = vadd.f32 %v2442_v61, %v2330_v13  ;;  %v2332_v57 = vadd.f32 %v2331_v29, %v2219_v63  ;;  %6914 = vmatprep.mubr.msk.bf16.mxu1 %vm2885_vm0, %v2556_v11  ;;  %v2512_v20 = vmax.f32 %v2441_v19, 0.0  ;;  %v2134_v11 = vadd.f32 %v10303_v18, %v10194_v12  ;;  %v12189_v18 = vld [vmem:[#allocation2_spill] sm:$0xff] }
 0x1ea   :  { %v2335_v26 = vpop.f32.mrf.mxu0  ;;  %3086 = vmatmul.mubr.bf16.gmra.mxu1 %v2555_v6 }
 0x1eb   :  { %v2448_v44 = vpop.f32.mrf.mxu1  ;;  %v2445_v27 = vadd.f32 %v2444_v32, %v2332_v57  ;;  %v2515_v28 = vmax.f32 %v2443_v45, 0.0  ;;  %v2336_v5 = vadd.f32 %v2335_v26, %v10272_v46  ;;  %v12187_v32 = vld [vmem:[#allocation5_spill] sm:$0xff]  ;;  %v2247_v26 = vadd.f32 %v12188_v1, %v2134_v11 }
 0x1ec   :  { %v2337_v52 = vpop.f32.mrf.mxu0  ;;  %v2136_v48 = vadd.f32 %v12187_v32, %v10198_v8 }
 0x1ed   :  { %v2450_v42 = vpop.f32.mrf.mxu1  ;;  %v2516_v33 = vmax.f32 %v2445_v27, 0.0  ;;  %v2338_v23 = vadd.f32 %v2337_v52, %v10279_v22  ;;  %v2559_v51 = vpack.c.bf16 %v2515_v28, %v2511_v34  ;;  %v2449_v22 = vadd.f32 %v2448_v44, %v2336_v5  ;;  %v12190_v28 = vld [vmem:[#allocation3_spill] sm:$0xff] }
 0x1ee   :  { %v2339_v9 = vpop.f32.mrf.mxu0 }
 0x1ef   :  { %v2452_v25 = vpop.f32.mrf.mxu1  ;;  %v2560_v36 = vpack.c.bf16 %v2516_v33, %v2512_v20  ;;  %v2340_v17 = vadd.f32 %v2339_v9, %v2227_v35  ;;  %v2451_v16 = vadd.f32 %v2450_v42, %v2338_v23  ;;  %v2519_v59 = vmax.f32 %v2449_v22, 0.0  ;;  %v12191_v20 = vld [vmem:[#allocation9_spill] sm:$0xff] }
 0x1f0   :  { %v2341_v58 = vpop.f32.mrf.mxu0  ;;  %v2249_v33 = vadd.f32 %v12191_v20, %v2136_v48  ;;  %v12192_v22 = vmov 0  }
 0x1f1   :  { %v2454_v2 = vpop.f32.mrf.mxu1  ;;  %v2453_v50 = vadd.f32 %v2452_v25, %v2340_v17  ;;  %v2342_v37 = vadd.f32 %v2341_v58, %v2229_v3  ;;  %6915 = vmatprep.mubr.msk.bf16.mxu1 %vm2885_vm0, %v2560_v36  ;;  %v2520_v10 = vmax.f32 %v2451_v16, 0.0 }
 0x1f2   :  { %v2345_v56 = vpop.f32.mrf.mxu0  ;;  %3096 = vmatmul.mubr.bf16.gmra.mxu1 %v2559_v51 }
 0x1f3   :  { %v2458_v46 = vpop.f32.mrf.mxu1  ;;  %v2455_v31 = vadd.f32 %v2454_v2, %v2342_v37  ;;  %v2523_v24 = vmax.f32 %v2453_v50, 0.0  ;;  %v2346_v14 = vadd.f32 %v2345_v56, %v10286_v21  ;;  %v7770_v56 = vld [vmem:[%s12126_s6 + $0x60] ss:$16 sps:$4 sm:$0xff]  }
 0x1f4   :  { %v2347_v0 = vpop.f32.mrf.mxu0 }
 0x1f5   :  { %v2460_v38 = vpop.f32.mrf.mxu1  ;;  %v2524_v30 = vmax.f32 %v2455_v31, 0.0  ;;  %v2348_v4 = vadd.f32 %v2347_v0, %v10293_v39  ;;  %v2563_v60 = vpack.c.bf16 %v2523_v24, %v2519_v59  ;;  %v2459_v39 = vadd.f32 %v2458_v46, %v2346_v14  ;;  %v7772_v46 = vld [vmem:[%s12126_s6 + $0x64] ss:$16 sps:$4 sm:$0xff]   ;;  %v7773_v31 = vld [vmem:[%s12126_s6 + $0x68] ss:$16 sps:$4 sm:$0xff]  }
 0x1f6   :  { %v2349_v40 = vpop.f32.mrf.mxu0  ;;  %3462 = vmatprep.subr.bf16.mxu0 %v7772_v46  ;;  %3576 = vmatpush1.bf16.msra.mxu1 %v7773_v31  ;;  %v7778_v24 = vld [vmem:[%s12126_s6 + $0x44] ss:$16 sps:$4 sm:$0xff]   ;;  %v7781_v0 = vld [vmem:[%s12126_s6 + $0x4c] ss:$16 sps:$4 sm:$0xff]   ;;  %v7785_v59 = vld [vmem:[%s12126_s6 + $0x28] ss:$16 sps:$4 sm:$0xff]  }
 0x1f7   :  { %v2462_v15 = vpop.f32.mrf.mxu1  ;;  %v2564_v47 = vpack.c.bf16 %v2524_v30, %v2520_v10  ;;  %v2350_v7 = vadd.f32 %v2349_v40, %v2237_v62  ;;  %v2461_v54 = vadd.f32 %v2460_v38, %v2348_v4  ;;  %v2527_v27 = vmax.f32 %v2459_v39, 0.0  ;;  %3463 = vmatpush1.bf16.msra.mxu0 %v7770_v56  ;;  %v7776_v38 = vld [vmem:[%s12126_s6 + $0x40] ss:$16 sps:$4 sm:$0xff]   ;;  %v7779_v62 = vld [vmem:[%s12126_s6 + $0x48] ss:$16 sps:$4 sm:$0xff]   ;;  %3577 = vmatprep.subr.bf16.mxu1 %v7781_v0 }
 0x1f8   :  { %v2351_v61 = vpop.f32.mrf.mxu0  ;;  %3464 = vmatprep.subr.bf16.mxu0 %v7778_v24  ;;  %v7784_v10 = vld [vmem:[%s12126_s6 + $0x24] ss:$16 sps:$4 sm:$0xff]   ;;  %v7787_v30 = vld [vmem:[%s12126_s6 + $0x2c] ss:$16 sps:$4 sm:$0xff]   ;;  %v7782_v4 = vld [vmem:[%s12126_s6 + $0x20] ss:$16 sps:$4 sm:$0xff]  }
 0x1f9   :  { %v2464_v63 = vpop.f32.mrf.mxu1  ;;  %v2463_v13 = vadd.f32 %v2462_v15, %v2350_v7  ;;  %v2352_v6 = vadd.f32 %v2351_v61, %v2239_v43  ;;  %6916 = vmatprep.mubr.msk.bf16.mxu1 %vm2885_vm0, %v2564_v47  ;;  %v2528_v44 = vmax.f32 %v2461_v54, 0.0  ;;  %v7790_v14 = vld [vmem:[%s12126_s6 + $0x4] ss:$16 sps:$4 sm:$0xff]   ;;  %v7793_v40 = vld [vmem:[%s12126_s6 + $0xc] ss:$16 sps:$4 sm:$0xff]  }
 0x1fa   :  { %v2355_v29 = vpop.f32.mrf.mxu0  ;;  %3106 = vmatmul.mubr.bf16.gmra.mxu1 %v2563_v60  ;;  %v7788_v15 = vld [vmem:[%s12126_s6] ss:$16 sps:$4 sm:$0xff]   ;;  %v7791_v43 = vld [vmem:[%s12126_s6 + $0x8] ss:$16 sps:$4 sm:$0xff]  }
 0x1fb   :  { %v2468_v21 = vpop.f32.mrf.mxu1  ;;  %v2465_v55 = vadd.f32 %v2464_v63, %v2352_v6  ;;  %v2531_v19 = vmax.f32 %v2463_v13, 0.0  ;;  %v2356_v52 = vadd.f32 %v2355_v29, %v12190_v28  ;;  %3465 = vmatpush1.bf16.msra.mxu0 %v7776_v38  ;;  %3578 = vmatpush1.bf16.msra.mxu1 %v7779_v62  ;;  %v7796_v6 = vld [vmem:[%s12127_s8 + $0x18c] ss:$28 sps:$4 sm:$0xff]  }
 0x1fc   :  { %v2357_v45 = vpop.f32.mrf.mxu0  ;;  %3466 = vmatprep.subr.bf16.mxu0 %v7784_v10  ;;  %3579 = vmatprep.subr.bf16.mxu1 %v7787_v30  ;;  %v7802_v29 = vld [vmem:[%s12127_s8 + $0x50c] ss:$28 sps:$4 sm:$0xff]  }
 0x1fd   :  { %v2470_v57 = vpop.f32.mrf.mxu1  ;;  %v2532_v12 = vmax.f32 %v2465_v55, 0.0  ;;  %v2358_v53 = vadd.f32 %v2357_v45, %v12189_v18  ;;  %v2567_v8 = vpack.c.bf16 %v2531_v19, %v2527_v27  ;;  %v2469_v36 = vadd.f32 %v2468_v21, %v2356_v52 }
 0x1fe   :  { %v2359_v42 = vpop.f32.mrf.mxu0 }
 0x1ff   :  { %v2472_v35 = vpop.f32.mrf.mxu1  ;;  %v2568_v23 = vpack.c.bf16 %v2532_v12, %v2528_v44  ;;  %v2360_v34 = vadd.f32 %v2359_v42, %v2247_v26  ;;  %v2471_v9 = vadd.f32 %v2470_v57, %v2358_v53  ;;  %v2535_v16 = vmax.f32 %v2469_v36, 0.0  ;;  %3467 = vmatpush1.bf16.msra.mxu0 %v7782_v4  ;;  %3580 = vmatpush1.bf16.msra.mxu1 %v7785_v59  ;;  %v2623_v57 = vld [vmem:[%s12128_s5] sm:$0x3]  ;;  %v12193_v26 = vld [vmem:[#allocation8_spill] sm:$0xff] }
 0x200   :  { %v2361_v5 = vpop.f32.mrf.mxu0  ;;  %3468 = vmatprep.subr.bf16.mxu0 %v7790_v14  ;;  %3581 = vmatprep.subr.bf16.mxu1 %v7793_v40  ;;  %v10504_v44 = vrot.slane %v2623_v57, %v12193_v26  ;;  %v12194_v12 = vld [vmem:[#allocation10_spill] sm:$0xff] }
 0x201   :  { %v2473_v25 = vadd.f32 %v2472_v35, %v2360_v34  ;;  %v2362_v3 = vadd.f32 %v2361_v5, %v2249_v33  ;;  %6917 = vmatprep.mubr.msk.bf16.mxu1 %vm2885_vm0, %v2568_v23  ;;  %v2474_v17 = vpop.f32.mrf.mxu1  ;;  %v2536_v2 = vmax.f32 %v2471_v9, 0.0  ;;  %v10507_v18 = vrot.slane %v2623_v57, %v12194_v12 }
 0x202   :  { %3116 = vmatmul.mubr.bf16.gmra.mxu1 %v2567_v8 }
 0x203   :  { %v2475_v51 = vadd.f32 %v2474_v17, %v2362_v3  ;;  %v2539_v58 = vmax.f32 %v2473_v25, 0.0  ;;  %3469 = vmatpush1.bf16.msra.mxu0 %v7788_v15  ;;  %3582 = vmatpush1.bf16.msra.mxu1 %v7791_v43 }
 0x204   :  { %4937 = vmatprep.subr.bf16.mxu0 %v7796_v6  ;;  %5050 = vmatprep.subr.bf16.mxu1 %v7802_v29 }
 0x205   :  { %v2540_v49 = vmax.f32 %v2475_v51, 0.0  ;;  %v2571_v37 = vpack.c.bf16 %v2539_v58, %v2535_v16 }
 0x207   :  { %v2572_v50 = vpack.c.bf16 %v2540_v49, %v2536_v2 }
 0x209   :  { %6918 = vmatprep.mubr.msk.bf16.mxu1 %vm2885_vm0, %v2572_v50 }
 0x20a   :  { %3126 = vmatmul.mubr.bf16.gmra.mxu1 %v2571_v37 }
 0x20b   :  { %3599 = vmatprep.mubr.bf16.mxu1 %v12192_v22 }
 0x212   :  { %v2944_v47 = vpop.f32.mrf.mxu0 }
 0x213   :  { %v2945_v27 = vadd.f32 %v2944_v47, %v10504_v44 }
 0x214   :  { %v2946_v7 = vpop.f32.mrf.mxu0 }
 0x215   :  { %v2947_v52 = vadd.f32 %v2946_v7, %v10507_v18 }
 0x216   :  { %v2948_v60 = vpop.f32.mrf.mxu0 }
 0x217   :  { %v2949_v33 = vadd.f32 %v2948_v60, %v10504_v44 }
 0x218   :  { %v2950_v61 = vpop.f32.mrf.mxu0 }
 0x219   :  { %v2951_v8 = vadd.f32 %v2950_v61, %v10507_v18  ;;  %v3184_v61 = vld [vmem:[%s12131_s1] sm:$0xff] }
 0x21a   :  { %v2954_v63 = vpop.f32.mrf.mxu0 }
 0x21b   :  { %v2955_v36 = vadd.f32 %v2954_v63, %v10504_v44 }
 0x21c   :  { %v2956_v11 = vpop.f32.mrf.mxu0 }
 0x21d   :  { %v2957_v2 = vadd.f32 %v2956_v11, %v10507_v18 }
 0x21e   :  { %v2958_v54 = vpop.f32.mrf.mxu0 }
 0x21f   :  { %v2959_v56 = vadd.f32 %v2958_v54, %v10504_v44 }
 0x220   :  { %v2960_v13 = vpop.f32.mrf.mxu0 }
 0x221   :  { %v2961_v24 = vadd.f32 %v2960_v13, %v10507_v18 }
 0x222   :  { %v2964_v39 = vpop.f32.mrf.mxu0 }
 0x223   :  { %v2965_v30 = vadd.f32 %v2964_v39, %v10504_v44 }
 0x224   :  { %v2966_v21 = vpop.f32.mrf.mxu0 }
 0x225   :  { %v2967_v40 = vadd.f32 %v2966_v21, %v10507_v18 }
 0x226   :  { %v10488_v32 = vpop.f32.mrf.mxu0 }
 0x227   :  { %v2969_v60 = vadd.f32 %v10488_v32, %v10504_v44  ;;  %v3185_v32 = vld [vmem:[%s12131_s1 + $0x8] sm:$0xff] }
 0x228   :  { %v10490_v48 = vpop.f32.mrf.mxu0 }
 0x229   :  { %v2971_v13 = vadd.f32 %v10490_v48, %v10507_v18 }
 0x22a   :  { %v10492_v55 = vpop.f32.mrf.mxu0 }
 0x22c   :  { %v10494_v19 = vpop.f32.mrf.mxu0 }
 0x22e   :  { %v10496_v45 = vpop.f32.mrf.mxu0 }
 0x230   :  { %v10501_v1 = vpop.f32.mrf.mxu0 }
 0x232   :  { %v10509_v53 = vpop.f32.mrf.mxu0 }
 0x234   :  { %v10513_v42 = vpop.f32.mrf.mxu0 }
 0x236   :  { %v10523_v5 = vpop.f32.mrf.mxu0 }
 0x238   :  { %v10536_v49 = vpop.f32.mrf.mxu0 }
 0x23a   :  { %v10549_v0 = vpop.f32.mrf.mxu0 }
 0x23c   :  { %v10562_v15 = vpop.f32.mrf.mxu0 }
 0x23e   :  { %v10580_v6 = vpop.f32.mrf.mxu0 }
 0x292   :  { %v3057_v28 = vpop.f32.mrf.mxu1 }
 0x293   :  { %v10515_v35 = vadd.f32 %v3057_v28, %v2945_v27  ;;  %v2975_v27 = vadd.f32 %v10492_v55, %v10504_v44 }
 0x294   :  { %v3059_v20 = vpop.f32.mrf.mxu1 }
 0x295   :  { %6593 = vst [vmem:[%s12129_s11] sm:$0xff] %v10515_v35  ;;  %v3060_v23 = vadd.f32 %v3059_v20, %v2947_v52 }
 0x296   :  { %v3061_v34 = vpop.f32.mrf.mxu1 }
 0x297   :  { %v3136_v9 = vmul.f32 0.5, %v3060_v23  ;;  %6609 = vst [vmem:[%s12130_s12] sm:$0xff] %v3060_v23  ;;  %v10528_v25 = vadd.f32 %v3061_v34, %v2949_v33  ;;  %v2977_v33 = vadd.f32 %v10494_v19, %v10507_v18  ;;  %v10598_v23 = vpop.f32.mrf.mxu0 }
 0x298   :  { %v3063_v3 = vpop.f32.mrf.mxu1 }
 0x299   :  { %v3152_v17 = vmul.f32 1.442695, %v3136_v9  ;;  %6594 = vst [vmem:[%s12129_s11 + $0x8] sm:$0xff] %v10528_v25  ;;  %v3064_v51 = vadd.f32 %v3063_v3, %v2951_v8  ;;  %v2979_v3 = vadd.f32 %v10496_v45, %v10504_v44 }
 0x29a   :  { %v3067_v58 = vpop.f32.mrf.mxu1 }
 0x29b   :  { %8044 = vpow2.f32 %v3152_v17  ;;  %v3137_v16 = vmul.f32 0.5, %v3064_v51  ;;  %6610 = vst [vmem:[%s12130_s12 + $0x8] sm:$0xff] %v3064_v51  ;;  %v10541_v50 = vadd.f32 %v3067_v58, %v2955_v36  ;;  %v2981_v51 = vadd.f32 %v10501_v1, %v10507_v18  ;;  %v7794_v1 = vld [vmem:[%s12127_s8 + $0x188] ss:$28 sps:$4 sm:$0xff]  }
 0x29c   :  { %v3069_v37 = vpop.f32.mrf.mxu1 }
 0x29d   :  { %v3154_v46 = vmul.f32 1.442695, %v3137_v16  ;;  %6595 = vst [vmem:[%s12129_s11 + $0x10] sm:$0xff] %v10541_v50  ;;  %v3070_v41 = vadd.f32 %v3069_v37, %v2957_v2  ;;  %v10614_v16 = vpop.f32.mrf.mxu0 }
 0x29e   :  { %v3071_v31 = vpop.f32.mrf.mxu1 }
 0x29f   :  { %8046 = vpow2.f32 %v3154_v46  ;;  %v3138_v38 = vmul.f32 0.5, %v3070_v41  ;;  %6611 = vst [vmem:[%s12130_s12 + $0x10] sm:$0xff] %v3070_v41  ;;  %v10554_v62 = vadd.f32 %v3071_v31, %v2959_v56  ;;  %v3186_v46 = vld [vmem:[%s12131_s1 + $0x10] sm:$0xff] }
 0x2a0   :  { %v3073_v10 = vpop.f32.mrf.mxu1 }
 0x2a1   :  { %v3156_v4 = vmul.f32 1.442695, %v3138_v38  ;;  %6596 = vst [vmem:[%s12129_s11 + $0x18] sm:$0xff] %v10554_v62  ;;  %v3074_v59 = vadd.f32 %v3073_v10, %v2961_v24  ;;  %v3187_v24 = vld [vmem:[%s12131_s1 + $0x18] sm:$0xff]  ;;  %v7811_v38 = vld [vmem:[%s12127_s8 + $0x4d4] ss:$28 sps:$4 sm:$0xff]   ;;  %v2985_v10 = vadd.f32 %v10509_v53, %v10504_v44 }
 0x2a2   :  { %v3077_v14 = vpop.f32.mrf.mxu1 }
 0x2a3   :  { %8048 = vpow2.f32 %v3156_v4  ;;  %v3139_v43 = vmul.f32 0.5, %v3074_v59  ;;  %6612 = vst [vmem:[%s12130_s12 + $0x18] sm:$0xff] %v3074_v59  ;;  %v10567_v47 = vadd.f32 %v3077_v14, %v2965_v30 }
 0x2a4   :  { %v3079_v7 = vpop.f32.mrf.mxu1 }
 0x2a5   :  { %v3158_v63 = vmul.f32 1.442695, %v3139_v43  ;;  %6597 = vst [vmem:[%s12129_s11 + $0x20] sm:$0xff] %v10567_v47  ;;  %v3080_v11 = vadd.f32 %v3079_v7, %v2967_v40  ;;  %v2987_v43 = vadd.f32 %v10513_v42, %v10507_v18  ;;  %v10648_v7 = vpop.f32.mrf.mxu0  ;;  %v7809_v42 = vld [vmem:[%s12127_s8 + $0x4d0] ss:$28 sps:$4 sm:$0xff]  }
 0x2a6   :  { %v3081_v54 = vpop.f32.mrf.mxu1 }
 0x2a7   :  { %8050 = vpow2.f32 %v3158_v63  ;;  %v3140_v39 = vmul.f32 0.5, %v3080_v11  ;;  %6613 = vst [vmem:[%s12130_s12 + $0x20] sm:$0xff] %v3080_v11  ;;  %v10585_v29 = vadd.f32 %v3081_v54, %v2969_v60  ;;  %v7805_v54 = vld [vmem:[%s12127_s8 + $0x11c] ss:$28 sps:$4 sm:$0xff]  }
 0x2a8   :  { %v8045_v21 = vpop.eup %8044  ;;  %v3083_v57 = vpop.f32.mrf.mxu1 }
 0x2a9   :  { %v3160_v48 = vmul.f32 1.442695, %v3140_v39  ;;  %6598 = vst [vmem:[%s12129_s11 + $0x28] sm:$0xff] %v10585_v29  ;;  %v3084_v28 = vadd.f32 %v3083_v57, %v2971_v13  ;;  %v3200_v52 = vmul.f32 %v8045_v21, %v3184_v61  ;;  %v7797_v61 = vld [vmem:[%s12127_s8 + $0x150] ss:$28 sps:$4 sm:$0xff]   ;;  %v2989_v39 = vadd.f32 %v10523_v5, %v10504_v44 }
 0x2aa   :  { %v3087_v20 = vpop.f32.mrf.mxu1  ;;  %v7820_v13 = vld [vmem:[%s12127_s8 + $0x49c] ss:$28 sps:$4 sm:$0xff]  }
 0x2ab   :  { %8052 = vpow2.f32 %v3160_v48  ;;  %v3141_v34 = vmul.f32 0.5, %v3084_v28  ;;  %6614 = vst [vmem:[%s12130_s12 + $0x28] sm:$0xff] %v3084_v28  ;;  %v10603_v55 = vadd.f32 %v3087_v20, %v2975_v27  ;;  %v3216_v2 = vadd.f32 %v3200_v52, %v10515_v35  ;;  %v7800_v35 = vld [vmem:[%s12127_s8 + $0x508] ss:$28 sps:$4 sm:$0xff]   ;;  %v10678_v52 = vpop.f32.mrf.mxu0 }
 0x2ac   :  { %v8047_v8 = vpop.eup %8046  ;;  %v3089_v9 = vpop.f32.mrf.mxu1  ;;  %v2991_v27 = vadd.f32 %v10536_v49, %v10507_v18  ;;  %v3188_v49 = vld [vmem:[%s12131_s1 + $0x20] sm:$0xff] }
 0x2ad   :  { %v3201_v36 = vmul.f32 %v8047_v8, %v3185_v32  ;;  %v3162_v17 = vmul.f32 1.442695, %v3141_v34  ;;  %6599 = vst [vmem:[%s12129_s11 + $0x30] sm:$0xff] %v10603_v55  ;;  %v3090_v19 = vadd.f32 %v3089_v9, %v2977_v33  ;;  %v7818_v34 = vld [vmem:[%s12127_s8 + $0x498] ss:$28 sps:$4 sm:$0xff]  }
 0x2ae   :  { %v3091_v58 = vpop.f32.mrf.mxu1 }
 0x2af   :  { %8054 = vpow2.f32 %v3162_v17  ;;  %v3142_v37 = vmul.f32 0.5, %v3090_v19  ;;  %6615 = vst [vmem:[%s12130_s12 + $0x30] sm:$0xff] %v3090_v19  ;;  %v10619_v45 = vadd.f32 %v3091_v58, %v2979_v3  ;;  %v3217_v56 = vadd.f32 %v3201_v36, %v10528_v25  ;;  %v7799_v25 = vld [vmem:[%s12127_s8 + $0x154] ss:$28 sps:$4 sm:$0xff]   ;;  %v3189_v3 = vld [vmem:[%s12131_s1 + $0x28] sm:$0xff] }
 0x2b0   :  { %v8049_v41 = vpop.eup %8048  ;;  %v3093_v31 = vpop.f32.mrf.mxu1  ;;  %v7829_v36 = vld [vmem:[%s12127_s8 + $0x464] ss:$28 sps:$4 sm:$0xff]   ;;  %v2995_v17 = vadd.f32 %v10549_v0, %v10504_v44 }
 0x2b1   :  { %v3164_v30 = vmul.f32 1.442695, %v3142_v37  ;;  %6600 = vst [vmem:[%s12129_s11 + $0x38] sm:$0xff] %v10619_v45  ;;  %v3094_v4 = vadd.f32 %v3093_v31, %v2981_v51  ;;  %v3232_v59 = vpack.c.bf16 %v3217_v56, %v3216_v2  ;;  %v3202_v40 = vmul.f32 %v8049_v41, %v3186_v46  ;;  %v10712_v46 = vpop.f32.mrf.mxu0 }
 0x2b2   :  { %v3097_v14 = vpop.f32.mrf.mxu1  ;;  %v2997_v56 = vadd.f32 %v10562_v15, %v10507_v18  ;;  %v7827_v15 = vld [vmem:[%s12127_s8 + $0x460] ss:$28 sps:$4 sm:$0xff]  }
 0x2b3   :  { %8056 = vpow2.f32 %v3164_v30  ;;  %v3143_v60 = vmul.f32 0.5, %v3094_v4  ;;  %6616 = vst [vmem:[%s12130_s12 + $0x38] sm:$0xff] %v3094_v4  ;;  %v10653_v53 = vadd.f32 %v3097_v14, %v2985_v10  ;;  %3487 = vmatmul.mubr.bf16.vlgmr.msra.gmra.mxu0 %v3232_v59  ;;  %3600 = vmatmul.mubr.bf16.vlgmr.msra.gmra.mxu1 %v3232_v59  ;;  %v3218_v28 = vadd.f32 %v3202_v40, %v10541_v50  ;;  %v7803_v50 = vld [vmem:[%s12127_s8 + $0x118] ss:$28 sps:$4 sm:$0xff]  }
 0x2b4   :  { %v8051_v63 = vpop.eup %8050  ;;  %v3099_v11 = vpop.f32.mrf.mxu1  ;;  %3496 = vmatprep.mubr.bf16.mxu0 %v12192_v22  ;;  %3609 = vmatprep.mubr.bf16.mxu1 %v12192_v22  ;;  %v3001_v59 = vadd.f32 %v10598_v23, %v10507_v18  ;;  %v3190_v23 = vld [vmem:[%s12131_s1 + $0x30] sm:$0xff] }
 0x2b5   :  { %v3166_v21 = vmul.f32 1.442695, %v3143_v60  ;;  %6601 = vst [vmem:[%s12129_s11 + $0x40] sm:$0xff] %v10653_v53  ;;  %v3100_v32 = vadd.f32 %v3099_v11, %v2987_v43  ;;  %v3203_v57 = vmul.f32 %v8051_v63, %v3187_v24  ;;  %4938 = vmatpush1.bf16.msra.mxu0 %v7794_v1  ;;  %5051 = vmatpush1.bf16.msra.mxu1 %v7800_v35  ;;  %v7806_v35 = vld [vmem:[%s12127_s8 + $0xe0] ss:$28 sps:$4 sm:$0xff]   ;;  %v3014_v43 = vpop.f32.mrf.mxu0 }
 0x2b6   :  { %v3101_v48 = vpop.f32.mrf.mxu1  ;;  %4939 = vmatprep.subr.bf16.mxu0 %v7799_v25  ;;  %5052 = vmatprep.subr.bf16.mxu1 %v7811_v38  ;;  %v7814_v24 = vld [vmem:[%s12127_s8 + $0xac] ss:$28 sps:$4 sm:$0xff]   ;;  %v2999_v38 = vadd.f32 %v10580_v6, %v10504_v44 }
 0x2b7   :  { %8058 = vpow2.f32 %v3166_v21  ;;  %v3144_v5 = vmul.f32 0.5, %v3100_v32  ;;  %6617 = vst [vmem:[%s12130_s12 + $0x40] sm:$0xff] %v3100_v32  ;;  %v10683_v20 = vadd.f32 %v3101_v48, %v2989_v39  ;;  %v3219_v33 = vadd.f32 %v3203_v57, %v10554_v62  ;;  %v7808_v62 = vld [vmem:[%s12127_s8 + $0xe4] ss:$28 sps:$4 sm:$0xff]   ;;  %v7835_v25 = vld [vmem:[%s12127_s8 + $0x42c] ss:$28 sps:$4 sm:$0xff]  }
 0x2b8   :  { %v8053_v8 = vpop.eup %8052  ;;  %v3103_v9 = vpop.f32.mrf.mxu1  ;;  %v7833_v39 = vld [vmem:[%s12127_s8 + $0x428] ss:$28 sps:$4 sm:$0xff]   ;;  %v7817_v57 = vld [vmem:[%s12127_s8 + $0x74] ss:$28 sps:$4 sm:$0xff]   ;;  %v3007_v48 = vadd.f32 %v10648_v7, %v10507_v18  ;;  %v3009_v7 = vadd.f32 %v10678_v52, %v10504_v44  ;;  %v3011_v52 = vadd.f32 %v10712_v46, %v10507_v18 }
 0x2b9   :  { %v3168_v19 = vmul.f32 1.442695, %v3144_v5  ;;  %6602 = vst [vmem:[%s12129_s11 + $0x48] sm:$0xff] %v10683_v20  ;;  %v3104_v51 = vadd.f32 %v3103_v9, %v2991_v27  ;;  %v3233_v58 = vpack.c.bf16 %v3219_v33, %v3218_v28  ;;  %4940 = vmatpush1.bf16.msra.mxu0 %v7797_v61  ;;  %5053 = vmatpush1.bf16.msra.mxu1 %v7809_v42  ;;  %v7844_v27 = vld [vmem:[%s12127_s8 + $0x3f4] ss:$28 sps:$4 sm:$0xff]   ;;  %v3016_v28 = vpop.f32.mrf.mxu0 }
 0x2ba   :  { %v3107_v2 = vpop.f32.mrf.mxu1  ;;  %v3204_v37 = vmul.f32 %v8053_v8, %v3188_v49  ;;  %4941 = vmatprep.subr.bf16.mxu0 %v7805_v54  ;;  %5054 = vmatprep.subr.bf16.mxu1 %v7820_v13 }
 0x2bb   :  { %8060 = vpow2.f32 %v3168_v19  ;;  %v3145_v0 = vmul.f32 0.5, %v3104_v51  ;;  %6618 = vst [vmem:[%s12130_s12 + $0x48] sm:$0xff] %v3104_v51  ;;  %v10717_v1 = vadd.f32 %v3107_v2, %v2995_v17  ;;  %3497 = vmatmul.mubr.bf16.gmra.mxu0 %v3233_v58  ;;  %3610 = vmatmul.mubr.bf16.gmra.mxu1 %v3233_v58  ;;  %v7823_v19 = vld [vmem:[%s12127_s8 + $0x3c] ss:$28 sps:$4 sm:$0xff]   ;;  %v3018_v58 = vpop.f32.mrf.mxu0 }
 0x2bc   :  { %v8055_v41 = vpop.eup %8054  ;;  %v3109_v31 = vpop.f32.mrf.mxu1  ;;  %3506 = vmatprep.mubr.bf16.mxu0 %v12192_v22  ;;  %3619 = vmatprep.mubr.bf16.mxu1 %v12192_v22  ;;  %v3220_v40 = vadd.f32 %v3204_v37, %v10567_v47  ;;  %v3005_v47 = vadd.f32 %v10614_v16, %v10504_v44  ;;  %v3191_v16 = vld [vmem:[%s12131_s1 + $0x38] sm:$0xff] }
 0x2bd   :  { %v3170_v10 = vmul.f32 1.442695, %v3145_v0  ;;  %6603 = vst [vmem:[%s12129_s11 + $0x50] sm:$0xff] %v10717_v1  ;;  %v3110_v30 = vadd.f32 %v3109_v31, %v2997_v56  ;;  %v3205_v4 = vmul.f32 %v8055_v41, %v3189_v3  ;;  %4942 = vmatpush1.bf16.msra.mxu0 %v7803_v50  ;;  %5055 = vmatpush1.bf16.msra.mxu1 %v7818_v34  ;;  %v7815_v3 = vld [vmem:[%s12127_s8 + $0x70] ss:$28 sps:$4 sm:$0xff]   ;;  %v3192_v56 = vld [vmem:[%s12131_s1 + $0x40] sm:$0xff] }
 0x2be   :  { %v3111_v14 = vpop.f32.mrf.mxu1  ;;  %4943 = vmatprep.subr.bf16.mxu0 %v7808_v62  ;;  %5056 = vmatprep.subr.bf16.mxu1 %v7829_v36  ;;  %v7842_v62 = vld [vmem:[%s12127_s8 + $0x3f0] ss:$28 sps:$4 sm:$0xff]   ;;  %v7853_v51 = vld [vmem:[%s12127_s8 + $0x3bc] ss:$28 sps:$4 sm:$0xff]  }
 0x2bf   :  { %8062 = vpow2.f32 %v3170_v10  ;;  %v3146_v6 = vmul.f32 0.5, %v3110_v30  ;;  %6619 = vst [vmem:[%s12130_s12 + $0x50] sm:$0xff] %v3110_v30  ;;  %v10745_v60 = vadd.f32 %v3111_v14, %v2999_v38  ;;  %v3221_v61 = vadd.f32 %v3205_v4, %v10585_v29  ;;  %v7812_v29 = vld [vmem:[%s12127_s8 + $0xa8] ss:$28 sps:$4 sm:$0xff]  }
 0x2c0   :  { %v8057_v42 = vpop.eup %8056  ;;  %v3113_v63 = vpop.f32.mrf.mxu1  ;;  %v3193_v38 = vld [vmem:[%s12131_s1 + $0x48] sm:$0xff]  ;;  %v7826_v30 = vld [vmem:[%s12127_s8 + $0x4] ss:$28 sps:$4 sm:$0xff]   ;;  %v3017_v4 = vadd.f32 %v3016_v28, %v10507_v18  ;;  %v7838_v28 = vld [vmem:[%s12127_s8 + $0x314] ss:$28 sps:$4 sm:$0xff]  }
 0x2c1   :  { %v3172_v11 = vmul.f32 1.442695, %v3146_v6  ;;  %6604 = vst [vmem:[%s12129_s11 + $0x58] sm:$0xff] %v10745_v60  ;;  %v3114_v54 = vadd.f32 %v3113_v63, %v3001_v59  ;;  %v3234_v13 = vpack.c.bf16 %v3221_v61, %v3220_v40  ;;  %4944 = vmatpush1.bf16.msra.mxu0 %v7806_v35  ;;  %5057 = vmatpush1.bf16.msra.mxu1 %v7827_v15  ;;  %v3020_v59 = vpop.f32.mrf.mxu0 }
 0x2c2   :  { %v3117_v21 = vpop.f32.mrf.mxu1  ;;  %v3206_v32 = vmul.f32 %v8057_v42, %v3190_v23  ;;  %4945 = vmatprep.subr.bf16.mxu0 %v7814_v24  ;;  %5058 = vmatprep.subr.bf16.mxu1 %v7835_v25  ;;  %v3015_v35 = vadd.f32 %v3014_v43, %v10504_v44  ;;  %v7851_v24 = vld [vmem:[%s12127_s8 + $0x3b8] ss:$28 sps:$4 sm:$0xff]   ;;  %v3019_v61 = vadd.f32 %v3018_v58, %v10504_v44  ;;  %v7832_v44 = vld [vmem:[%s12127_s8 + $0x34c] ss:$28 sps:$4 sm:$0xff]  }
 0x2c3   :  { %8064 = vpow2.f32 %v3172_v11  ;;  %v3147_v5 = vmul.f32 0.5, %v3114_v54  ;;  %6620 = vst [vmem:[%s12130_s12 + $0x58] sm:$0xff] %v3114_v54  ;;  %v10777_v33 = vadd.f32 %v3117_v21, %v3005_v47  ;;  %3507 = vmatmul.mubr.bf16.gmra.mxu0 %v3234_v13  ;;  %3620 = vmatmul.mubr.bf16.gmra.mxu1 %v3234_v13  ;;  %v7824_v47 = vld [vmem:[%s12127_s8] ss:$28 sps:$4 sm:$0xff]   ;;  %v3021_v11 = vadd.f32 %v3020_v59, %v10507_v18 }
 0x2c4   :  { %v8059_v49 = vpop.eup %8058  ;;  %v3119_v50 = vpop.f32.mrf.mxu1  ;;  %3516 = vmatprep.mubr.bf16.mxu0 %v12192_v22  ;;  %3629 = vmatprep.mubr.bf16.mxu1 %v12192_v22  ;;  %v3222_v17 = vadd.f32 %v3206_v32, %v10603_v55  ;;  %v7859_v59 = vld [vmem:[%s12127_s8 + $0x1fc] ss:$28 sps:$4 sm:$0xff]  }
 0x2c5   :  { %v3174_v34 = vmul.f32 1.442695, %v3147_v5  ;;  %6605 = vst [vmem:[%s12129_s11 + $0x60] sm:$0xff] %v10777_v33  ;;  %v3120_v8 = vadd.f32 %v3119_v50, %v3007_v48  ;;  %v3207_v9 = vmul.f32 %v8059_v49, %v3191_v16  ;;  %4946 = vmatpush1.bf16.msra.mxu0 %v7812_v29  ;;  %5059 = vmatpush1.bf16.msra.mxu1 %v7833_v39  ;;  %v7830_v48 = vld [vmem:[%s12127_s8 + $0x348] ss:$28 sps:$4 sm:$0xff]  }
 0x2c6   :  { %v3121_v36 = vpop.f32.mrf.mxu1  ;;  %4947 = vmatprep.subr.bf16.mxu0 %v7817_v57  ;;  %5060 = vmatprep.subr.bf16.mxu1 %v7844_v27 }
 0x2c7   :  { %8066 = vpow2.f32 %v3174_v34  ;;  %v3148_v2 = vmul.f32 0.5, %v3120_v8  ;;  %6621 = vst [vmem:[%s12130_s12 + $0x60] sm:$0xff] %v3120_v8  ;;  %v10805_v37 = vadd.f32 %v3121_v36, %v3009_v7  ;;  %v3223_v55 = vadd.f32 %v3207_v9, %v10619_v45  ;;  %v7821_v45 = vld [vmem:[%s12127_s8 + $0x38] ss:$28 sps:$4 sm:$0xff]   ;;  %v7836_v8 = vld [vmem:[%s12127_s8 + $0x310] ss:$28 sps:$4 sm:$0xff]  }
 0x2c8   :  { %v8061_v46 = vpop.eup %8060  ;;  %v3123_v0 = vpop.f32.mrf.mxu1  ;;  %v7841_v9 = vld [vmem:[%s12127_s8 + $0x2dc] ss:$28 sps:$4 sm:$0xff]   ;;  %v3196_v36 = vld [vmem:[%s12131_s1 + $0x60] sm:$0xff] }
 0x2c9   :  { %v3176_v15 = vmul.f32 1.442695, %v3148_v2  ;;  %6606 = vst [vmem:[%s12129_s11 + $0x68] sm:$0xff] %v10805_v37  ;;  %v3124_v41 = vadd.f32 %v3123_v0, %v3011_v52  ;;  %v3235_v31 = vpack.c.bf16 %v3223_v55, %v3222_v17  ;;  %4948 = vmatpush1.bf16.msra.mxu0 %v7815_v3  ;;  %5061 = vmatpush1.bf16.msra.mxu1 %v7842_v62  ;;  %v7845_v55 = vld [vmem:[%s12127_s8 + $0x2a0] ss:$28 sps:$4 sm:$0xff]  }
 0x2ca   :  { %v3127_v25 = vpop.f32.mrf.mxu1  ;;  %v3208_v10 = vmul.f32 %v8061_v46, %v3192_v56  ;;  %4949 = vmatprep.subr.bf16.mxu0 %v7823_v19  ;;  %5062 = vmatprep.subr.bf16.mxu1 %v7853_v51  ;;  %v7839_v19 = vld [vmem:[%s12127_s8 + $0x2d8] ss:$28 sps:$4 sm:$0xff]   ;;  %v3197_v51 = vld [vmem:[%s12131_s1 + $0x68] sm:$0xff] }
 0x2cb   :  { %8068 = vpow2.f32 %v3176_v15  ;;  %v3149_v14 = vmul.f32 0.5, %v3124_v41  ;;  %6622 = vst [vmem:[%s12130_s12 + $0x68] sm:$0xff] %v3124_v41  ;;  %v10832_v40 = vadd.f32 %v3127_v25, %v3015_v35  ;;  %3517 = vmatmul.mubr.bf16.gmra.mxu0 %v3235_v31  ;;  %3630 = vmatmul.mubr.bf16.gmra.mxu1 %v3235_v31  ;;  %v7850_v56 = vld [vmem:[%s12127_s8 + $0x26c] ss:$28 sps:$4 sm:$0xff]   ;;  %v3198_v15 = vld [vmem:[%s12131_s1 + $0x70] sm:$0xff] }
 0x2cc   :  { %v8063_v43 = vpop.eup %8062  ;;  %v3129_v6 = vpop.f32.mrf.mxu1  ;;  %3526 = vmatprep.mubr.bf16.mxu0 %v12192_v22  ;;  %3639 = vmatprep.mubr.bf16.mxu1 %v12192_v22  ;;  %v3224_v13 = vadd.f32 %v3208_v10, %v10653_v53  ;;  %v3194_v53 = vld [vmem:[%s12131_s1 + $0x50] sm:$0xff]  ;;  %v7848_v31 = vld [vmem:[%s12127_s8 + $0x268] ss:$28 sps:$4 sm:$0xff]  }
 0x2cd   :  { %v3178_v23 = vmul.f32 1.442695, %v3149_v14  ;;  %6607 = vst [vmem:[%s12129_s11 + $0x70] sm:$0xff] %v10832_v40  ;;  %v3130_v42 = vadd.f32 %v3129_v6, %v3017_v4  ;;  %v3209_v63 = vmul.f32 %v8063_v43, %v3193_v38  ;;  %4950 = vmatpush1.bf16.msra.mxu0 %v7821_v45  ;;  %5063 = vmatpush1.bf16.msra.mxu1 %v7851_v24  ;;  %v3199_v45 = vld [vmem:[%s12131_s1 + $0x78] sm:$0xff]  ;;  %v7854_v4 = vld [vmem:[%s12127_s8 + $0x230] ss:$28 sps:$4 sm:$0xff]  }
 0x2ce   :  { %v3131_v54 = vpop.f32.mrf.mxu1  ;;  %4951 = vmatprep.subr.bf16.mxu0 %v7826_v30  ;;  %v7856_v30 = vld [vmem:[%s12127_s8 + $0x234] ss:$28 sps:$4 sm:$0xff]   ;;  %v7862_v14 = vld [vmem:[%s12127_s8 + $0x384] ss:$28 sps:$4 sm:$0xff]  }
 0x2cf   :  { %8070 = vpow2.f32 %v3178_v23  ;;  %v3150_v29 = vmul.f32 0.5, %v3130_v42  ;;  %6623 = vst [vmem:[%s12130_s12 + $0x70] sm:$0xff] %v3130_v42  ;;  %v10852_v39 = vadd.f32 %v3131_v54, %v3019_v61  ;;  %v3225_v21 = vadd.f32 %v3209_v63, %v10683_v20  ;;  %v3195_v20 = vld [vmem:[%s12131_s1 + $0x58] sm:$0xff]  ;;  %5064 = vmatprep.subr.bf16.mxu1 %v7862_v14  ;;  %v7865_v6 = vld [vmem:[%s12127_s8 + $0x1c4] ss:$28 sps:$4 sm:$0xff]  }
 0x2d0   :  { %v8065_v16 = vpop.eup %8064  ;;  %v3133_v18 = vpop.f32.mrf.mxu1  ;;  %v7860_v43 = vld [vmem:[%s12127_s8 + $0x380] ss:$28 sps:$4 sm:$0xff]   ;;  %v7871_v63 = vld [vmem:[%s12127_s8 + $0x194] ss:$28 sps:$4 sm:$0xff]  }
 0x2d1   :  { %v3180_v32 = vmul.f32 1.442695, %v3150_v29  ;;  %6608 = vst [vmem:[%s12129_s11 + $0x78] sm:$0xff] %v10852_v39  ;;  %v3134_v57 = vadd.f32 %v3133_v18, %v3021_v11  ;;  %v3236_v27 = vpack.c.bf16 %v3225_v21, %v3224_v13  ;;  %4952 = vmatpush1.bf16.msra.mxu0 %v7824_v47  ;;  %v3210_v49 = vmul.f32 %v8065_v16, %v3194_v53  ;;  %v7868_v61 = vld [vmem:[%s12127_s8 + $0x544] ss:$28 sps:$4 sm:$0xff]   ;;  %v12195_v29 = vld [vmem:[#allocation11_spill] sm:$0xff] }
 0x2d2   :  { %4953 = vmatprep.subr.bf16.mxu0 %v7832_v44  ;;  %5065 = vmatpush1.bf16.msra.mxu1 %v7860_v43  ;;  %v7863_v23 = vld [vmem:[%s12127_s8 + $0x1c0] ss:$28 sps:$4 sm:$0xff]   ;;  %v7877_v47 = vld [vmem:[%s12127_s8 + $0x514] ss:$28 sps:$4 sm:$0xff]  }
 0x2d3   :  { %8072 = vpow2.f32 %v3180_v32  ;;  %v3151_v5 = vmul.f32 0.5, %v3134_v57  ;;  %6624 = vst [vmem:[%s12130_s12 + $0x78] sm:$0xff] %v3134_v57  ;;  %3527 = vmatmul.mubr.bf16.gmra.mxu0 %v3236_v27  ;;  %3640 = vmatmul.mubr.bf16.gmra.mxu1 %v3236_v27  ;;  %v3226_v3 = vadd.f32 %v3210_v49, %v10717_v1  ;;  %v7847_v1 = vld [vmem:[%s12127_s8 + $0x2a4] ss:$28 sps:$4 sm:$0xff]  }
 0x2d4   :  { %v8067_v50 = vpop.eup %8066  ;;  %3536 = vmatprep.mubr.bf16.mxu0 %v12192_v22  ;;  %3649 = vmatprep.mubr.bf16.mxu1 %v12192_v22  ;;  %v7866_v42 = vld [vmem:[%s12127_s8 + $0x540] ss:$28 sps:$4 sm:$0xff]  }
 0x2d5   :  { %v3182_v7 = vmul.f32 1.442695, %v3151_v5  ;;  %v3211_v34 = vmul.f32 %v8067_v50, %v3195_v20  ;;  %4954 = vmatpush2.bf16.msra.mxu0 %v7830_v48  ;;  %5080 = vmatprep.subr.bf16.mxu1 %v7868_v61  ;;  %v3272_v11 = vld [vmem:[%s12132_s7] sm:$0xf] }
 0x2d6   :  { %4955 = vmatprep.subr.bf16.mxu0 %v7838_v28  ;;  %5081 = vmatpush2.bf16.msra.mxu1 %v7866_v42  ;;  %v10959_v44 = vrot.slane %v3272_v11, %v12194_v12  ;;  %v10965_v21 = vrot.slane %v3272_v11, %v12193_v26  ;;  %v12196_v16 = vld [vmem:[#allocation6_spill] sm:$0xff] }
 0x2d7   :  { %8074 = vpow2.f32 %v3182_v7  ;;  %v3227_v62 = vadd.f32 %v3211_v34, %v10745_v60  ;;  %5276 = vmatprep.subr.bf16.mxu1 %v7877_v47  ;;  %v10968_v18 = vrot.slane %v3272_v11, %v12196_v16  ;;  %v7880_v47 = vld [vmem:[%s12127_s8 + $0x124] ss:$28 sps:$4 sm:$0xff]  }
 0x2d8   :  { %v8069_v52 = vpop.eup %8068 }
 0x2d9   :  { %v3237_v17 = vpack.c.bf16 %v3227_v62, %v3226_v3  ;;  %4956 = vmatpush2.bf16.msra.mxu0 %v7836_v8  ;;  %v3212_v60 = vmul.f32 %v8069_v52, %v3196_v36 }
 0x2da   :  { %4957 = vmatprep.subr.bf16.mxu0 %v7841_v9 }
 0x2db   :  { %3537 = vmatmul.mubr.bf16.gmra.mxu0 %v3237_v17  ;;  %3650 = vmatmul.mubr.bf16.gmra.mxu1 %v3237_v17  ;;  %v3228_v46 = vadd.f32 %v3212_v60, %v10777_v33 }
 0x2dc   :  { %v8071_v58 = vpop.eup %8070  ;;  %3546 = vmatprep.mubr.bf16.mxu0 %v12192_v22  ;;  %3659 = vmatprep.mubr.bf16.mxu1 %v12192_v22 }
 0x2dd   :  { %v3213_v2 = vmul.f32 %v8071_v58, %v3197_v51  ;;  %4958 = vmatpush2.bf16.msra.mxu0 %v7839_v19 }
 0x2de   :  { %4959 = vmatprep.subr.bf16.mxu0 %v7847_v1 }
 0x2df   :  { %v3229_v0 = vadd.f32 %v3213_v2, %v10805_v37 }
 0x2e0   :  { %v8073_v35 = vpop.eup %8072 }
 0x2e1   :  { %v3238_v41 = vpack.c.bf16 %v3229_v0, %v3228_v46  ;;  %4960 = vmatpush2.bf16.msra.mxu0 %v7845_v55  ;;  %v3214_v33 = vmul.f32 %v8073_v35, %v3198_v15  ;;  %v7869_v0 = vld [vmem:[%s12127_s8 + $0x190] ss:$28 sps:$4 sm:$0xff]  }
 0x2e2   :  { %4961 = vmatprep.subr.bf16.mxu0 %v7850_v56  ;;  %v7875_v35 = vld [vmem:[%s12127_s8 + $0x510] ss:$28 sps:$4 sm:$0xff]  }
 0x2e3   :  { %3547 = vmatmul.mubr.bf16.gmra.mxu0 %v3238_v41  ;;  %3660 = vmatmul.mubr.bf16.gmra.mxu1 %v3238_v41  ;;  %v3230_v25 = vadd.f32 %v3214_v33, %v10832_v40  ;;  %v7857_v40 = vld [vmem:[%s12127_s8 + $0x1f8] ss:$28 sps:$4 sm:$0xff]  }
 0x2e4   :  { %v8075_v37 = vpop.eup %8074  ;;  %3556 = vmatprep.mubr.bf16.mxu0 %v12192_v22  ;;  %3669 = vmatprep.mubr.bf16.mxu1 %v12192_v22 }
 0x2e5   :  { %v3215_v24 = vmul.f32 %v8075_v37, %v3199_v45  ;;  %4962 = vmatpush2.bf16.msra.mxu0 %v7848_v31  ;;  %v7874_v37 = vld [vmem:[%s12127_s8 + $0x15c] ss:$28 sps:$4 sm:$0xff]  }
 0x2e6   :  { %4963 = vmatprep.subr.bf16.mxu0 %v7856_v30 }
 0x2e7   :  { %v3231_v38 = vadd.f32 %v3215_v24, %v10852_v39  ;;  %v10962_v39 = vrot.slane %v3272_v11, %v12195_v29  ;;  %v7886_v24 = vld [vmem:[%s12127_s8 + $0x4dc] ss:$28 sps:$4 sm:$0xff]  }
 0x2e8   :  { %v7884_v11 = vld [vmem:[%s12127_s8 + $0x4d8] ss:$28 sps:$4 sm:$0xff]  }
 0x2e9   :  { %v3239_v10 = vpack.c.bf16 %v3231_v38, %v3230_v25  ;;  %4964 = vmatpush2.bf16.msra.mxu0 %v7854_v4 }
 0x2ea   :  { %4965 = vmatprep.subr.bf16.mxu0 %v7859_v59 }
 0x2eb   :  { %3557 = vmatmul.mubr.bf16.gmra.mxu0 %v3239_v10  ;;  %3670 = vmatmul.mubr.bf16.gmra.mxu1 %v3239_v10 }
 0x2ed   :  { %4966 = vmatpush2.bf16.msra.mxu0 %v7857_v40 }
 0x2ee   :  { %4967 = vmatprep.subr.bf16.mxu0 %v7865_v6  ;;  %v7872_v6 = vld [vmem:[%s12127_s8 + $0x158] ss:$28 sps:$4 sm:$0xff]  }
 0x2f1   :  { %4968 = vmatpush2.bf16.msra.mxu0 %v7863_v23 }
 0x2f2   :  { %5163 = vmatprep.subr.bf16.mxu0 %v7871_v63 }
 0x373   :  { %v3488_v54 = vpop.f32.mrf.mxu0  ;;  %v3601_v13 = vpop.f32.mrf.mxu1 }
 0x374   :  { %v3489_v49 = vadd.f32 %v3488_v54, %v10965_v21  ;;  %v3602_v50 = vadd.f32 %v3601_v13, %v10968_v18 }
 0x375   :  { %v3490_v53 = vpop.f32.mrf.mxu0  ;;  %v3603_v32 = vpop.f32.mrf.mxu1 }
 0x376   :  { %v3491_v48 = vadd.f32 %v3490_v53, %v10959_v44  ;;  %v3604_v20 = vadd.f32 %v3603_v32, %v10962_v39  ;;  %v3680_v60 = vmax.f32 %v3489_v49, 0.0  ;;  %v3682_v58 = vmax.f32 %v3602_v50, 0.0  ;;  %v7878_v49 = vld [vmem:[%s12127_s8 + $0x120] ss:$28 sps:$4 sm:$0xff]  }
 0x377   :  { %v3492_v57 = vpop.f32.mrf.mxu0  ;;  %v3605_v27 = vpop.f32.mrf.mxu1  ;;  %v7895_v50 = vld [vmem:[%s12127_s8 + $0x4a4] ss:$28 sps:$4 sm:$0xff]  }
 0x378   :  { %v3493_v28 = vadd.f32 %v3492_v57, %v10965_v21  ;;  %v3606_v5 = vadd.f32 %v3605_v27, %v10968_v18  ;;  %v3681_v17 = vmax.f32 %v3491_v48, 0.0  ;;  %v3683_v19 = vmax.f32 %v3604_v20, 0.0 }
 0x379   :  { %v3494_v7 = vpop.f32.mrf.mxu0  ;;  %v3607_v34 = vpop.f32.mrf.mxu1 }
 0x37a   :  { %v3495_v8 = vadd.f32 %v3494_v7, %v10959_v44  ;;  %v3608_v9 = vadd.f32 %v3607_v34, %v10962_v39  ;;  %v3684_v3 = vmax.f32 %v3493_v28, 0.0  ;;  %v3686_v62 = vmax.f32 %v3606_v5, 0.0 }
 0x37b   :  { %v3498_v52 = vpop.f32.mrf.mxu0  ;;  %v3611_v36 = vpop.f32.mrf.mxu1 }
 0x37c   :  { %v3685_v51 = vmax.f32 %v3495_v8, 0.0  ;;  %v3687_v1 = vmax.f32 %v3608_v9, 0.0  ;;  %v10988_v15 = vpack.c.bf16 %v3684_v3, %v3680_v60  ;;  %v10990_v41 = vpack.c.bf16 %v3686_v62, %v3682_v58  ;;  %v7883_v62 = vld [vmem:[%s12127_s8 + $0xec] ss:$28 sps:$4 sm:$0xff]  }
 0x37d   :  { %v3500_v2 = vpop.f32.mrf.mxu0  ;;  %v3613_v55 = vpop.f32.mrf.mxu1  ;;  %v3499_v30 = vadd.f32 %v3498_v52, %v10965_v21  ;;  %v3612_v4 = vadd.f32 %v3611_v36, %v10968_v18  ;;  %v7893_v52 = vld [vmem:[%s12127_s8 + $0x4a0] ss:$28 sps:$4 sm:$0xff]  }
 0x37e   :  { %v10978_v56 = vpack.c.bf16 %v3685_v51, %v3681_v17  ;;  %v10980_v46 = vpack.c.bf16 %v3687_v1, %v3683_v19  ;;  %v3501_v31 = vadd.f32 %v3500_v2, %v10959_v44  ;;  %v3614_v25 = vadd.f32 %v3613_v55, %v10962_v39  ;;  %v7904_v51 = vld [vmem:[%s12127_s8 + $0x46c] ss:$28 sps:$4 sm:$0xff]  }
 0x37f   :  { %v3502_v45 = vpop.f32.mrf.mxu0  ;;  %v3615_v33 = vpop.f32.mrf.mxu1  ;;  %v3688_v57 = vmax.f32 %v3499_v30, 0.0  ;;  %v3690_v27 = vmax.f32 %v3612_v4, 0.0 }
 0x380   :  { %v3503_v38 = vadd.f32 %v3502_v45, %v10965_v21  ;;  %v3616_v10 = vadd.f32 %v3615_v33, %v10968_v18  ;;  %4969 = vmatprep.mubr.bf16.mxu0 %v10978_v56  ;;  %7126 = vmatprep.mubr.msk.bf16.mxu1 %vm2885_vm0, %v10980_v46  ;;  %v3689_v54 = vmax.f32 %v3501_v31, 0.0  ;;  %v3691_v13 = vmax.f32 %v3614_v25, 0.0  ;;  %v7902_v25 = vld [vmem:[%s12127_s8 + $0x468] ss:$28 sps:$4 sm:$0xff]  }
 0x381   :  { %v3504_v59 = vpop.f32.mrf.mxu0  ;;  %v3617_v14 = vpop.f32.mrf.mxu1  ;;  %4970 = vmatmul.mubr.bf16.vlgmr.msra.gmra.mxu0 %v10988_v15  ;;  %5083 = vmatmul.mubr.bf16.vlgmr.msra.gmra.mxu1 %v10990_v41 }
 0x382   :  { %v3505_v40 = vadd.f32 %v3504_v59, %v10959_v44  ;;  %v3618_v43 = vadd.f32 %v3617_v14, %v10962_v39  ;;  %5164 = vmatpush1.bf16.msra.mxu0 %v7869_v0  ;;  %5277 = vmatpush1.bf16.msra.mxu1 %v7875_v35  ;;  %v3692_v61 = vmax.f32 %v3503_v38, 0.0  ;;  %v3694_v23 = vmax.f32 %v3616_v10, 0.0  ;;  %v7881_v35 = vld [vmem:[%s12127_s8 + $0xe8] ss:$28 sps:$4 sm:$0xff]  }
 0x383   :  { %v3508_v42 = vpop.f32.mrf.mxu0  ;;  %v3621_v63 = vpop.f32.mrf.mxu1  ;;  %5165 = vmatprep.subr.bf16.mxu0 %v7874_v37  ;;  %5278 = vmatprep.subr.bf16.mxu1 %v7886_v24  ;;  %v7889_v24 = vld [vmem:[%s12127_s8 + $0xb4] ss:$28 sps:$4 sm:$0xff]  }
 0x384   :  { %v3693_v53 = vmax.f32 %v3505_v40, 0.0  ;;  %v3695_v32 = vmax.f32 %v3618_v43, 0.0  ;;  %v11030_v7 = vpack.c.bf16 %v3692_v61, %v3688_v57  ;;  %v11032_v34 = vpack.c.bf16 %v3694_v23, %v3690_v27  ;;  %v7887_v23 = vld [vmem:[%s12127_s8 + $0xb0] ss:$28 sps:$4 sm:$0xff]  }
 0x385   :  { %v3510_v48 = vpop.f32.mrf.mxu0  ;;  %v3623_v20 = vpop.f32.mrf.mxu1  ;;  %v3509_v1 = vadd.f32 %v3508_v42, %v10965_v21  ;;  %v3622_v60 = vadd.f32 %v3621_v63, %v10968_v18  ;;  %v7910_v42 = vld [vmem:[%s12127_s8 + $0x434] ss:$28 sps:$4 sm:$0xff]  }
 0x386   :  { %v11020_v28 = vpack.c.bf16 %v3693_v53, %v3689_v54  ;;  %v11022_v5 = vpack.c.bf16 %v3695_v32, %v3691_v13  ;;  %5166 = vmatpush1.bf16.msra.mxu0 %v7872_v6  ;;  %v3511_v8 = vadd.f32 %v3510_v48, %v10959_v44  ;;  %5279 = vmatpush1.bf16.msra.mxu1 %v7884_v11  ;;  %v7892_v53 = vld [vmem:[%s12127_s8 + $0x7c] ss:$28 sps:$4 sm:$0xff]   ;;  %v7908_v32 = vld [vmem:[%s12127_s8 + $0x430] ss:$28 sps:$4 sm:$0xff]  }
 0x387   :  { %v3512_v9 = vpop.f32.mrf.mxu0  ;;  %v3625_v3 = vpop.f32.mrf.mxu1  ;;  %5167 = vmatprep.subr.bf16.mxu0 %v7880_v47  ;;  %v3624_v36 = vadd.f32 %v3623_v20, %v10962_v39  ;;  %5280 = vmatprep.subr.bf16.mxu1 %v7895_v50  ;;  %v3696_v59 = vmax.f32 %v3509_v1, 0.0  ;;  %v3698_v14 = vmax.f32 %v3622_v60, 0.0  ;;  %v7919_v20 = vld [vmem:[%s12127_s8 + $0x3fc] ss:$28 sps:$4 sm:$0xff]   ;;  %v7898_v1 = vld [vmem:[%s12127_s8 + $0x44] ss:$28 sps:$4 sm:$0xff]  }
 0x388   :  { %v3513_v17 = vadd.f32 %v3512_v9, %v10965_v21  ;;  %v3626_v19 = vadd.f32 %v3625_v3, %v10968_v18  ;;  %4979 = vmatprep.mubr.bf16.mxu0 %v11020_v28  ;;  %7127 = vmatprep.mubr.msk.bf16.mxu1 %vm2885_vm0, %v11022_v5  ;;  %v3697_v38 = vmax.f32 %v3511_v8, 0.0  ;;  %v7917_v60 = vld [vmem:[%s12127_s8 + $0x3f8] ss:$28 sps:$4 sm:$0xff]  }
 0x389   :  { %v3514_v58 = vpop.f32.mrf.mxu0  ;;  %v3627_v2 = vpop.f32.mrf.mxu1  ;;  %4980 = vmatmul.mubr.bf16.gmra.mxu0 %v11030_v7  ;;  %5093 = vmatmul.mubr.bf16.gmra.mxu1 %v11032_v34  ;;  %v3699_v10 = vmax.f32 %v3624_v36, 0.0 }
 0x38a   :  { %v3515_v55 = vadd.f32 %v3514_v58, %v10959_v44  ;;  %v3628_v0 = vadd.f32 %v3627_v2, %v10962_v39  ;;  %5168 = vmatpush1.bf16.msra.mxu0 %v7878_v49  ;;  %v3700_v31 = vmax.f32 %v3513_v17, 0.0  ;;  %v3702_v45 = vmax.f32 %v3626_v19, 0.0  ;;  %5281 = vmatpush1.bf16.msra.mxu1 %v7893_v52  ;;  %v7890_v52 = vld [vmem:[%s12127_s8 + $0x78] ss:$28 sps:$4 sm:$0xff]  }
 0x38b   :  { %v3518_v33 = vpop.f32.mrf.mxu0  ;;  %v3631_v37 = vpop.f32.mrf.mxu1  ;;  %5169 = vmatprep.subr.bf16.mxu0 %v7883_v62  ;;  %5282 = vmatprep.subr.bf16.mxu1 %v7904_v51 }
 0x38c   :  { %v3701_v30 = vmax.f32 %v3515_v55, 0.0  ;;  %v3703_v4 = vmax.f32 %v3628_v0, 0.0  ;;  %v11075_v63 = vpack.c.bf16 %v3700_v31, %v3696_v59  ;;  %v11077_v47 = vpack.c.bf16 %v3702_v45, %v3698_v14 }
 0x38d   :  { %v3520_v40 = vpop.f32.mrf.mxu0  ;;  %v3633_v43 = vpop.f32.mrf.mxu1  ;;  %v3519_v49 = vadd.f32 %v3518_v33, %v10965_v21  ;;  %v3632_v50 = vadd.f32 %v3631_v37, %v10968_v18 }
 0x38e   :  { %v11065_v6 = vpack.c.bf16 %v3701_v30, %v3697_v38  ;;  %v11067_v61 = vpack.c.bf16 %v3703_v4, %v3699_v10  ;;  %5170 = vmatpush1.bf16.msra.mxu0 %v7881_v35  ;;  %v3521_v11 = vadd.f32 %v3520_v40, %v10959_v44  ;;  %5283 = vmatpush1.bf16.msra.mxu1 %v7902_v25  ;;  %v7896_v25 = vld [vmem:[%s12127_s8 + $0x40] ss:$28 sps:$4 sm:$0xff]   ;;  %v7901_v40 = vld [vmem:[%s12127_s8 + $0xc] ss:$28 sps:$4 sm:$0xff]  }
 0x38f   :  { %v3522_v54 = vpop.f32.mrf.mxu0  ;;  %v3635_v13 = vpop.f32.mrf.mxu1  ;;  %5171 = vmatprep.subr.bf16.mxu0 %v7889_v24  ;;  %v3634_v57 = vadd.f32 %v3633_v43, %v10962_v39  ;;  %5284 = vmatprep.subr.bf16.mxu1 %v7910_v42  ;;  %v3704_v35 = vmax.f32 %v3519_v49, 0.0  ;;  %v3706_v31 = vmax.f32 %v3632_v50, 0.0  ;;  %v7928_v38 = vld [vmem:[%s12127_s8 + $0x3c4] ss:$28 sps:$4 sm:$0xff]  }
 0x390   :  { %v3523_v27 = vadd.f32 %v3522_v54, %v10965_v21  ;;  %v3636_v48 = vadd.f32 %v3635_v13, %v10968_v18  ;;  %4989 = vmatprep.mubr.bf16.mxu0 %v11065_v6  ;;  %7128 = vmatprep.mubr.msk.bf16.mxu1 %vm2885_vm0, %v11067_v61  ;;  %v3705_v58 = vmax.f32 %v3521_v11, 0.0  ;;  %v7926_v43 = vld [vmem:[%s12127_s8 + $0x3c0] ss:$28 sps:$4 sm:$0xff]   ;;  %v7937_v54 = vld [vmem:[%s12127_s8 + $0x38c] ss:$28 sps:$4 sm:$0xff]  }
 0x391   :  { %v3524_v8 = vpop.f32.mrf.mxu0  ;;  %v3637_v9 = vpop.f32.mrf.mxu1  ;;  %4990 = vmatmul.mubr.bf16.gmra.mxu0 %v11075_v63  ;;  %5103 = vmatmul.mubr.bf16.gmra.mxu1 %v11077_v47  ;;  %v3707_v2 = vmax.f32 %v3634_v57, 0.0 }
 0x392   :  { %v3525_v3 = vadd.f32 %v3524_v8, %v10959_v44  ;;  %v3638_v62 = vadd.f32 %v3637_v9, %v10962_v39  ;;  %5172 = vmatpush1.bf16.msra.mxu0 %v7887_v23  ;;  %v3708_v36 = vmax.f32 %v3523_v27, 0.0  ;;  %v3710_v17 = vmax.f32 %v3636_v48, 0.0  ;;  %5285 = vmatpush1.bf16.msra.mxu1 %v7908_v32 }
 0x393   :  { %v3528_v19 = vpop.f32.mrf.mxu0  ;;  %v3641_v51 = vpop.f32.mrf.mxu1  ;;  %5173 = vmatprep.subr.bf16.mxu0 %v7892_v53  ;;  %5286 = vmatprep.subr.bf16.mxu1 %v7919_v20  ;;  %v7899_v20 = vld [vmem:[%s12127_s8 + $0x8] ss:$28 sps:$4 sm:$0xff]  }
 0x394   :  { %v3709_v55 = vmax.f32 %v3525_v3, 0.0  ;;  %v3711_v0 = vmax.f32 %v3638_v62, 0.0  ;;  %v11120_v10 = vpack.c.bf16 %v3708_v36, %v3704_v35  ;;  %v11122_v30 = vpack.c.bf16 %v3710_v17, %v3706_v31  ;;  %v7907_v3 = vld [vmem:[%s12127_s8 + $0x354] ss:$28 sps:$4 sm:$0xff]   ;;  %v7935_v62 = vld [vmem:[%s12127_s8 + $0x388] ss:$28 sps:$4 sm:$0xff]  }
 0x395   :  { %v3530_v45 = vpop.f32.mrf.mxu0  ;;  %v3643_v33 = vpop.f32.mrf.mxu1  ;;  %v3529_v13 = vadd.f32 %v3528_v19, %v10965_v21  ;;  %v3642_v53 = vadd.f32 %v3641_v51, %v10968_v18  ;;  %v7943_v35 = vld [vmem:[%s12127_s8 + $0x54c] ss:$28 sps:$4 sm:$0xff]  }
 0x396   :  { %v11110_v37 = vpack.c.bf16 %v3709_v55, %v3705_v58  ;;  %v11112_v24 = vpack.c.bf16 %v3711_v0, %v3707_v2  ;;  %5174 = vmatpush1.bf16.msra.mxu0 %v7890_v52  ;;  %v3531_v4 = vadd.f32 %v3530_v45, %v10959_v44  ;;  %5287 = vmatpush1.bf16.msra.mxu1 %v7917_v60  ;;  %v7905_v0 = vld [vmem:[%s12127_s8 + $0x350] ss:$28 sps:$4 sm:$0xff]  }
 0x397   :  { %v3532_v59 = vpop.f32.mrf.mxu0  ;;  %v3645_v14 = vpop.f32.mrf.mxu1  ;;  %5175 = vmatprep.subr.bf16.mxu0 %v7898_v1  ;;  %v3644_v23 = vadd.f32 %v3643_v33, %v10962_v39  ;;  %5288 = vmatprep.subr.bf16.mxu1 %v7928_v38  ;;  %v3712_v51 = vmax.f32 %v3529_v13, 0.0  ;;  %v3714_v1 = vmax.f32 %v3642_v53, 0.0 }
 0x398   :  { %v3533_v42 = vadd.f32 %v3532_v59, %v10965_v21  ;;  %v3646_v11 = vadd.f32 %v3645_v14, %v10968_v18  ;;  %4999 = vmatprep.mubr.bf16.mxu0 %v11110_v37  ;;  %7129 = vmatprep.mubr.msk.bf16.mxu1 %vm2885_vm0, %v11112_v24  ;;  %v3713_v52 = vmax.f32 %v3531_v4, 0.0  ;;  %v7913_v4 = vld [vmem:[%s12127_s8 + $0x31c] ss:$28 sps:$4 sm:$0xff]   ;;  %v7941_v59 = vld [vmem:[%s12127_s8 + $0x548] ss:$28 sps:$4 sm:$0xff]  }
 0x399   :  { %v3534_v32 = vpop.f32.mrf.mxu0  ;;  %v3647_v57 = vpop.f32.mrf.mxu1  ;;  %5000 = vmatmul.mubr.bf16.gmra.mxu0 %v11120_v10  ;;  %5113 = vmatmul.mubr.bf16.gmra.mxu1 %v11122_v30  ;;  %v3715_v36 = vmax.f32 %v3644_v23, 0.0  ;;  %v7952_v23 = vld [vmem:[%s12127_s8 + $0x51c] ss:$28 sps:$4 sm:$0xff]  }
 0x39a   :  { %v3535_v27 = vadd.f32 %v3534_v32, %v10959_v44  ;;  %v3648_v48 = vadd.f32 %v3647_v57, %v10962_v39  ;;  %5176 = vmatpush1.bf16.msra.mxu0 %v7896_v25  ;;  %v3716_v49 = vmax.f32 %v3533_v42, 0.0  ;;  %v3718_v50 = vmax.f32 %v3646_v11, 0.0  ;;  %5289 = vmatpush1.bf16.msra.mxu1 %v7926_v43  ;;  %v7911_v57 = vld [vmem:[%s12127_s8 + $0x318] ss:$28 sps:$4 sm:$0xff]  }
 0x39b   :  { %v3538_v8 = vpop.f32.mrf.mxu0  ;;  %v3651_v9 = vpop.f32.mrf.mxu1  ;;  %5177 = vmatprep.subr.bf16.mxu0 %v7901_v40  ;;  %5290 = vmatprep.subr.bf16.mxu1 %v7937_v54 }
 0x39c   :  { %v3717_v17 = vmax.f32 %v3535_v27, 0.0  ;;  %v3719_v19 = vmax.f32 %v3648_v48, 0.0  ;;  %v11165_v31 = vpack.c.bf16 %v3716_v49, %v3712_v51  ;;  %v11167_v45 = vpack.c.bf16 %v3718_v50, %v3714_v1  ;;  %v7916_v50 = vld [vmem:[%s12127_s8 + $0x2e4] ss:$28 sps:$4 sm:$0xff]  }
 0x39d   :  { %v3540_v60 = vpop.f32.mrf.mxu0  ;;  %v3653_v58 = vpop.f32.mrf.mxu1  ;;  %v3539_v42 = vadd.f32 %v3538_v8, %v10965_v21  ;;  %v3652_v11 = vadd.f32 %v3651_v9, %v10968_v18 }
 0x39e   :  { %v11155_v2 = vpack.c.bf16 %v3717_v17, %v3713_v52  ;;  %v11157_v55 = vpack.c.bf16 %v3719_v19, %v3715_v36  ;;  %5178 = vmatpush1.bf16.msra.mxu0 %v7899_v20  ;;  %v3541_v33 = vadd.f32 %v3540_v60, %v10959_v44  ;;  %5291 = vmatpush1.bf16.msra.mxu1 %v7935_v62  ;;  %v7914_v60 = vld [vmem:[%s12127_s8 + $0x2e0] ss:$28 sps:$4 sm:$0xff]  }
 0x39f   :  { %v3542_v25 = vpop.f32.mrf.mxu0  ;;  %v3655_v38 = vpop.f32.mrf.mxu1  ;;  %5179 = vmatprep.subr.bf16.mxu0 %v7907_v3  ;;  %v3654_v14 = vadd.f32 %v3653_v58, %v10962_v39  ;;  %5306 = vmatprep.subr.bf16.mxu1 %v7943_v35  ;;  %v3720_v52 = vmax.f32 %v3539_v42, 0.0  ;;  %v3722_v36 = vmax.f32 %v3652_v11, 0.0 }
 0x3a0   :  { %v3543_v40 = vadd.f32 %v3542_v25, %v10965_v21  ;;  %v3656_v43 = vadd.f32 %v3655_v38, %v10968_v18  ;;  %5009 = vmatprep.mubr.bf16.mxu0 %v11155_v2  ;;  %7130 = vmatprep.mubr.msk.bf16.mxu1 %vm2885_vm0, %v11157_v55  ;;  %v3721_v8 = vmax.f32 %v3541_v33, 0.0  ;;  %v7922_v38 = vld [vmem:[%s12127_s8 + $0x2ac] ss:$28 sps:$4 sm:$0xff]  }
 0x3a1   :  { %v3544_v54 = vpop.f32.mrf.mxu0  ;;  %v3657_v13 = vpop.f32.mrf.mxu1  ;;  %5010 = vmatmul.mubr.bf16.gmra.mxu0 %v11165_v31  ;;  %5123 = vmatmul.mubr.bf16.gmra.mxu1 %v11167_v45  ;;  %v3723_v9 = vmax.f32 %v3654_v14, 0.0 }
 0x3a2   :  { %v3545_v53 = vadd.f32 %v3544_v54, %v10959_v44  ;;  %v3658_v32 = vadd.f32 %v3657_v13, %v10962_v39  ;;  %5180 = vmatpush2.bf16.msra.mxu0 %v7905_v0  ;;  %v3724_v27 = vmax.f32 %v3543_v40, 0.0  ;;  %v3726_v48 = vmax.f32 %v3656_v43, 0.0  ;;  %5307 = vmatpush2.bf16.msra.mxu1 %v7941_v59  ;;  %v7920_v13 = vld [vmem:[%s12127_s8 + $0x2a8] ss:$28 sps:$4 sm:$0xff]  }
 0x3a3   :  { %v3548_v20 = vpop.f32.mrf.mxu0  ;;  %v3661_v49 = vpop.f32.mrf.mxu1  ;;  %5181 = vmatprep.subr.bf16.mxu0 %v7913_v4  ;;  %5502 = vmatprep.subr.bf16.mxu1 %v7952_v23 }
 0x3a4   :  { %v3725_v3 = vmax.f32 %v3545_v53, 0.0  ;;  %v3727_v62 = vmax.f32 %v3658_v32, 0.0  ;;  %v11204_v58 = vpack.c.bf16 %v3724_v27, %v3720_v52  ;;  %v11206_v0 = vpack.c.bf16 %v3726_v48, %v3722_v36  ;;  %v7925_v48 = vld [vmem:[%s12127_s8 + $0x274] ss:$28 sps:$4 sm:$0xff]  }
 0x3a5   :  { %v3550_v17 = vpop.f32.mrf.mxu0  ;;  %v3663_v19 = vpop.f32.mrf.mxu1  ;;  %v3549_v40 = vadd.f32 %v3548_v20, %v10965_v21  ;;  %v3662_v43 = vadd.f32 %v3661_v49, %v10968_v18 }
 0x3a6   :  { %v11197_v51 = vpack.c.bf16 %v3725_v3, %v3721_v8  ;;  %v11199_v1 = vpack.c.bf16 %v3727_v62, %v3723_v9  ;;  %5182 = vmatpush2.bf16.msra.mxu0 %v7911_v57  ;;  %v3551_v35 = vadd.f32 %v3550_v17, %v10959_v44  ;;  %v3664_v4 = vadd.f32 %v3663_v19, %v10962_v39  ;;  %v7923_v19 = vld [vmem:[%s12127_s8 + $0x270] ss:$28 sps:$4 sm:$0xff]  }
 0x3a7   :  { %v3552_v33 = vpop.f32.mrf.mxu0  ;;  %v3665_v25 = vpop.f32.mrf.mxu1  ;;  %5183 = vmatprep.subr.bf16.mxu0 %v7916_v50  ;;  %v3728_v9 = vmax.f32 %v3549_v40, 0.0  ;;  %v3730_v3 = vmax.f32 %v3662_v43, 0.0 }
 0x3a8   :  { %v3553_v59 = vadd.f32 %v3552_v33, %v10965_v21  ;;  %v3666_v14 = vadd.f32 %v3665_v25, %v10968_v18  ;;  %5019 = vmatprep.mubr.bf16.mxu0 %v11197_v51  ;;  %7131 = vmatprep.mubr.msk.bf16.mxu1 %vm2885_vm0, %v11199_v1  ;;  %v3729_v20 = vmax.f32 %v3551_v35, 0.0  ;;  %v3731_v49 = vmax.f32 %v3664_v4, 0.0  ;;  %v7931_v4 = vld [vmem:[%s12127_s8 + $0x23c] ss:$28 sps:$4 sm:$0xff]  }
 0x3a9   :  { %v3554_v23 = vpop.f32.mrf.mxu0  ;;  %v3667_v42 = vpop.f32.mrf.mxu1  ;;  %5020 = vmatmul.mubr.bf16.gmra.mxu0 %v11204_v58  ;;  %5133 = vmatmul.mubr.bf16.gmra.mxu1 %v11206_v0 }
 0x3aa   :  { %v3555_v11 = vadd.f32 %v3554_v23, %v10959_v44  ;;  %v3668_v54 = vadd.f32 %v3667_v42, %v10962_v39  ;;  %5184 = vmatpush2.bf16.msra.mxu0 %v7914_v60  ;;  %v3732_v53 = vmax.f32 %v3553_v59, 0.0  ;;  %v3734_v32 = vmax.f32 %v3666_v14, 0.0 }
 0x3ab   :  { %v3558_v57 = vpop.f32.mrf.mxu0  ;;  %v3671_v27 = vpop.f32.mrf.mxu1  ;;  %5185 = vmatprep.subr.bf16.mxu0 %v7922_v38 }
 0x3ac   :  { %v3733_v50 = vmax.f32 %v3555_v11, 0.0  ;;  %v3735_v8 = vmax.f32 %v3668_v54, 0.0  ;;  %v11237_v60 = vpack.c.bf16 %v3732_v53, %v3728_v9  ;;  %v11239_v33 = vpack.c.bf16 %v3734_v32, %v3730_v3  ;;  %v7929_v53 = vld [vmem:[%s12127_s8 + $0x238] ss:$28 sps:$4 sm:$0xff]  }
 0x3ad   :  { %v3560_v62 = vpop.f32.mrf.mxu0  ;;  %v3673_v52 = vpop.f32.mrf.mxu1  ;;  %v3559_v43 = vadd.f32 %v3558_v57, %v10965_v21  ;;  %v3672_v23 = vadd.f32 %v3671_v27, %v10968_v18 }
 0x3ae   :  { %v11230_v36 = vpack.c.bf16 %v3733_v50, %v3729_v20  ;;  %v11232_v17 = vpack.c.bf16 %v3735_v8, %v3731_v49  ;;  %5186 = vmatpush2.bf16.msra.mxu0 %v7920_v13  ;;  %v3561_v35 = vadd.f32 %v3560_v62, %v10959_v44  ;;  %v3674_v59 = vadd.f32 %v3673_v52, %v10962_v39  ;;  %v7932_v8 = vld [vmem:[%s12127_s8 + $0x200] ss:$28 sps:$4 sm:$0xff]   ;;  %v7940_v62 = vld [vmem:[%s12127_s8 + $0x1cc] ss:$28 sps:$4 sm:$0xff]  }
 0x3af   :  { %v3562_v25 = vpop.f32.mrf.mxu0  ;;  %v3675_v38 = vpop.f32.mrf.mxu1  ;;  %5187 = vmatprep.subr.bf16.mxu0 %v7925_v48  ;;  %v3736_v49 = vmax.f32 %v3559_v43, 0.0  ;;  %v7938_v52 = vld [vmem:[%s12127_s8 + $0x1c8] ss:$28 sps:$4 sm:$0xff]  }
 0x3b0   :  { %v3563_v14 = vadd.f32 %v3562_v25, %v10965_v21  ;;  %v3676_v40 = vadd.f32 %v3675_v38, %v10968_v18  ;;  %5029 = vmatprep.mubr.bf16.mxu0 %v11230_v36  ;;  %7132 = vmatprep.mubr.msk.bf16.mxu1 %vm2885_vm0, %v11232_v17  ;;  %v7934_v21 = vld [vmem:[%s12127_s8 + $0x204] ss:$28 sps:$4 sm:$0xff]   ;;  %v3737_v18 = vmax.f32 %v3561_v35, 0.0  ;;  %v3739_v57 = vmax.f32 %v3674_v59, 0.0  ;;  %v7944_v35 = vld [vmem:[%s12127_s8 + $0x198] ss:$28 sps:$4 sm:$0xff]  }
 0x3b1   :  { %v3564_v42 = vpop.f32.mrf.mxu0  ;;  %v3677_v11 = vpop.f32.mrf.mxu1  ;;  %5030 = vmatmul.mubr.bf16.gmra.mxu0 %v11237_v60  ;;  %5143 = vmatmul.mubr.bf16.gmra.mxu1 %v11239_v33  ;;  %v7950_v25 = vld [vmem:[%s12127_s8 + $0x518] ss:$28 sps:$4 sm:$0xff]   ;;  %v7949_v38 = vld [vmem:[%s12127_s8 + $0x164] ss:$28 sps:$4 sm:$0xff]   ;;  %v7970_v43 = vld [vmem:[%s12127_s8 + $0x4ac] ss:$28 sps:$4 sm:$0xff]  }
 0x3b2   :  { %v3565_v54 = vadd.f32 %v3564_v42, %v10959_v44  ;;  %v3678_v13 = vadd.f32 %v3677_v11, %v10962_v39  ;;  %5188 = vmatpush2.bf16.msra.mxu0 %v7923_v19  ;;  %v3740_v32 = vmax.f32 %v3563_v14, 0.0  ;;  %v3742_v48 = vmax.f32 %v3676_v40, 0.0  ;;  %v7946_v19 = vld [vmem:[%s12127_s8 + $0x19c] ss:$28 sps:$4 sm:$0xff]   ;;  %v7955_v40 = vld [vmem:[%s12127_s8 + $0x12c] ss:$28 sps:$4 sm:$0xff]  }
 0x3b3   :  { %5189 = vmatprep.subr.bf16.mxu0 %v7931_v4  ;;  %v3738_v44 = vmax.f32 %v3672_v23, 0.0  ;;  %v7961_v4 = vld [vmem:[%s12127_s8 + $0x4e4] ss:$28 sps:$4 sm:$0xff]   ;;  %v7958_v11 = vld [vmem:[%s12127_s8 + $0xf4] ss:$28 sps:$4 sm:$0xff]  }
 0x3b4   :  { %v3741_v27 = vmax.f32 %v3565_v54, 0.0  ;;  %v3743_v20 = vmax.f32 %v3678_v13, 0.0  ;;  %v11270_v9 = vpack.c.bf16 %v3740_v32, %v3736_v49  ;;  %v7947_v59 = vld [vmem:[%s12127_s8 + $0x160] ss:$28 sps:$4 sm:$0xff]   ;;  %v7953_v23 = vld [vmem:[%s12127_s8 + $0x128] ss:$28 sps:$4 sm:$0xff]  }
 0x3b5   :  { %v11272_v3 = vpack.c.bf16 %v3742_v48, %v3738_v44  ;;  %v7959_v14 = vld [vmem:[%s12127_s8 + $0x4e0] ss:$28 sps:$4 sm:$0xff]   ;;  %v7968_v42 = vld [vmem:[%s12127_s8 + $0x4a8] ss:$28 sps:$4 sm:$0xff]   ;;  %v7979_v54 = vld [vmem:[%s12127_s8 + $0x474] ss:$28 sps:$4 sm:$0xff]  }
 0x3b6   :  { %v11263_v50 = vpack.c.bf16 %v3741_v27, %v3737_v18  ;;  %v11265_v39 = vpack.c.bf16 %v3743_v20, %v3739_v57  ;;  %5190 = vmatpush2.bf16.msra.mxu0 %v7929_v53  ;;  %v7956_v13 = vld [vmem:[%s12127_s8 + $0xf0] ss:$28 sps:$4 sm:$0xff]   ;;  %v7964_v32 = vld [vmem:[%s12127_s8 + $0xbc] ss:$28 sps:$4 sm:$0xff]   ;;  %v7967_v57 = vld [vmem:[%s12127_s8 + $0x84] ss:$28 sps:$4 sm:$0xff]  }
 0x3b7   :  { %5191 = vmatprep.subr.bf16.mxu0 %v7934_v21  ;;  %v7977_v53 = vld [vmem:[%s12127_s8 + $0x470] ss:$28 sps:$4 sm:$0xff]   ;;  %v7985_v48 = vld [vmem:[%s12127_s8 + $0x43c] ss:$28 sps:$4 sm:$0xff]   ;;  %v7994_v27 = vld [vmem:[%s12127_s8 + $0x404] ss:$28 sps:$4 sm:$0xff]  }
 0x3b8   :  { %5039 = vmatprep.mubr.bf16.mxu0 %v11263_v50  ;;  %7133 = vmatprep.mubr.msk.bf16.mxu1 %vm2885_vm0, %v11265_v39  ;;  %v7962_v21 = vld [vmem:[%s12127_s8 + $0xb8] ss:$28 sps:$4 sm:$0xff]   ;;  %v7965_v20 = vld [vmem:[%s12127_s8 + $0x80] ss:$28 sps:$4 sm:$0xff]   ;;  %v7973_v44 = vld [vmem:[%s12127_s8 + $0x4c] ss:$28 sps:$4 sm:$0xff]  }
 0x3b9   :  { %5040 = vmatmul.mubr.bf16.gmra.mxu0 %v11270_v9  ;;  %5153 = vmatmul.mubr.bf16.gmra.mxu1 %v11272_v3  ;;  %v7983_v18 = vld [vmem:[%s12127_s8 + $0x438] ss:$28 sps:$4 sm:$0xff]   ;;  %v7992_v49 = vld [vmem:[%s12127_s8 + $0x400] ss:$28 sps:$4 sm:$0xff]  }
 0x3ba   :  { %5192 = vmatpush2.bf16.msra.mxu0 %v7932_v8  ;;  %5195 = vmatprep.mubr.bf16.mxu0 %v10978_v56  ;;  %v8003_v8 = vld [vmem:[%s12127_s8 + $0x3cc] ss:$28 sps:$4 sm:$0xff]  }
 0x3bb   :  { %7134 = vmatprep.mubr.msk.bf16.mxu1 %vm2885_vm0, %v10980_v46  ;;  %5193 = vmatprep.subr.bf16.mxu0 %v7940_v62  ;;  %v7971_v62 = vld [vmem:[%s12127_s8 + $0x48] ss:$28 sps:$4 sm:$0xff]  }
 0x3be   :  { %5194 = vmatpush2.bf16.msra.mxu0 %v7938_v52  ;;  %v8001_v52 = vld [vmem:[%s12127_s8 + $0x3c8] ss:$28 sps:$4 sm:$0xff]  }
 0x3bf   :  { %5389 = vmatprep.subr.bf16.mxu0 %v7946_v19  ;;  %v7976_v19 = vld [vmem:[%s12127_s8 + $0x14] ss:$28 sps:$4 sm:$0xff]  }
 0x3c1   :  { %5196 = vmatmul.mubr.bf16.vlgmr.msra.gmra.mxu0 %v10988_v15  ;;  %5309 = vmatmul.mubr.bf16.vlgmr.msra.gmra.mxu1 %v10990_v41 }
 0x3c2   :  { %5205 = vmatprep.mubr.bf16.mxu0 %v11020_v28  ;;  %7135 = vmatprep.mubr.msk.bf16.mxu1 %vm2885_vm0, %v11022_v5 }
 0x3c3   :  { %5390 = vmatpush1.bf16.msra.mxu0 %v7944_v35  ;;  %5503 = vmatpush1.bf16.msra.mxu1 %v7950_v25  ;;  %v8012_v35 = vld [vmem:[%s12127_s8 + $0x394] ss:$28 sps:$4 sm:$0xff]  }
 0x3c4   :  { %5391 = vmatprep.subr.bf16.mxu0 %v7949_v38  ;;  %5504 = vmatprep.subr.bf16.mxu1 %v7961_v4  ;;  %v7974_v25 = vld [vmem:[%s12127_s8 + $0x10] ss:$28 sps:$4 sm:$0xff]   ;;  %v7982_v4 = vld [vmem:[%s12127_s8 + $0x35c] ss:$28 sps:$4 sm:$0xff]  }
 0x3c5   :  { %v8010_v38 = vld [vmem:[%s12127_s8 + $0x390] ss:$28 sps:$4 sm:$0xff]  }
 0x3c7   :  { %5392 = vmatpush1.bf16.msra.mxu0 %v7947_v59  ;;  %5505 = vmatpush1.bf16.msra.mxu1 %v7959_v14  ;;  %v8018_v59 = vld [vmem:[%s12127_s8 + $0x554] ss:$28 sps:$4 sm:$0xff]  }
 0x3c8   :  { %5393 = vmatprep.subr.bf16.mxu0 %v7955_v40  ;;  %5506 = vmatprep.subr.bf16.mxu1 %v7970_v43  ;;  %v7980_v14 = vld [vmem:[%s12127_s8 + $0x358] ss:$28 sps:$4 sm:$0xff]   ;;  %v8016_v40 = vld [vmem:[%s12127_s8 + $0x550] ss:$28 sps:$4 sm:$0xff]   ;;  %v7988_v43 = vld [vmem:[%s12127_s8 + $0x324] ss:$28 sps:$4 sm:$0xff]  }
 0x3c9   :  { %5206 = vmatmul.mubr.bf16.gmra.mxu0 %v11030_v7  ;;  %5319 = vmatmul.mubr.bf16.gmra.mxu1 %v11032_v34 }
 0x3ca   :  { %5215 = vmatprep.mubr.bf16.mxu0 %v11065_v6  ;;  %7136 = vmatprep.mubr.msk.bf16.mxu1 %vm2885_vm0, %v11067_v61 }
 0x3cb   :  { %5394 = vmatpush1.bf16.msra.mxu0 %v7953_v23  ;;  %5507 = vmatpush1.bf16.msra.mxu1 %v7968_v42  ;;  %v7986_v23 = vld [vmem:[%s12127_s8 + $0x320] ss:$28 sps:$4 sm:$0xff]   ;;  %v7991_v42 = vld [vmem:[%s12127_s8 + $0x2ec] ss:$28 sps:$4 sm:$0xff]  }
 0x3cc   :  { %5395 = vmatprep.subr.bf16.mxu0 %v7958_v11  ;;  %5508 = vmatprep.subr.bf16.mxu1 %v7979_v54  ;;  %v7989_v11 = vld [vmem:[%s12127_s8 + $0x2e8] ss:$28 sps:$4 sm:$0xff]   ;;  %v7997_v54 = vld [vmem:[%s12127_s8 + $0x2b4] ss:$28 sps:$4 sm:$0xff]  }
 0x3cf   :  { %5396 = vmatpush1.bf16.msra.mxu0 %v7956_v13  ;;  %5509 = vmatpush1.bf16.msra.mxu1 %v7977_v53  ;;  %v7995_v13 = vld [vmem:[%s12127_s8 + $0x2b0] ss:$28 sps:$4 sm:$0xff]   ;;  %v8000_v53 = vld [vmem:[%s12127_s8 + $0x27c] ss:$28 sps:$4 sm:$0xff]  }
 0x3d0   :  { %5397 = vmatprep.subr.bf16.mxu0 %v7964_v32  ;;  %5510 = vmatprep.subr.bf16.mxu1 %v7985_v48  ;;  %v7998_v32 = vld [vmem:[%s12127_s8 + $0x278] ss:$28 sps:$4 sm:$0xff]   ;;  %v8006_v48 = vld [vmem:[%s12127_s8 + $0x244] ss:$28 sps:$4 sm:$0xff]  }
 0x3d1   :  { %5216 = vmatmul.mubr.bf16.gmra.mxu0 %v11075_v63  ;;  %5329 = vmatmul.mubr.bf16.gmra.mxu1 %v11077_v47 }
 0x3d2   :  { %5225 = vmatprep.mubr.bf16.mxu0 %v11110_v37  ;;  %7137 = vmatprep.mubr.msk.bf16.mxu1 %vm2885_vm0, %v11112_v24 }
 0x3d3   :  { %5398 = vmatpush1.bf16.msra.mxu0 %v7962_v21  ;;  %5511 = vmatpush1.bf16.msra.mxu1 %v7983_v18  ;;  %v8004_v21 = vld [vmem:[%s12127_s8 + $0x240] ss:$28 sps:$4 sm:$0xff]   ;;  %v8009_v18 = vld [vmem:[%s12127_s8 + $0x20c] ss:$28 sps:$4 sm:$0xff]  }
 0x3d4   :  { %5399 = vmatprep.subr.bf16.mxu0 %v7967_v57  ;;  %5512 = vmatprep.subr.bf16.mxu1 %v7994_v27  ;;  %v8007_v57 = vld [vmem:[%s12127_s8 + $0x208] ss:$28 sps:$4 sm:$0xff]   ;;  %v8015_v27 = vld [vmem:[%s12127_s8 + $0x1d4] ss:$28 sps:$4 sm:$0xff]  }
 0x3d7   :  { %5400 = vmatpush1.bf16.msra.mxu0 %v7965_v20  ;;  %5513 = vmatpush1.bf16.msra.mxu1 %v7992_v49  ;;  %v8013_v20 = vld [vmem:[%s12127_s8 + $0x1d0] ss:$28 sps:$4 sm:$0xff]   ;;  %v8019_v49 = vld [vmem:[%s12127_s8 + $0x360] ss:$28 sps:$4 sm:$0xff]  }
 0x3d8   :  { %5401 = vmatprep.subr.bf16.mxu0 %v7973_v44  ;;  %5514 = vmatprep.subr.bf16.mxu1 %v8003_v8  ;;  %v8020_v44 = vld [vmem:[%s12127_s8 + $0x1a0] ss:$28 sps:$4 sm:$0xff]  }
 0x3d9   :  { %5226 = vmatmul.mubr.bf16.gmra.mxu0 %v11120_v10  ;;  %5339 = vmatmul.mubr.bf16.gmra.mxu1 %v11122_v30  ;;  %v8021_v8 = vld [vmem:[%s12127_s8 + $0x520] ss:$28 sps:$4 sm:$0xff]  }
 0x3da   :  { %5235 = vmatprep.mubr.bf16.mxu0 %v11155_v2  ;;  %7138 = vmatprep.mubr.msk.bf16.mxu1 %vm2885_vm0, %v11157_v55 }
 0x3db   :  { %5402 = vmatpush1.bf16.msra.mxu0 %v7971_v62  ;;  %5515 = vmatpush1.bf16.msra.mxu1 %v8001_v52  ;;  %v8022_v62 = vld [vmem:[%s12127_s8 + $0x328] ss:$28 sps:$4 sm:$0xff]  }
 0x3dc   :  { %5403 = vmatprep.subr.bf16.mxu0 %v7976_v19  ;;  %5516 = vmatprep.subr.bf16.mxu1 %v8012_v35  ;;  %v8023_v52 = vld [vmem:[%s12127_s8 + $0x168] ss:$28 sps:$4 sm:$0xff]   ;;  %v8025_v35 = vld [vmem:[%s12127_s8 + $0x2f0] ss:$28 sps:$4 sm:$0xff]  }
 0x3dd   :  { %v8024_v19 = vld [vmem:[%s12127_s8 + $0x4e8] ss:$28 sps:$4 sm:$0xff]  }
 0x3df   :  { %5404 = vmatpush1.bf16.msra.mxu0 %v7974_v25  ;;  %5517 = vmatpush1.bf16.msra.mxu1 %v8010_v38  ;;  %v8026_v25 = vld [vmem:[%s12127_s8 + $0x130] ss:$28 sps:$4 sm:$0xff]  }
 0x3e0   :  { %5405 = vmatprep.subr.bf16.mxu0 %v7982_v4  ;;  %5532 = vmatprep.subr.bf16.mxu1 %v8018_v59  ;;  %v8027_v38 = vld [vmem:[%s12127_s8 + $0x4b0] ss:$28 sps:$4 sm:$0xff]   ;;  %v8028_v4 = vld [vmem:[%s12127_s8 + $0x2b8] ss:$28 sps:$4 sm:$0xff]  }
 0x3e1   :  { %5236 = vmatmul.mubr.bf16.gmra.mxu0 %v11165_v31  ;;  %5349 = vmatmul.mubr.bf16.gmra.mxu1 %v11167_v45  ;;  %v8029_v59 = vld [vmem:[%s12127_s8 + $0xf8] ss:$28 sps:$4 sm:$0xff]  }
 0x3e2   :  { %5245 = vmatprep.mubr.bf16.mxu0 %v11197_v51  ;;  %7139 = vmatprep.mubr.msk.bf16.mxu1 %vm2885_vm0, %v11199_v1 }
 0x3e3   :  { %5406 = vmatpush2.bf16.msra.mxu0 %v7980_v14  ;;  %5533 = vmatpush2.bf16.msra.mxu1 %v8016_v40  ;;  %v8030_v14 = vld [vmem:[%s12127_s8 + $0x478] ss:$28 sps:$4 sm:$0xff]   ;;  %v8031_v40 = vld [vmem:[%s12127_s8 + $0x280] ss:$28 sps:$4 sm:$0xff]  }
 0x3e4   :  { %5407 = vmatprep.subr.bf16.mxu0 %v7988_v43  ;;  %5712 = vmatprep.subr.bf16.mxu1 %v12192_v22  ;;  %v8032_v43 = vld [vmem:[%s12127_s8 + $0xc0] ss:$28 sps:$4 sm:$0xff]  }
 0x3e7   :  { %5408 = vmatpush2.bf16.msra.mxu0 %v7986_v23  ;;  %v8033_v23 = vld [vmem:[%s12127_s8 + $0x440] ss:$28 sps:$4 sm:$0xff]  }
 0x3e8   :  { %5409 = vmatprep.subr.bf16.mxu0 %v7991_v42  ;;  %v8034_v42 = vld [vmem:[%s12127_s8 + $0x248] ss:$28 sps:$4 sm:$0xff]  }
 0x3e9   :  { %5246 = vmatmul.mubr.bf16.gmra.mxu0 %v11204_v58  ;;  %5359 = vmatmul.mubr.bf16.gmra.mxu1 %v11206_v0 }
 0x3ea   :  { %5255 = vmatprep.mubr.bf16.mxu0 %v11230_v36  ;;  %7140 = vmatprep.mubr.msk.bf16.mxu1 %vm2885_vm0, %v11232_v17 }
 0x3eb   :  { %5410 = vmatpush2.bf16.msra.mxu0 %v7989_v11  ;;  %v8035_v11 = vld [vmem:[%s12127_s8 + $0x88] ss:$28 sps:$4 sm:$0xff]  }
 0x3ec   :  { %5411 = vmatprep.subr.bf16.mxu0 %v7997_v54  ;;  %v8036_v54 = vld [vmem:[%s12127_s8 + $0x408] ss:$28 sps:$4 sm:$0xff]  }
 0x3ef   :  { %5412 = vmatpush2.bf16.msra.mxu0 %v7995_v13  ;;  %v8037_v13 = vld [vmem:[%s12127_s8 + $0x210] ss:$28 sps:$4 sm:$0xff]  }
 0x3f0   :  { %5413 = vmatprep.subr.bf16.mxu0 %v8000_v53  ;;  %v8038_v53 = vld [vmem:[%s12127_s8 + $0x50] ss:$28 sps:$4 sm:$0xff]  }
 0x3f1   :  { %5256 = vmatmul.mubr.bf16.gmra.mxu0 %v11237_v60  ;;  %5369 = vmatmul.mubr.bf16.gmra.mxu1 %v11239_v33 }
 0x3f2   :  { %5265 = vmatprep.mubr.bf16.mxu0 %v11263_v50  ;;  %7141 = vmatprep.mubr.msk.bf16.mxu1 %vm2885_vm0, %v11265_v39 }
 0x3f3   :  { %5414 = vmatpush2.bf16.msra.mxu0 %v7998_v32  ;;  %v8039_v32 = vld [vmem:[%s12127_s8 + $0x3d0] ss:$28 sps:$4 sm:$0xff]  }
 0x3f4   :  { %5415 = vmatprep.subr.bf16.mxu0 %v8006_v48  ;;  %v8040_v48 = vld [vmem:[%s12127_s8 + $0x1d8] ss:$28 sps:$4 sm:$0xff]  }
 0x3f7   :  { %5416 = vmatpush2.bf16.msra.mxu0 %v8004_v21  ;;  %v8041_v21 = vld [vmem:[%s12127_s8 + $0x18] ss:$28 sps:$4 sm:$0xff]  }
 0x3f8   :  { %5417 = vmatprep.subr.bf16.mxu0 %v8009_v18  ;;  %v8042_v18 = vld [vmem:[%s12127_s8 + $0x398] ss:$28 sps:$4 sm:$0xff]  }
 0x3f9   :  { %5266 = vmatmul.mubr.bf16.gmra.mxu0 %v11270_v9  ;;  %5379 = vmatmul.mubr.bf16.gmra.mxu1 %v11272_v3 }
 0x3fa   :  { %5421 = vmatprep.mubr.bf16.mxu0 %v10978_v56  ;;  %7142 = vmatprep.mubr.msk.bf16.mxu1 %vm2885_vm0, %v10980_v46 }
 0x3fb   :  { %5418 = vmatpush2.bf16.msra.mxu0 %v8007_v57  ;;  %v8043_v57 = vld [vmem:[%s12127_s8 + $0x558] ss:$28 sps:$4 sm:$0xff]  }
 0x3fc   :  { %5419 = vmatprep.subr.bf16.mxu0 %v8015_v27 }
 0x3ff   :  { %5420 = vmatpush2.bf16.msra.mxu0 %v8013_v20 }
 0x400   :  { %7270 = vmatprep.subr.bf16.mxu0 %v8019_v49 }
 0x401   :  { %5535 = vmatmul.mubr.bf16.vlgmr.msra.gmra.mxu1 %v10990_v41 }
 0x402   :  { %5422 = vmatmul.mubr.bf16.vlgmr.msra.gmra.mxu0 %v10988_v15  ;;  %7143 = vmatprep.mubr.msk.bf16.mxu1 %vm2885_vm0, %v11022_v5 }
 0x403   :  { %5431 = vmatprep.mubr.bf16.mxu0 %v11020_v28  ;;  %7271 = vmatpush3.bf16.msra.mxu0 %v8020_v44 }
 0x404   :  { %5713 = vmatpush1.bf16.msra.mxu1 %v8021_v8  ;;  %7272 = vmatprep.subr.bf16.mxu0 %v8022_v62 }
 0x405   :  { %5714 = vmatprep.subr.bf16.mxu1 %v12192_v22 }
 0x407   :  { %7273 = vmatpush3.bf16.msra.mxu0 %v8023_v52 }
 0x408   :  { %5715 = vmatpush1.bf16.msra.mxu1 %v8024_v19  ;;  %7274 = vmatprep.subr.bf16.mxu0 %v8025_v35 }
 0x409   :  { %5545 = vmatmul.mubr.bf16.gmra.mxu1 %v11032_v34  ;;  %5716 = vmatprep.subr.bf16.mxu1 %v12192_v22 }
 0x40a   :  { %5432 = vmatmul.mubr.bf16.gmra.mxu0 %v11030_v7  ;;  %7144 = vmatprep.mubr.msk.bf16.mxu1 %vm2885_vm0, %v11067_v61 }
 0x40b   :  { %5441 = vmatprep.mubr.bf16.mxu0 %v11065_v6  ;;  %7275 = vmatpush3.bf16.msra.mxu0 %v8026_v25 }
 0x40c   :  { %5717 = vmatpush1.bf16.msra.mxu1 %v8027_v38  ;;  %7276 = vmatprep.subr.bf16.mxu0 %v8028_v4 }
 0x40d   :  { %5718 = vmatprep.subr.bf16.mxu1 %v12192_v22 }
 0x40f   :  { %7277 = vmatpush3.bf16.msra.mxu0 %v8029_v59 }
 0x410   :  { %5719 = vmatpush1.bf16.msra.mxu1 %v8030_v14  ;;  %7278 = vmatprep.subr.bf16.mxu0 %v8031_v40 }
 0x411   :  { %5555 = vmatmul.mubr.bf16.gmra.mxu1 %v11077_v47  ;;  %5720 = vmatprep.subr.bf16.mxu1 %v12192_v22 }
 0x412   :  { %5442 = vmatmul.mubr.bf16.gmra.mxu0 %v11075_v63  ;;  %7145 = vmatprep.mubr.msk.bf16.mxu1 %vm2885_vm0, %v11112_v24 }
 0x413   :  { %5451 = vmatprep.mubr.bf16.mxu0 %v11110_v37  ;;  %7279 = vmatpush3.bf16.msra.mxu0 %v8032_v43 }
 0x414   :  { %5721 = vmatpush1.bf16.msra.mxu1 %v8033_v23  ;;  %7280 = vmatprep.subr.bf16.mxu0 %v8034_v42 }
 0x415   :  { %5722 = vmatprep.subr.bf16.mxu1 %v12192_v22 }
 0x417   :  { %7281 = vmatpush3.bf16.msra.mxu0 %v8035_v11 }
 0x418   :  { %5723 = vmatpush1.bf16.msra.mxu1 %v8036_v54  ;;  %7282 = vmatprep.subr.bf16.mxu0 %v8037_v13 }
 0x419   :  { %5565 = vmatmul.mubr.bf16.gmra.mxu1 %v11122_v30  ;;  %5724 = vmatprep.subr.bf16.mxu1 %v12192_v22 }
 0x41a   :  { %5452 = vmatmul.mubr.bf16.gmra.mxu0 %v11120_v10  ;;  %7146 = vmatprep.mubr.msk.bf16.mxu1 %vm2885_vm0, %v11157_v55 }
 0x41b   :  { %5461 = vmatprep.mubr.bf16.mxu0 %v11155_v2  ;;  %7283 = vmatpush3.bf16.msra.mxu0 %v8038_v53 }
 0x41c   :  { %5725 = vmatpush1.bf16.msra.mxu1 %v8039_v32  ;;  %7284 = vmatprep.subr.bf16.mxu0 %v8040_v48 }
 0x41d   :  { %5726 = vmatprep.subr.bf16.mxu1 %v12192_v22 }
 0x41f   :  { %7285 = vmatpush3.bf16.msra.mxu0 %v8041_v21 }
 0x420   :  { %5727 = vmatpush1.bf16.msra.mxu1 %v8042_v18 }
 0x421   :  { %5575 = vmatmul.mubr.bf16.gmra.mxu1 %v11167_v45  ;;  %5742 = vmatprep.subr.bf16.mxu1 %v12192_v22  ;;  %v11602_v22 = vld [vmem:[%s12133_s9] sm:$0xff] }
 0x422   :  { %5462 = vmatmul.mubr.bf16.gmra.mxu0 %v11165_v31  ;;  %7147 = vmatprep.mubr.msk.bf16.mxu1 %vm2885_vm0, %v11199_v1  ;;  %v11606_v27 = vrot.slane %v11602_v22, %v12193_v26  ;;  %v11610_v20 = vrot.slane %v11602_v22, %v12194_v12 }
 0x423   :  { %5471 = vmatprep.mubr.bf16.mxu0 %v11197_v51 }
 0x424   :  { %5743 = vmatpush2.bf16.msra.mxu1 %v8043_v57 }
 0x429   :  { %5585 = vmatmul.mubr.bf16.gmra.mxu1 %v11206_v0 }
 0x42a   :  { %5472 = vmatmul.mubr.bf16.gmra.mxu0 %v11204_v58  ;;  %7148 = vmatprep.mubr.msk.bf16.mxu1 %vm2885_vm0, %v11232_v17 }
 0x42b   :  { %5481 = vmatprep.mubr.bf16.mxu0 %v11230_v36 }
 0x431   :  { %5595 = vmatmul.mubr.bf16.gmra.mxu1 %v11239_v33 }
 0x432   :  { %5482 = vmatmul.mubr.bf16.gmra.mxu0 %v11237_v60  ;;  %7149 = vmatprep.mubr.msk.bf16.mxu1 %vm2885_vm0, %v11265_v39 }
 0x433   :  { %5491 = vmatprep.mubr.bf16.mxu0 %v11263_v50 }
 0x439   :  { %5605 = vmatmul.mubr.bf16.gmra.mxu1 %v11272_v3 }
 0x43a   :  { %5492 = vmatmul.mubr.bf16.gmra.mxu0 %v11270_v9  ;;  %7150 = vmatprep.mubr.msk.bf16.mxu1 %vm2885_vm0, %v10980_v46 }
 0x43b   :  { %5647 = vmatprep.mubr.bf16.mxu0 %v10978_v56 }
 0x441   :  { %v4971_v49 = vpop.f32.mrf.mxu0  ;;  %v5084_v44 = vpop.f32.mrf.mxu1  ;;  %5745 = vmatmul.mubr.bf16.vlgmr.msra.gmra.mxu1 %v10990_v41 }
 0x442   :  { %v4972_v46 = vadd.f32 %v4971_v49, %v11606_v27  ;;  %5648 = vmatmul.mubr.bf16.vlgmr.msra.gmra.mxu0 %v10988_v15  ;;  %7151 = vmatprep.mubr.msk.bf16.mxu1 %vm2885_vm0, %v11022_v5 }
 0x443   :  { %5655 = vmatprep.mubr.bf16.mxu0 %v11020_v28  ;;  %v4973_v56 = vpop.f32.mrf.mxu0  ;;  %v5086_v26 = vpop.f32.mrf.mxu1 }
 0x444   :  { %v5085_v8 = vadd.f32 %v5084_v44, %v4972_v46  ;;  %v4974_v62 = vadd.f32 %v4973_v56, %v11610_v20 }
 0x445   :  { %v4975_v12 = vpop.f32.mrf.mxu0  ;;  %v5088_v52 = vpop.f32.mrf.mxu1 }
 0x446   :  { %v7158_v19 = vmul.f32 -1.442695, %v5085_v8  ;;  %v5087_v35 = vadd.f32 %v5086_v26, %v4974_v62  ;;  %v4976_v41 = vadd.f32 %v4975_v12, %v11606_v27 }
 0x447   :  { %v4977_v25 = vpop.f32.mrf.mxu0  ;;  %v5090_v38 = vpop.f32.mrf.mxu1 }
 0x448   :  { %8076 = vpow2.f32 %v7158_v19  ;;  %v7159_v15 = vmul.f32 -1.442695, %v5087_v35  ;;  %v5089_v4 = vadd.f32 %v5088_v52, %v4976_v41  ;;  %v4978_v5 = vadd.f32 %v4977_v25, %v11610_v20 }
 0x449   :  { %v4981_v59 = vpop.f32.mrf.mxu0  ;;  %v5094_v28 = vpop.f32.mrf.mxu1  ;;  %5753 = vmatmul.mubr.bf16.gmra.mxu1 %v11032_v34 }
 0x44a   :  { %8078 = vpow2.f32 %v7159_v15  ;;  %v7165_v14 = vmul.f32 -1.442695, %v5089_v4  ;;  %v5091_v40 = vadd.f32 %v5090_v38, %v4978_v5  ;;  %v4982_v43 = vadd.f32 %v4981_v59, %v11606_v27  ;;  %5656 = vmatmul.mubr.bf16.gmra.mxu0 %v11030_v7  ;;  %7152 = vmatprep.mubr.msk.bf16.mxu1 %vm2885_vm0, %v11067_v61 }
 0x44b   :  { %5663 = vmatprep.mubr.bf16.mxu0 %v11065_v6  ;;  %v4983_v23 = vpop.f32.mrf.mxu0  ;;  %v5096_v42 = vpop.f32.mrf.mxu1 }
 0x44c   :  { %8080 = vpow2.f32 %v7165_v14  ;;  %v7166_v11 = vmul.f32 -1.442695, %v5091_v40  ;;  %v5095_v54 = vadd.f32 %v5094_v28, %v4982_v43  ;;  %v4984_v13 = vadd.f32 %v4983_v23, %v11610_v20 }
 0x44d   :  { %v4985_v34 = vpop.f32.mrf.mxu0  ;;  %v5098_v53 = vpop.f32.mrf.mxu1 }
 0x44e   :  { %8082 = vpow2.f32 %v7166_v11  ;;  %v7172_v32 = vmul.f32 -1.442695, %v5095_v54  ;;  %v5097_v48 = vadd.f32 %v5096_v42, %v4984_v13  ;;  %v4986_v21 = vadd.f32 %v4985_v34, %v11606_v27 }
 0x44f   :  { %v4987_v7 = vpop.f32.mrf.mxu0  ;;  %v5100_v18 = vpop.f32.mrf.mxu1 }
 0x450   :  { %8084 = vpow2.f32 %v7172_v32  ;;  %v7173_v61 = vmul.f32 -1.442695, %v5097_v48  ;;  %v5099_v57 = vadd.f32 %v5098_v53, %v4986_v21  ;;  %v4988_v6 = vadd.f32 %v4987_v7, %v11610_v20 }
 0x451   :  { %v4991_v49 = vpop.f32.mrf.mxu0  ;;  %v5104_v44 = vpop.f32.mrf.mxu1  ;;  %5761 = vmatmul.mubr.bf16.gmra.mxu1 %v11077_v47 }
 0x452   :  { %8086 = vpow2.f32 %v7173_v61  ;;  %v7179_v46 = vmul.f32 -1.442695, %v5099_v57  ;;  %v5101_v56 = vadd.f32 %v5100_v18, %v4988_v6  ;;  %v4992_v26 = vadd.f32 %v4991_v49, %v11606_v27  ;;  %5664 = vmatmul.mubr.bf16.gmra.mxu0 %v11075_v63  ;;  %7153 = vmatprep.mubr.msk.bf16.mxu1 %vm2885_vm0, %v11112_v24 }
 0x453   :  { %5671 = vmatprep.mubr.bf16.mxu0 %v11110_v37  ;;  %v4993_v8 = vpop.f32.mrf.mxu0  ;;  %v5106_v62 = vpop.f32.mrf.mxu1 }
 0x454   :  { %8088 = vpow2.f32 %v7179_v46  ;;  %v7180_v12 = vmul.f32 -1.442695, %v5101_v56  ;;  %v5105_v52 = vadd.f32 %v5104_v44, %v4992_v26  ;;  %v4994_v19 = vadd.f32 %v4993_v8, %v11610_v20 }
 0x455   :  { %v8077_v47 = vpop.eup %8076  ;;  %v4995_v35 = vpop.f32.mrf.mxu0 }
 0x456   :  { %v5108_v41 = vpop.f32.mrf.mxu1  ;;  %v6145_v25 = vadd.f32 1.0, %v8077_v47  ;;  %8090 = vpow2.f32 %v7180_v12  ;;  %v7186_v38 = vmul.f32 -1.442695, %v5105_v52  ;;  %v5107_v15 = vadd.f32 %v5106_v62, %v4994_v19 }
 0x457   :  { %v8079_v63 = vpop.eup %8078  ;;  %v4996_v4 = vadd.f32 %v4995_v35, %v11606_v27  ;;  %v4997_v24 = vpop.f32.mrf.mxu0 }
 0x458   :  { %v5110_v5 = vpop.f32.mrf.mxu1  ;;  %8092 = vrcp.f32 %v6145_v25  ;;  %v6146_v37 = vadd.f32 1.0, %v8079_v63  ;;  %v7187_v59 = vmul.f32 -1.442695, %v5107_v15  ;;  %v4998_v28 = vadd.f32 %v4997_v24, %v11610_v20 }
 0x459   :  { %v8081_v14 = vpop.eup %8080  ;;  %8094 = vpow2.f32 %v7186_v38  ;;  %v5109_v40 = vadd.f32 %v5108_v41, %v4996_v4  ;;  %v5001_v43 = vpop.f32.mrf.mxu0  ;;  %5769 = vmatmul.mubr.bf16.gmra.mxu1 %v11122_v30 }
 0x45a   :  { %v5114_v23 = vpop.f32.mrf.mxu1  ;;  %8096 = vrcp.f32 %v6146_v37  ;;  %v6152_v42 = vadd.f32 1.0, %v8081_v14  ;;  %v5111_v11 = vadd.f32 %v5110_v5, %v4998_v28  ;;  %v5002_v54 = vadd.f32 %v5001_v43, %v11606_v27  ;;  %5672 = vmatmul.mubr.bf16.gmra.mxu0 %v11120_v10  ;;  %7154 = vmatprep.mubr.msk.bf16.mxu1 %vm2885_vm0, %v11157_v55 }
 0x45b   :  { %v8083_v13 = vpop.eup %8082  ;;  %8098 = vpow2.f32 %v7187_v59  ;;  %v7193_v34 = vmul.f32 -1.442695, %v5109_v40  ;;  %5679 = vmatprep.mubr.bf16.mxu0 %v11155_v2  ;;  %v5003_v53 = vpop.f32.mrf.mxu0 }
 0x45c   :  { %v5116_v32 = vpop.f32.mrf.mxu1  ;;  %8100 = vrcp.f32 %v6152_v42  ;;  %v6153_v48 = vadd.f32 1.0, %v8083_v13  ;;  %v7194_v30 = vmul.f32 -1.442695, %v5111_v11  ;;  %v5115_v21 = vadd.f32 %v5114_v23, %v5002_v54 }
 0x45d   :  { %v8085_v7 = vpop.eup %8084  ;;  %8102 = vpow2.f32 %v7193_v34  ;;  %v5004_v18 = vadd.f32 %v5003_v53, %v11610_v20  ;;  %v5005_v61 = vpop.f32.mrf.mxu0 }
 0x45e   :  { %v5118_v10 = vpop.f32.mrf.mxu1  ;;  %8104 = vrcp.f32 %v6153_v48  ;;  %v6159_v57 = vadd.f32 1.0, %v8085_v7  ;;  %v7200_v55 = vmul.f32 -1.442695, %v5115_v21  ;;  %v5006_v6 = vadd.f32 %v5005_v61, %v11606_v27 }
 0x45f   :  { %v8087_v49 = vpop.eup %8086  ;;  %8106 = vpow2.f32 %v7194_v30  ;;  %v5117_v2 = vadd.f32 %v5116_v32, %v5004_v18  ;;  %v5007_v44 = vpop.f32.mrf.mxu0 }
 0x460   :  { %v5120_v46 = vpop.f32.mrf.mxu1  ;;  %8108 = vrcp.f32 %v6159_v57  ;;  %v6160_v56 = vadd.f32 1.0, %v8087_v49  ;;  %v5119_v26 = vadd.f32 %v5118_v10, %v5006_v6  ;;  %v5008_v8 = vadd.f32 %v5007_v44, %v11610_v20 }
 0x461   :  { %v8089_v62 = vpop.eup %8088  ;;  %8110 = vpow2.f32 %v7200_v55  ;;  %v7201_v12 = vmul.f32 -1.442695, %v5117_v2  ;;  %v5011_v52 = vpop.f32.mrf.mxu0  ;;  %5777 = vmatmul.mubr.bf16.gmra.mxu1 %v11167_v45 }
 0x462   :  { %v5124_v19 = vpop.f32.mrf.mxu1  ;;  %8112 = vrcp.f32 %v6160_v56  ;;  %v6166_v47 = vadd.f32 1.0, %v8089_v62  ;;  %v7207_v35 = vmul.f32 -1.442695, %v5119_v26  ;;  %v5121_v41 = vadd.f32 %v5120_v46, %v5008_v8  ;;  %5680 = vmatmul.mubr.bf16.gmra.mxu0 %v11165_v31  ;;  %7155 = vmatprep.mubr.msk.bf16.mxu1 %vm2885_vm0, %v11199_v1 }
 0x463   :  { %v8091_v25 = vpop.eup %8090  ;;  %8114 = vpow2.f32 %v7201_v12  ;;  %v5012_v38 = vadd.f32 %v5011_v52, %v11606_v27  ;;  %5687 = vmatprep.mubr.bf16.mxu0 %v11197_v51  ;;  %v5013_v15 = vpop.f32.mrf.mxu0 }
 0x464   :  { %v5126_v63 = vpop.f32.mrf.mxu1  ;;  %8116 = vrcp.f32 %v6166_v47  ;;  %v6167_v4 = vadd.f32 1.0, %v8091_v25  ;;  %v7208_v45 = vmul.f32 -1.442695, %v5121_v41  ;;  %v5014_v24 = vadd.f32 %v5013_v15, %v11610_v20 }
 0x465   :  { %v8093_v5 = vpop.eup %8092  ;;  %8118 = vpow2.f32 %v7207_v35  ;;  %v5125_v37 = vadd.f32 %v5124_v19, %v5012_v38  ;;  %v5015_v31 = vpop.f32.mrf.mxu0 }
 0x466   :  { %v5128_v59 = vpop.f32.mrf.mxu1  ;;  %v8095_v28 = vpop.eup %8094  ;;  %6481 = vst [vmem:[%s12134_s10] sm:$0xff] %v8093_v5  ;;  %8120 = vrcp.f32 %v6167_v4  ;;  %v5127_v1 = vadd.f32 %v5126_v63, %v5014_v24  ;;  %v5016_v51 = vadd.f32 %v5015_v31, %v11606_v27 }
 0x467   :  { %v8097_v14 = vpop.eup %8096  ;;  %v6173_v40 = vadd.f32 1.0, %v8095_v28  ;;  %8122 = vpow2.f32 %v7208_v45  ;;  %v7214_v43 = vmul.f32 -1.442695, %v5125_v37  ;;  %v5017_v23 = vpop.f32.mrf.mxu0 }
 0x468   :  { %v5130_v42 = vpop.f32.mrf.mxu1  ;;  %v8099_v11 = vpop.eup %8098  ;;  %6482 = vst [vmem:[%s12134_s10 + $0x8] sm:$0xff] %v8097_v14  ;;  %v7215_v54 = vmul.f32 -1.442695, %v5127_v1  ;;  %v5129_v13 = vadd.f32 %v5128_v59, %v5016_v51  ;;  %v5018_v34 = vadd.f32 %v5017_v23, %v11610_v20 }
 0x469   :  { %v8101_v53 = vpop.eup %8100  ;;  %8124 = vrcp.f32 %v6173_v40  ;;  %v6174_v32 = vadd.f32 1.0, %v8099_v11  ;;  %v5021_v48 = vpop.f32.mrf.mxu0  ;;  %5785 = vmatmul.mubr.bf16.gmra.mxu1 %v11206_v0 }
 0x46a   :  { %v5134_v30 = vpop.f32.mrf.mxu1  ;;  %v8103_v21 = vpop.eup %8102  ;;  %6488 = vst [vmem:[%s12134_s10 + $0x38] sm:$0xff] %v8101_v53  ;;  %8126 = vpow2.f32 %v7214_v43  ;;  %v7221_v7 = vmul.f32 -1.442695, %v5129_v13  ;;  %v5131_v18 = vadd.f32 %v5130_v42, %v5018_v34  ;;  %v5022_v61 = vadd.f32 %v5021_v48, %v11606_v27  ;;  %5688 = vmatmul.mubr.bf16.gmra.mxu0 %v11204_v58  ;;  %7156 = vmatprep.mubr.msk.bf16.mxu1 %vm2885_vm0, %v11232_v17 }
 0x46b   :  { %v8105_v10 = vpop.eup %8104  ;;  %8128 = vrcp.f32 %v6174_v32  ;;  %v6180_v57 = vadd.f32 1.0, %v8103_v21  ;;  %5695 = vmatprep.mubr.bf16.mxu0 %v11230_v36  ;;  %v5023_v0 = vpop.f32.mrf.mxu0 }
 0x46c   :  { %v5136_v55 = vpop.f32.mrf.mxu1  ;;  %v8107_v6 = vpop.eup %8106  ;;  %6489 = vst [vmem:[%s12134_s10 + $0x40] sm:$0xff] %v8105_v10  ;;  %8130 = vpow2.f32 %v7215_v54  ;;  %v7222_v49 = vmul.f32 -1.442695, %v5131_v18  ;;  %v5135_v2 = vadd.f32 %v5134_v30, %v5022_v61  ;;  %v5024_v58 = vadd.f32 %v5023_v0, %v11610_v20 }
 0x46d   :  { %v8109_v44 = vpop.eup %8108  ;;  %8132 = vrcp.f32 %v6180_v57  ;;  %v6181_v17 = vadd.f32 1.0, %v8107_v6  ;;  %v5025_v46 = vpop.f32.mrf.mxu0 }
 0x46e   :  { %v5138_v56 = vpop.f32.mrf.mxu1  ;;  %v8111_v26 = vpop.eup %8110  ;;  %6495 = vst [vmem:[%s12134_s10 + $0x70] sm:$0xff] %v8109_v44  ;;  %8134 = vpow2.f32 %v7221_v7  ;;  %v7228_v36 = vmul.f32 -1.442695, %v5135_v2  ;;  %v5137_v8 = vadd.f32 %v5136_v55, %v5024_v58  ;;  %v5026_v62 = vadd.f32 %v5025_v46, %v11606_v27 }
 0x46f   :  { %v8113_v12 = vpop.eup %8112  ;;  %8136 = vrcp.f32 %v6181_v17  ;;  %v6187_v52 = vadd.f32 1.0, %v8111_v26  ;;  %v5027_v19 = vpop.f32.mrf.mxu0 }
 0x470   :  { %v5140_v47 = vpop.f32.mrf.mxu1  ;;  %v8115_v35 = vpop.eup %8114  ;;  %6496 = vst [vmem:[%s12134_s10 + $0x78] sm:$0xff] %v8113_v12  ;;  %8138 = vpow2.f32 %v7222_v49  ;;  %v7229_v41 = vmul.f32 -1.442695, %v5137_v8  ;;  %v5139_v25 = vadd.f32 %v5138_v56, %v5026_v62  ;;  %v5028_v38 = vadd.f32 %v5027_v19, %v11610_v20 }
 0x471   :  { %v8117_v15 = vpop.eup %8116  ;;  %8140 = vrcp.f32 %v6187_v52  ;;  %v6188_v63 = vadd.f32 1.0, %v8115_v35  ;;  %v5031_v4 = vpop.f32.mrf.mxu0  ;;  %5793 = vmatmul.mubr.bf16.gmra.mxu1 %v11239_v33  ;;  %v11717_v62 = vrot.slane %v11602_v22, %v12196_v16 }
 0x472   :  { %v5144_v45 = vpop.f32.mrf.mxu1  ;;  %v8119_v24 = vpop.eup %8118  ;;  %6502 = vst [vmem:[%s12134_s10 + $0xa8] sm:$0xff] %v8117_v15  ;;  %8142 = vpow2.f32 %v7228_v36  ;;  %v7235_v5 = vmul.f32 -1.442695, %v5139_v25  ;;  %v5141_v37 = vadd.f32 %v5140_v47, %v5028_v38  ;;  %v5032_v31 = vadd.f32 %v5031_v4, %v11606_v27  ;;  %5696 = vmatmul.mubr.bf16.gmra.mxu0 %v11237_v60  ;;  %7157 = vmatprep.mubr.msk.bf16.mxu1 %vm2885_vm0, %v11265_v39 }
 0x473   :  { %v8121_v59 = vpop.eup %8120  ;;  %8144 = vrcp.f32 %v6188_v63  ;;  %v6194_v28 = vadd.f32 1.0, %v8119_v24  ;;  %5703 = vmatprep.mubr.bf16.mxu0 %v11263_v50  ;;  %v5033_v33 = vpop.f32.mrf.mxu0 }
 0x474   :  { %v5146_v1 = vpop.f32.mrf.mxu1  ;;  %v8123_v51 = vpop.eup %8122  ;;  %6503 = vst [vmem:[%s12134_s10 + $0xb0] sm:$0xff] %v8121_v59  ;;  %8146 = vpow2.f32 %v7229_v41  ;;  %v7236_v14 = vmul.f32 -1.442695, %v5141_v37  ;;  %v5145_v40 = vadd.f32 %v5144_v45, %v5032_v31  ;;  %v5034_v60 = vadd.f32 %v5033_v33, %v11610_v20 }
 0x475   :  { %8148 = vrcp.f32 %v6194_v28  ;;  %v6195_v43 = vadd.f32 1.0, %v8123_v51  ;;  %v5035_v39 = vpop.f32.mrf.mxu0 }
 0x476   :  { %v5148_v23 = vpop.f32.mrf.mxu1  ;;  %v8125_v42 = vpop.eup %8124  ;;  %8150 = vpow2.f32 %v7235_v5  ;;  %v7242_v11 = vmul.f32 -1.442695, %v5145_v40  ;;  %v5147_v50 = vadd.f32 %v5146_v1, %v5034_v60  ;;  %v5036_v54 = vadd.f32 %v5035_v39, %v11606_v27 }
 0x477   :  { %v8127_v13 = vpop.eup %8126  ;;  %6509 = vst [vmem:[%s12134_s10 + $0xe0] sm:$0xff] %v8125_v42  ;;  %8152 = vrcp.f32 %v6195_v43  ;;  %v5037_v34 = vpop.f32.mrf.mxu0 }
 0x478   :  { %v5150_v53 = vpop.f32.mrf.mxu1  ;;  %v8129_v32 = vpop.eup %8128  ;;  %v6201_v48 = vadd.f32 1.0, %v8127_v13  ;;  %8154 = vpow2.f32 %v7236_v14  ;;  %v7243_v30 = vmul.f32 -1.442695, %v5147_v50  ;;  %v5149_v21 = vadd.f32 %v5148_v23, %v5036_v54 }
 0x479   :  { %v8131_v7 = vpop.eup %8130  ;;  %6510 = vst [vmem:[%s12134_s10 + $0xe8] sm:$0xff] %v8129_v32  ;;  %8156 = vpow2.f32 %v7242_v11  ;;  %v5038_v18 = vadd.f32 %v5037_v34, %v11610_v20  ;;  %v5041_v61 = vpop.f32.mrf.mxu0  ;;  %5801 = vmatmul.mubr.bf16.gmra.mxu1 %v11272_v3 }
 0x47a   :  { %v5154_v10 = vpop.f32.mrf.mxu1  ;;  %v8133_v57 = vpop.eup %8132  ;;  %8158 = vrcp.f32 %v6201_v48  ;;  %v6202_v0 = vadd.f32 1.0, %v8131_v7  ;;  %v7249_v55 = vmul.f32 -1.442695, %v5149_v21  ;;  %v5042_v6 = vadd.f32 %v5041_v61, %v11606_v27  ;;  %5704 = vmatmul.mubr.bf16.gmra.mxu0 %v11270_v9 }
 0x47b   :  { %v8135_v49 = vpop.eup %8134  ;;  %6516 = vst [vmem:[%s12134_s10 + $0x118] sm:$0xff] %v8133_v57  ;;  %8160 = vpow2.f32 %v7243_v30  ;;  %v5151_v2 = vadd.f32 %v5150_v53, %v5038_v18  ;;  %v5043_v58 = vpop.f32.mrf.mxu0 }
 0x47c   :  { %v5156_v44 = vpop.f32.mrf.mxu1  ;;  %v8137_v17 = vpop.eup %8136  ;;  %8162 = vrcp.f32 %v6202_v0  ;;  %v6208_v3 = vadd.f32 1.0, %v8135_v49  ;;  %v5155_v46 = vadd.f32 %v5154_v10, %v5042_v6  ;;  %v5044_v56 = vadd.f32 %v5043_v58, %v11610_v20 }
 0x47d   :  { %v8139_v26 = vpop.eup %8138  ;;  %6517 = vst [vmem:[%s12134_s10 + $0x120] sm:$0xff] %v8137_v17  ;;  %8164 = vpow2.f32 %v7249_v55  ;;  %v7250_v9 = vmul.f32 -1.442695, %v5151_v2  ;;  %v5045_v36 = vpop.f32.mrf.mxu0 }
 0x47e   :  { %v5158_v8 = vpop.f32.mrf.mxu1  ;;  %v8141_v12 = vpop.eup %8140  ;;  %8166 = vrcp.f32 %v6208_v3  ;;  %v6209_v52 = vadd.f32 1.0, %v8139_v26  ;;  %v7256_v19 = vmul.f32 -1.442695, %v5155_v46  ;;  %v5157_v47 = vadd.f32 %v5156_v44, %v5044_v56 }
 0x47f   :  { %v8143_v35 = vpop.eup %8142  ;;  %6523 = vst [vmem:[%s12134_s10 + $0x150] sm:$0xff] %v8141_v12  ;;  %8168 = vpow2.f32 %v7250_v9  ;;  %v5046_v41 = vadd.f32 %v5045_v36, %v11606_v27  ;;  %v5047_v25 = vpop.f32.mrf.mxu0  ;;  %v11729_v27 = vrot.slane %v11602_v22, %v12195_v29 }
 0x480   :  { %v5160_v38 = vpop.f32.mrf.mxu1  ;;  %v8145_v15 = vpop.eup %8144  ;;  %8170 = vrcp.f32 %v6209_v52  ;;  %v6215_v63 = vadd.f32 1.0, %v8143_v35  ;;  %v7257_v16 = vmul.f32 -1.442695, %v5157_v47  ;;  %v5048_v4 = vadd.f32 %v5047_v25, %v11610_v20 }
 0x481   :  { %v8147_v45 = vpop.eup %8146  ;;  %6524 = vst [vmem:[%s12134_s10 + $0x158] sm:$0xff] %v8145_v15  ;;  %8172 = vpow2.f32 %v7256_v19  ;;  %v5159_v24 = vadd.f32 %v5158_v8, %v5046_v41  ;;  %v5197_v5 = vpop.f32.mrf.mxu0 }
 0x482   :  { %v5310_v37 = vpop.f32.mrf.mxu1  ;;  %v8149_v31 = vpop.eup %8148  ;;  %8174 = vrcp.f32 %v6215_v63  ;;  %v6216_v59 = vadd.f32 1.0, %v8147_v45  ;;  %v5161_v28 = vadd.f32 %v5160_v38, %v5048_v4  ;;  %v5198_v33 = vadd.f32 %v5197_v5, %v11717_v62 }
 0x483   :  { %v8151_v20 = vpop.eup %8150  ;;  %6530 = vst [vmem:[%s12134_s10 + $0x188] sm:$0xff] %v8149_v31  ;;  %8176 = vpow2.f32 %v7257_v16  ;;  %v7263_v1 = vmul.f32 -1.442695, %v5159_v24  ;;  %v5199_v51 = vpop.f32.mrf.mxu0 }
 0x484   :  { %v5312_v14 = vpop.f32.mrf.mxu1  ;;  %v8153_v40 = vpop.eup %8152  ;;  %8178 = vrcp.f32 %v6216_v59  ;;  %v6222_v60 = vadd.f32 1.0, %v8151_v20  ;;  %v7264_v29 = vmul.f32 -1.442695, %v5161_v28  ;;  %v5311_v22 = vadd.f32 %v5310_v37, %v5198_v33 }
 0x485   :  { %v8155_v43 = vpop.eup %8154  ;;  %6531 = vst [vmem:[%s12134_s10 + $0x190] sm:$0xff] %v8153_v40  ;;  %8180 = vpow2.f32 %v7263_v1  ;;  %v5200_v39 = vadd.f32 %v5199_v51, %v11729_v27  ;;  %v5201_v23 = vpop.f32.mrf.mxu0 }
 0x486   :  { %v5314_v42 = vpop.f32.mrf.mxu1  ;;  %v8157_v11 = vpop.eup %8156  ;;  %8182 = vrcp.f32 %v6222_v60  ;;  %v6223_v50 = vadd.f32 1.0, %v8155_v43  ;;  %v7160_v54 = vmul.f32 -1.442695, %v5311_v22  ;;  %v5202_v13 = vadd.f32 %v5201_v23, %v11717_v62 }
 0x487   :  { %v8159_v34 = vpop.eup %8158  ;;  %v6229_v53 = vadd.f32 1.0, %v8157_v11  ;;  %8184 = vpow2.f32 %v7264_v29  ;;  %v5313_v32 = vadd.f32 %v5312_v14, %v5200_v39  ;;  %v5203_v48 = vpop.f32.mrf.mxu0 }
 0x488   :  { %v5316_v30 = vpop.f32.mrf.mxu1  ;;  %v8161_v21 = vpop.eup %8160  ;;  %6537 = vst [vmem:[%s12134_s10 + $0x1c0] sm:$0xff] %v8159_v34  ;;  %8186 = vrcp.f32 %v6223_v50  ;;  %v5315_v7 = vadd.f32 %v5314_v42, %v5202_v13  ;;  %v5204_v18 = vadd.f32 %v5203_v48, %v11729_v27 }
 0x489   :  { %v8163_v61 = vpop.eup %8162  ;;  %8188 = vrcp.f32 %v6229_v53  ;;  %v6230_v10 = vadd.f32 1.0, %v8161_v21  ;;  %v7161_v57 = vmul.f32 -1.442695, %v5313_v32  ;;  %v5207_v0 = vpop.f32.mrf.mxu0 }
 0x48a   :  { %v5320_v55 = vpop.f32.mrf.mxu1  ;;  %v8165_v6 = vpop.eup %8164  ;;  %6538 = vst [vmem:[%s12134_s10 + $0x1c8] sm:$0xff] %v8163_v61  ;;  %8190 = vpow2.f32 %v7160_v54  ;;  %v7167_v49 = vmul.f32 -1.442695, %v5315_v7  ;;  %v5317_v2 = vadd.f32 %v5316_v30, %v5204_v18  ;;  %v5208_v58 = vadd.f32 %v5207_v0, %v11717_v62 }
 0x48b   :  { %v8167_v44 = vpop.eup %8166  ;;  %8192 = vrcp.f32 %v6230_v10  ;;  %v6236_v17 = vadd.f32 1.0, %v8165_v6  ;;  %v5209_v3 = vpop.f32.mrf.mxu0 }
 0x48c   :  { %v5322_v46 = vpop.f32.mrf.mxu1  ;;  %v8169_v56 = vpop.eup %8168  ;;  %6544 = vst [vmem:[%s12134_s10 + $0x1f8] sm:$0xff] %v8167_v44  ;;  %8194 = vpow2.f32 %v7161_v57  ;;  %v7168_v26 = vmul.f32 -1.442695, %v5317_v2  ;;  %v5321_v9 = vadd.f32 %v5320_v55, %v5208_v58  ;;  %v5210_v36 = vadd.f32 %v5209_v3, %v11729_v27 }
 0x48d   :  { %v8171_v8 = vpop.eup %8170  ;;  %8196 = vrcp.f32 %v6236_v17  ;;  %v6237_v12 = vadd.f32 1.0, %v8169_v56  ;;  %v5211_v52 = vpop.f32.mrf.mxu0 }
 0x48e   :  { %v5324_v19 = vpop.f32.mrf.mxu1  ;;  %v8173_v47 = vpop.eup %8172  ;;  %6545 = vst [vmem:[%s12134_s10 + $0x200] sm:$0xff] %v8171_v8  ;;  %8198 = vpow2.f32 %v7167_v49  ;;  %v7174_v35 = vmul.f32 -1.442695, %v5321_v9  ;;  %v5323_v41 = vadd.f32 %v5322_v46, %v5210_v36  ;;  %v5212_v25 = vadd.f32 %v5211_v52, %v11717_v62 }
 0x48f   :  { %v8175_v38 = vpop.eup %8174  ;;  %8200 = vrcp.f32 %v6237_v12  ;;  %v6243_v15 = vadd.f32 1.0, %v8173_v47  ;;  %v5213_v63 = vpop.f32.mrf.mxu0 }
 0x490   :  { %v5326_v16 = vpop.f32.mrf.mxu1  ;;  %v8177_v4 = vpop.eup %8176  ;;  %6551 = vst [vmem:[%s12134_s10 + $0x230] sm:$0xff] %v8175_v38  ;;  %8202 = vpow2.f32 %v7168_v26  ;;  %v7175_v45 = vmul.f32 -1.442695, %v5323_v41  ;;  %v5325_v24 = vadd.f32 %v5324_v19, %v5212_v25  ;;  %v5214_v5 = vadd.f32 %v5213_v63, %v11729_v27 }
 0x491   :  { %v8179_v37 = vpop.eup %8178  ;;  %8204 = vrcp.f32 %v6243_v15  ;;  %v6244_v31 = vadd.f32 1.0, %v8177_v4  ;;  %v5217_v59 = vpop.f32.mrf.mxu0 }
 0x492   :  { %v5330_v28 = vpop.f32.mrf.mxu1  ;;  %v8181_v33 = vpop.eup %8180  ;;  %6552 = vst [vmem:[%s12134_s10 + $0x238] sm:$0xff] %v8179_v37  ;;  %8206 = vpow2.f32 %v7174_v35  ;;  %v7181_v20 = vmul.f32 -1.442695, %v5325_v24  ;;  %v5327_v1 = vadd.f32 %v5326_v16, %v5214_v5  ;;  %v5218_v51 = vadd.f32 %v5217_v59, %v11717_v62 }
 0x493   :  { %v8183_v14 = vpop.eup %8182  ;;  %8208 = vrcp.f32 %v6244_v31  ;;  %v6250_v40 = vadd.f32 1.0, %v8181_v33  ;;  %v5219_v60 = vpop.f32.mrf.mxu0 }
 0x494   :  { %v5332_v29 = vpop.f32.mrf.mxu1  ;;  %v8185_v22 = vpop.eup %8184  ;;  %6558 = vst [vmem:[%s12134_s10 + $0x268] sm:$0xff] %v8183_v14  ;;  %8210 = vpow2.f32 %v7175_v45  ;;  %v7182_v43 = vmul.f32 -1.442695, %v5327_v1  ;;  %v5331_v39 = vadd.f32 %v5330_v28, %v5218_v51  ;;  %v5220_v23 = vadd.f32 %v5219_v60, %v11729_v27 }
 0x495   :  { %v8187_v42 = vpop.eup %8186  ;;  %8212 = vrcp.f32 %v6250_v40  ;;  %v6251_v11 = vadd.f32 1.0, %v8185_v22  ;;  %v5221_v50 = vpop.f32.mrf.mxu0 }
 0x496   :  { %v5334_v54 = vpop.f32.mrf.mxu1  ;;  %v8189_v13 = vpop.eup %8188  ;;  %6559 = vst [vmem:[%s12134_s10 + $0x270] sm:$0xff] %v8187_v42  ;;  %8214 = vpow2.f32 %v7181_v20  ;;  %v7188_v34 = vmul.f32 -1.442695, %v5331_v39  ;;  %v5333_v53 = vadd.f32 %v5332_v29, %v5220_v23  ;;  %v5222_v32 = vadd.f32 %v5221_v50, %v11717_v62 }
 0x497   :  { %v8191_v48 = vpop.eup %8190  ;;  %6565 = vst [vmem:[%s12134_s10 + $0x2a0] sm:$0xff] %v8189_v13  ;;  %8216 = vrcp.f32 %v6251_v11  ;;  %v5223_v30 = vpop.f32.mrf.mxu0 }
 0x498   :  { %v5336_v21 = vpop.f32.mrf.mxu1  ;;  %v8193_v7 = vpop.eup %8192  ;;  %v6147_v18 = vadd.f32 1.0, %v8191_v48  ;;  %8218 = vpow2.f32 %v7182_v43  ;;  %v7189_v61 = vmul.f32 -1.442695, %v5333_v53  ;;  %v5335_v10 = vadd.f32 %v5334_v54, %v5222_v32 }
 0x499   :  { %v8195_v57 = vpop.eup %8194  ;;  %6566 = vst [vmem:[%s12134_s10 + $0x2a8] sm:$0xff] %v8193_v7  ;;  %8220 = vpow2.f32 %v7188_v34  ;;  %v5224_v0 = vadd.f32 %v5223_v30, %v11729_v27  ;;  %v5227_v55 = vpop.f32.mrf.mxu0 }
 0x49a   :  { %v5340_v6 = vpop.f32.mrf.mxu1  ;;  %v8197_v49 = vpop.eup %8196  ;;  %8222 = vrcp.f32 %v6147_v18  ;;  %v6148_v2 = vadd.f32 1.0, %v8195_v57  ;;  %v7195_v58 = vmul.f32 -1.442695, %v5335_v10  ;;  %v5228_v44 = vadd.f32 %v5227_v55, %v11717_v62 }
 0x49b   :  { %v8199_v17 = vpop.eup %8198  ;;  %6572 = vst [vmem:[%s12134_s10 + $0x2d8] sm:$0xff] %v8197_v49  ;;  %8224 = vpow2.f32 %v7189_v61  ;;  %v5337_v3 = vadd.f32 %v5336_v21, %v5224_v0  ;;  %v5229_v46 = vpop.f32.mrf.mxu0 }
 0x49c   :  { %v5342_v56 = vpop.f32.mrf.mxu1  ;;  %v8201_v26 = vpop.eup %8200  ;;  %8226 = vrcp.f32 %v6148_v2  ;;  %v6154_v9 = vadd.f32 1.0, %v8199_v17  ;;  %v5341_v36 = vadd.f32 %v5340_v6, %v5228_v44  ;;  %v5230_v8 = vadd.f32 %v5229_v46, %v11729_v27 }
 0x49d   :  { %v8203_v12 = vpop.eup %8202  ;;  %6573 = vst [vmem:[%s12134_s10 + $0x2e0] sm:$0xff] %v8201_v26  ;;  %8228 = vpow2.f32 %v7195_v58  ;;  %v7196_v52 = vmul.f32 -1.442695, %v5337_v3  ;;  %v5231_v19 = vpop.f32.mrf.mxu0 }
 0x49e   :  { %v5344_v47 = vpop.f32.mrf.mxu1  ;;  %v8205_v35 = vpop.eup %8204  ;;  %8230 = vrcp.f32 %v6154_v9  ;;  %v6155_v41 = vadd.f32 1.0, %v8203_v12  ;;  %v7202_v25 = vmul.f32 -1.442695, %v5341_v36  ;;  %v5343_v38 = vadd.f32 %v5342_v56, %v5230_v8 }
 0x49f   :  { %v8207_v15 = vpop.eup %8206  ;;  %6579 = vst [vmem:[%s12134_s10 + $0x310] sm:$0xff] %v8205_v35  ;;  %8232 = vpow2.f32 %v7196_v52  ;;  %v5232_v63 = vadd.f32 %v5231_v19, %v11717_v62  ;;  %v5233_v16 = vpop.f32.mrf.mxu0 }
 0x4a0   :  { %v5346_v4 = vpop.f32.mrf.mxu1  ;;  %v8209_v45 = vpop.eup %8208  ;;  %8234 = vrcp.f32 %v6155_v41  ;;  %v6161_v24 = vadd.f32 1.0, %v8207_v15  ;;  %v7203_v5 = vmul.f32 -1.442695, %v5343_v38  ;;  %v5234_v37 = vadd.f32 %v5233_v16, %v11729_v27 }
 0x4a1   :  { %v8211_v31 = vpop.eup %8210  ;;  %6580 = vst [vmem:[%s12134_s10 + $0x318] sm:$0xff] %v8209_v45  ;;  %8236 = vpow2.f32 %v7202_v25  ;;  %v5345_v59 = vadd.f32 %v5344_v47, %v5232_v63  ;;  %v5237_v28 = vpop.f32.mrf.mxu0 }
 0x4a2   :  { %v5350_v33 = vpop.f32.mrf.mxu1  ;;  %v8213_v20 = vpop.eup %8212  ;;  %8238 = vrcp.f32 %v6161_v24  ;;  %v6162_v1 = vadd.f32 1.0, %v8211_v31  ;;  %v5347_v51 = vadd.f32 %v5346_v4, %v5234_v37  ;;  %v5238_v14 = vadd.f32 %v5237_v28, %v11717_v62 }
 0x4a3   :  { %v8215_v40 = vpop.eup %8214  ;;  %6586 = vst [vmem:[%s12134_s10 + $0x348] sm:$0xff] %v8213_v20  ;;  %8240 = vpow2.f32 %v7203_v5  ;;  %v7209_v60 = vmul.f32 -1.442695, %v5345_v59  ;;  %v5239_v29 = vpop.f32.mrf.mxu0 }
 0x4a4   :  { %v5352_v22 = vpop.f32.mrf.mxu1  ;;  %v8217_v43 = vpop.eup %8216  ;;  %8242 = vrcp.f32 %v6162_v1  ;;  %v6168_v39 = vadd.f32 1.0, %v8215_v40  ;;  %v7210_v23 = vmul.f32 -1.442695, %v5347_v51  ;;  %v5351_v42 = vadd.f32 %v5350_v33, %v5238_v14 }
 0x4a5   :  { %v8219_v11 = vpop.eup %8218  ;;  %6587 = vst [vmem:[%s12134_s10 + $0x350] sm:$0xff] %v8217_v43  ;;  %8244 = vpow2.f32 %v7209_v60  ;;  %v5240_v50 = vadd.f32 %v5239_v29, %v11729_v27  ;;  %v5241_v54 = vpop.f32.mrf.mxu0 }
 0x4a6   :  { %v5354_v13 = vpop.f32.mrf.mxu1  ;;  %v8221_v34 = vpop.eup %8220  ;;  %8246 = vrcp.f32 %v6168_v39  ;;  %v6169_v53 = vadd.f32 1.0, %v8219_v11  ;;  %v7216_v32 = vmul.f32 -1.442695, %v5351_v42  ;;  %v5242_v48 = vadd.f32 %v5241_v54, %v11717_v62 }
 0x4a7   :  { %v8223_v30 = vpop.eup %8222  ;;  %v6175_v21 = vadd.f32 1.0, %v8221_v34  ;;  %8248 = vpow2.f32 %v7210_v23  ;;  %v5353_v7 = vadd.f32 %v5352_v22, %v5240_v50  ;;  %v5243_v18 = vpop.f32.mrf.mxu0 }
 0x4a8   :  { %v5356_v61 = vpop.f32.mrf.mxu1  ;;  %v8225_v10 = vpop.eup %8224  ;;  %6483 = vst [vmem:[%s12134_s10 + $0x10] sm:$0xff] %v8223_v30  ;;  %8250 = vrcp.f32 %v6169_v53  ;;  %v5355_v57 = vadd.f32 %v5354_v13, %v5242_v48  ;;  %v5244_v0 = vadd.f32 %v5243_v18, %v11729_v27 }
 0x4a9   :  { %v8227_v55 = vpop.eup %8226  ;;  %8252 = vrcp.f32 %v6175_v21  ;;  %v6176_v6 = vadd.f32 1.0, %v8225_v10  ;;  %v7217_v49 = vmul.f32 -1.442695, %v5353_v7  ;;  %v5247_v2 = vpop.f32.mrf.mxu0 }
 0x4aa   :  { %v5360_v58 = vpop.f32.mrf.mxu1  ;;  %v8229_v44 = vpop.eup %8228  ;;  %6484 = vst [vmem:[%s12134_s10 + $0x18] sm:$0xff] %v8227_v55  ;;  %8254 = vpow2.f32 %v7216_v32  ;;  %v7223_v17 = vmul.f32 -1.442695, %v5355_v57  ;;  %v5357_v3 = vadd.f32 %v5356_v61, %v5244_v0  ;;  %v5248_v46 = vadd.f32 %v5247_v2, %v11717_v62 }
 0x4ab   :  { %v8231_v56 = vpop.eup %8230  ;;  %8256 = vrcp.f32 %v6176_v6  ;;  %v6182_v26 = vadd.f32 1.0, %v8229_v44  ;;  %v5249_v9 = vpop.f32.mrf.mxu0 }
 0x4ac   :  { %v5362_v36 = vpop.f32.mrf.mxu1  ;;  %v8233_v8 = vpop.eup %8232  ;;  %6490 = vst [vmem:[%s12134_s10 + $0x48] sm:$0xff] %v8231_v56  ;;  %8258 = vpow2.f32 %v7217_v49  ;;  %v7224_v12 = vmul.f32 -1.442695, %v5357_v3  ;;  %v5361_v52 = vadd.f32 %v5360_v58, %v5248_v46  ;;  %v5250_v19 = vadd.f32 %v5249_v9, %v11729_v27 }
 0x4ad   :  { %v8235_v47 = vpop.eup %8234  ;;  %8260 = vrcp.f32 %v6182_v26  ;;  %v6183_v35 = vadd.f32 1.0, %v8233_v8  ;;  %v5251_v41 = vpop.f32.mrf.mxu0 }
 0x4ae   :  { %v5364_v25 = vpop.f32.mrf.mxu1  ;;  %v8237_v38 = vpop.eup %8236  ;;  %6491 = vst [vmem:[%s12134_s10 + $0x50] sm:$0xff] %v8235_v47  ;;  %8262 = vpow2.f32 %v7223_v17  ;;  %v7230_v15 = vmul.f32 -1.442695, %v5361_v52  ;;  %v5363_v63 = vadd.f32 %v5362_v36, %v5250_v19  ;;  %v5252_v16 = vadd.f32 %v5251_v41, %v11717_v62 }
 0x4af   :  { %v8239_v4 = vpop.eup %8238  ;;  %8264 = vrcp.f32 %v6183_v35  ;;  %v6189_v45 = vadd.f32 1.0, %v8237_v38  ;;  %v5253_v24 = vpop.f32.mrf.mxu0 }
 0x4b0   :  { %v5366_v5 = vpop.f32.mrf.mxu1  ;;  %v8241_v37 = vpop.eup %8240  ;;  %6497 = vst [vmem:[%s12134_s10 + $0x80] sm:$0xff] %v8239_v4  ;;  %8266 = vpow2.f32 %v7224_v12  ;;  %v7231_v31 = vmul.f32 -1.442695, %v5363_v63  ;;  %v5365_v59 = vadd.f32 %v5364_v25, %v5252_v16  ;;  %v5254_v28 = vadd.f32 %v5253_v24, %v11729_v27  ;;  %v12197_v12 = vld [vmem:[#allocation7_spill] sm:$0xff] }
 0x4b1   :  { %v8243_v33 = vpop.eup %8242  ;;  %8268 = vrcp.f32 %v6189_v45  ;;  %v6190_v20 = vadd.f32 1.0, %v8241_v37  ;;  %v5257_v1 = vpop.f32.mrf.mxu0  ;;  %v3996_v52 = vsub.s32 4, %v12197_v12  ;;  %v4000_v16 = vsub.s32 5, %v12197_v12 }
 0x4b2   :  { %v5370_v51 = vpop.f32.mrf.mxu1  ;;  %v8245_v14 = vpop.eup %8244  ;;  %6498 = vst [vmem:[%s12134_s10 + $0x88] sm:$0xff] %v8243_v33  ;;  %8270 = vpow2.f32 %v7230_v15  ;;  %v7237_v40 = vmul.f32 -1.442695, %v5365_v59  ;;  %v5367_v60 = vadd.f32 %v5366_v5, %v5254_v28  ;;  %v5258_v29 = vadd.f32 %v5257_v1, %v11717_v62  ;;  %v11860_v33 = vld [vmem:[%s12133_s9] sm:$0xff] }
 0x4b3   :  { %v8247_v22 = vpop.eup %8246  ;;  %8272 = vrcp.f32 %v6190_v20  ;;  %v6196_v43 = vadd.f32 1.0, %v8245_v14  ;;  %v5259_v39 = vpop.f32.mrf.mxu0  ;;  %v11863_v20 = vrot.slane %v11860_v33, %v3996_v52 }
 0x4b4   :  { %v5372_v23 = vpop.f32.mrf.mxu1  ;;  %v8249_v42 = vpop.eup %8248  ;;  %6504 = vst [vmem:[%s12134_s10 + $0xb8] sm:$0xff] %v8247_v22  ;;  %8274 = vpow2.f32 %v7231_v31  ;;  %v7238_v11 = vmul.f32 -1.442695, %v5367_v60  ;;  %v5371_v50 = vadd.f32 %v5370_v51, %v5258_v29  ;;  %v5260_v54 = vadd.f32 %v5259_v39, %v11729_v27 }
 0x4b5   :  { %v8251_v13 = vpop.eup %8250  ;;  %8276 = vrcp.f32 %v6196_v43  ;;  %v6197_v34 = vadd.f32 1.0, %v8249_v42  ;;  %v5261_v53 = vpop.f32.mrf.mxu0  ;;  %v11870_v22 = vrot.slane %v11860_v33, %v4000_v16 }
 0x4b6   :  { %v5374_v32 = vpop.f32.mrf.mxu1  ;;  %v8253_v48 = vpop.eup %8252  ;;  %6505 = vst [vmem:[%s12134_s10 + $0xc0] sm:$0xff] %v8251_v13  ;;  %8278 = vpow2.f32 %v7237_v40  ;;  %v7244_v30 = vmul.f32 -1.442695, %v5371_v50  ;;  %v5373_v21 = vadd.f32 %v5372_v23, %v5260_v54  ;;  %v5262_v7 = vadd.f32 %v5261_v53, %v11717_v62 }
 0x4b7   :  { %v8255_v18 = vpop.eup %8254  ;;  %6511 = vst [vmem:[%s12134_s10 + $0xf0] sm:$0xff] %v8253_v48  ;;  %8280 = vrcp.f32 %v6197_v34  ;;  %v5263_v61 = vpop.f32.mrf.mxu0 }
 0x4b8   :  { %v5376_v10 = vpop.f32.mrf.mxu1  ;;  %v8257_v57 = vpop.eup %8256  ;;  %v6203_v0 = vadd.f32 1.0, %v8255_v18  ;;  %8282 = vpow2.f32 %v7238_v11  ;;  %v7245_v55 = vmul.f32 -1.442695, %v5373_v21  ;;  %v5375_v6 = vadd.f32 %v5374_v32, %v5262_v7 }
 0x4b9   :  { %v8259_v49 = vpop.eup %8258  ;;  %6512 = vst [vmem:[%s12134_s10 + $0xf8] sm:$0xff] %v8257_v57  ;;  %8284 = vpow2.f32 %v7244_v30  ;;  %v5264_v2 = vadd.f32 %v5263_v61, %v11729_v27  ;;  %v5267_v58 = vpop.f32.mrf.mxu0 }
 0x4ba   :  { %v5380_v44 = vpop.f32.mrf.mxu1  ;;  %v8261_v17 = vpop.eup %8260  ;;  %8286 = vrcp.f32 %v6203_v0  ;;  %v6204_v3 = vadd.f32 1.0, %v8259_v49  ;;  %v7251_v46 = vmul.f32 -1.442695, %v5375_v6  ;;  %v5268_v56 = vadd.f32 %v5267_v58, %v11717_v62 }
 0x4bb   :  { %v8263_v26 = vpop.eup %8262  ;;  %6518 = vst [vmem:[%s12134_s10 + $0x128] sm:$0xff] %v8261_v17  ;;  %8288 = vpow2.f32 %v7245_v55  ;;  %v5377_v9 = vadd.f32 %v5376_v10, %v5264_v2  ;;  %v5269_v36 = vpop.f32.mrf.mxu0 }
 0x4bc   :  { %v5382_v8 = vpop.f32.mrf.mxu1  ;;  %v8265_v19 = vpop.eup %8264  ;;  %8290 = vrcp.f32 %v6204_v3  ;;  %v6210_v47 = vadd.f32 1.0, %v8263_v26  ;;  %v5381_v35 = vadd.f32 %v5380_v44, %v5268_v56  ;;  %v5270_v41 = vadd.f32 %v5269_v36, %v11729_v27 }
 0x4bd   :  { %v8267_v25 = vpop.eup %8266  ;;  %6519 = vst [vmem:[%s12134_s10 + $0x130] sm:$0xff] %v8265_v19  ;;  %8292 = vpow2.f32 %v7251_v46  ;;  %v7252_v38 = vmul.f32 -1.442695, %v5377_v9  ;;  %v5271_v15 = vpop.f32.mrf.mxu0 }
 0x4be   :  { %v5384_v63 = vpop.f32.mrf.mxu1  ;;  %v8269_v4 = vpop.eup %8268  ;;  %8294 = vrcp.f32 %v6210_v47  ;;  %v6211_v45 = vadd.f32 1.0, %v8267_v25  ;;  %v7258_v24 = vmul.f32 -1.442695, %v5381_v35  ;;  %v5383_v5 = vadd.f32 %v5382_v8, %v5270_v41 }
 0x4bf   :  { %v8271_v37 = vpop.eup %8270  ;;  %6525 = vst [vmem:[%s12134_s10 + $0x160] sm:$0xff] %v8269_v4  ;;  %8296 = vpow2.f32 %v7252_v38  ;;  %v5272_v31 = vadd.f32 %v5271_v15, %v11717_v62  ;;  %v5273_v59 = vpop.f32.mrf.mxu0 }
 0x4c0   :  { %v5386_v28 = vpop.f32.mrf.mxu1  ;;  %v8273_v1 = vpop.eup %8272  ;;  %8298 = vrcp.f32 %v6211_v45  ;;  %v6217_v51 = vadd.f32 1.0, %v8271_v37  ;;  %v7259_v14 = vmul.f32 -1.442695, %v5383_v5  ;;  %v5274_v40 = vadd.f32 %v5273_v59, %v11729_v27 }
 0x4c1   :  { %v8275_v60 = vpop.eup %8274  ;;  %6526 = vst [vmem:[%s12134_s10 + $0x168] sm:$0xff] %v8273_v1  ;;  %8300 = vpow2.f32 %v7258_v24  ;;  %v5385_v62 = vadd.f32 %v5384_v63, %v5272_v31 }
 0x4c2   :  { %v5536_v29 = vpop.f32.mrf.mxu1  ;;  %v8277_v43 = vpop.eup %8276  ;;  %8302 = vrcp.f32 %v6217_v51  ;;  %v6218_v39 = vadd.f32 1.0, %v8275_v60  ;;  %v5387_v23 = vadd.f32 %v5386_v28, %v5274_v40 }
 0x4c3   :  { %v5423_v42 = vpop.f32.mrf.mxu0  ;;  %v8279_v11 = vpop.eup %8278  ;;  %6532 = vst [vmem:[%s12134_s10 + $0x198] sm:$0xff] %v8277_v43  ;;  %8304 = vpow2.f32 %v7259_v14  ;;  %v7265_v27 = vmul.f32 -1.442695, %v5385_v62 }
 0x4c4   :  { %v5424_v50 = vadd.f32 %v5423_v42, %v11863_v20  ;;  %v5538_v54 = vpop.f32.mrf.mxu1  ;;  %v8281_v13 = vpop.eup %8280  ;;  %8306 = vrcp.f32 %v6218_v39  ;;  %v6224_v34 = vadd.f32 1.0, %v8279_v11  ;;  %v7266_v53 = vmul.f32 -1.442695, %v5387_v23 }
 0x4c5   :  { %v5425_v32 = vpop.f32.mrf.mxu0  ;;  %v8283_v48 = vpop.eup %8282  ;;  %6533 = vst [vmem:[%s12134_s10 + $0x1a0] sm:$0xff] %v8281_v13  ;;  %8308 = vpow2.f32 %v7265_v27 }
 0x4c6   :  { %v5537_v30 = vadd.f32 %v5536_v29, %v5424_v50  ;;  %v5426_v21 = vadd.f32 %v5425_v32, %v11870_v22  ;;  %v5540_v7 = vpop.f32.mrf.mxu1  ;;  %v8285_v18 = vpop.eup %8284  ;;  %8310 = vrcp.f32 %v6224_v34  ;;  %v6225_v61 = vadd.f32 1.0, %v8283_v48 }
 0x4c7   :  { %v5427_v10 = vpop.f32.mrf.mxu0  ;;  %v8287_v57 = vpop.eup %8286  ;;  %v6231_v0 = vadd.f32 1.0, %v8285_v18  ;;  %8312 = vpow2.f32 %v7266_v53 }
 0x4c8   :  { %v7162_v55 = vmul.f32 -1.442695, %v5537_v30  ;;  %v5539_v6 = vadd.f32 %v5538_v54, %v5426_v21  ;;  %v5542_v49 = vpop.f32.mrf.mxu1  ;;  %v8289_v2 = vpop.eup %8288  ;;  %6539 = vst [vmem:[%s12134_s10 + $0x1d0] sm:$0xff] %v8287_v57  ;;  %8314 = vrcp.f32 %v6225_v61  ;;  %v5428_v58 = vadd.f32 %v5427_v10, %v11863_v20 }
 0x4c9   :  { %v5429_v44 = vpop.f32.mrf.mxu0  ;;  %v8291_v17 = vpop.eup %8290  ;;  %8316 = vrcp.f32 %v6231_v0  ;;  %v6232_v3 = vadd.f32 1.0, %v8289_v2 }
 0x4ca   :  { %v7163_v46 = vmul.f32 -1.442695, %v5539_v6  ;;  %v5430_v56 = vadd.f32 %v5429_v44, %v11870_v22  ;;  %v5546_v26 = vpop.f32.mrf.mxu1  ;;  %v8293_v9 = vpop.eup %8292  ;;  %6540 = vst [vmem:[%s12134_s10 + $0x1d8] sm:$0xff] %v8291_v17  ;;  %8318 = vpow2.f32 %v7162_v55  ;;  %v5541_v36 = vadd.f32 %v5540_v7, %v5428_v58 }
 0x4cb   :  { %v5433_v8 = vpop.f32.mrf.mxu0  ;;  %v8295_v52 = vpop.eup %8294  ;;  %8320 = vrcp.f32 %v6232_v3  ;;  %v6238_v19 = vadd.f32 1.0, %v8293_v9 }
 0x4cc   :  { %v5543_v47 = vadd.f32 %v5542_v49, %v5430_v56  ;;  %v5434_v35 = vadd.f32 %v5433_v8, %v11863_v20  ;;  %v5548_v41 = vpop.f32.mrf.mxu1  ;;  %v8297_v25 = vpop.eup %8296  ;;  %6546 = vst [vmem:[%s12134_s10 + $0x208] sm:$0xff] %v8295_v52  ;;  %8322 = vpow2.f32 %v7163_v46  ;;  %v7169_v38 = vmul.f32 -1.442695, %v5541_v36 }
 0x4cd   :  { %v5435_v15 = vpop.f32.mrf.mxu0  ;;  %v8299_v63 = vpop.eup %8298  ;;  %8324 = vrcp.f32 %v6238_v19  ;;  %v6239_v16 = vadd.f32 1.0, %v8297_v25 }
 0x4ce   :  { %v7170_v4 = vmul.f32 -1.442695, %v5543_v47  ;;  %v5547_v45 = vadd.f32 %v5546_v26, %v5434_v35  ;;  %v5550_v24 = vpop.f32.mrf.mxu1  ;;  %v8301_v5 = vpop.eup %8300  ;;  %6547 = vst [vmem:[%s12134_s10 + $0x210] sm:$0xff] %v8299_v63  ;;  %8326 = vpow2.f32 %v7169_v38  ;;  %v5436_v37 = vadd.f32 %v5435_v15, %v11870_v22 }
 0x4cf   :  { %v5437_v31 = vpop.f32.mrf.mxu0  ;;  %v8303_v59 = vpop.eup %8302  ;;  %8328 = vrcp.f32 %v6239_v16  ;;  %v6245_v28 = vadd.f32 1.0, %v8301_v5 }
 0x4d0   :  { %v7176_v1 = vmul.f32 -1.442695, %v5547_v45  ;;  %v5438_v51 = vadd.f32 %v5437_v31, %v11863_v20  ;;  %v5552_v14 = vpop.f32.mrf.mxu1  ;;  %v8305_v40 = vpop.eup %8304  ;;  %6553 = vst [vmem:[%s12134_s10 + $0x240] sm:$0xff] %v8303_v59  ;;  %8330 = vpow2.f32 %v7170_v4  ;;  %v5549_v60 = vadd.f32 %v5548_v41, %v5436_v37 }
 0x4d1   :  { %v5439_v62 = vpop.f32.mrf.mxu0  ;;  %v8307_v29 = vpop.eup %8306  ;;  %8332 = vrcp.f32 %v6245_v28  ;;  %v6246_v43 = vadd.f32 1.0, %v8305_v40 }
 0x4d2   :  { %v5551_v39 = vadd.f32 %v5550_v24, %v5438_v51  ;;  %v5440_v23 = vadd.f32 %v5439_v62, %v11870_v22  ;;  %v5556_v42 = vpop.f32.mrf.mxu1  ;;  %v8309_v11 = vpop.eup %8308  ;;  %6554 = vst [vmem:[%s12134_s10 + $0x248] sm:$0xff] %v8307_v29  ;;  %8334 = vpow2.f32 %v7176_v1  ;;  %v7177_v27 = vmul.f32 -1.442695, %v5549_v60 }
 0x4d3   :  { %v5443_v50 = vpop.f32.mrf.mxu0  ;;  %v8311_v54 = vpop.eup %8310  ;;  %8336 = vrcp.f32 %v6246_v43  ;;  %v6252_v13 = vadd.f32 1.0, %v8309_v11 }
 0x4d4   :  { %v7183_v34 = vmul.f32 -1.442695, %v5551_v39  ;;  %v5553_v53 = vadd.f32 %v5552_v14, %v5440_v23  ;;  %v5558_v32 = vpop.f32.mrf.mxu1  ;;  %v8313_v48 = vpop.eup %8312  ;;  %6560 = vst [vmem:[%s12134_s10 + $0x278] sm:$0xff] %v8311_v54  ;;  %8338 = vpow2.f32 %v7177_v27  ;;  %v5444_v30 = vadd.f32 %v5443_v50, %v11863_v20 }
 0x4d5   :  { %v5445_v21 = vpop.f32.mrf.mxu0  ;;  %v8315_v7 = vpop.eup %8314  ;;  %8340 = vrcp.f32 %v6252_v13  ;;  %v6253_v18 = vadd.f32 1.0, %v8313_v48 }
 0x4d6   :  { %v7184_v61 = vmul.f32 -1.442695, %v5553_v53  ;;  %v5446_v10 = vadd.f32 %v5445_v21, %v11870_v22  ;;  %v5560_v57 = vpop.f32.mrf.mxu1  ;;  %v8317_v0 = vpop.eup %8316  ;;  %6561 = vst [vmem:[%s12134_s10 + $0x280] sm:$0xff] %v8315_v7  ;;  %8342 = vpow2.f32 %v7183_v34  ;;  %v5557_v55 = vadd.f32 %v5556_v42, %v5444_v30 }
 0x4d7   :  { %v5447_v6 = vpop.f32.mrf.mxu0  ;;  %v8319_v49 = vpop.eup %8318  ;;  %6567 = vst [vmem:[%s12134_s10 + $0x2b0] sm:$0xff] %v8317_v0  ;;  %8344 = vrcp.f32 %v6253_v18 }
 0x4d8   :  { %v5559_v2 = vadd.f32 %v5558_v32, %v5446_v10  ;;  %v5448_v58 = vadd.f32 %v5447_v6, %v11863_v20  ;;  %v5562_v44 = vpop.f32.mrf.mxu1  ;;  %v8321_v17 = vpop.eup %8320  ;;  %v6149_v3 = vadd.f32 1.0, %v8319_v49  ;;  %8346 = vpow2.f32 %v7184_v61 }
 0x4d9   :  { %v7190_v46 = vmul.f32 -1.442695, %v5557_v55  ;;  %v5449_v56 = vpop.f32.mrf.mxu0  ;;  %v8323_v26 = vpop.eup %8322  ;;  %6568 = vst [vmem:[%s12134_s10 + $0x2b8] sm:$0xff] %v8321_v17 }
 0x4da   :  { %v7191_v9 = vmul.f32 -1.442695, %v5559_v2  ;;  %v5561_v36 = vadd.f32 %v5560_v57, %v5448_v58  ;;  %v5450_v8 = vadd.f32 %v5449_v56, %v11870_v22  ;;  %v5566_v52 = vpop.f32.mrf.mxu1  ;;  %v8325_v19 = vpop.eup %8324  ;;  %8348 = vrcp.f32 %v6149_v3 }
 0x4db   :  { %v6150_v47 = vadd.f32 1.0, %v8323_v26  ;;  %v5453_v35 = vpop.f32.mrf.mxu0  ;;  %v8327_v41 = vpop.eup %8326  ;;  %6574 = vst [vmem:[%s12134_s10 + $0x2e8] sm:$0xff] %v8325_v19  ;;  %8350 = vpow2.f32 %v7190_v46 }
 0x4dc   :  { %v7197_v25 = vmul.f32 -1.442695, %v5561_v36  ;;  %v5563_v38 = vadd.f32 %v5562_v44, %v5450_v8  ;;  %v5454_v15 = vadd.f32 %v5453_v35, %v11863_v20  ;;  %v5568_v63 = vpop.f32.mrf.mxu1  ;;  %v8329_v16 = vpop.eup %8328  ;;  %v6156_v4 = vadd.f32 1.0, %v8327_v41 }
 0x4dd   :  { %8352 = vrcp.f32 %v6150_v47  ;;  %v5455_v45 = vpop.f32.mrf.mxu0  ;;  %v8331_v24 = vpop.eup %8330  ;;  %6575 = vst [vmem:[%s12134_s10 + $0x2f0] sm:$0xff] %v8329_v16 }
 0x4de   :  { %8354 = vpow2.f32 %v7191_v9  ;;  %v7198_v5 = vmul.f32 -1.442695, %v5563_v38  ;;  %v5567_v37 = vadd.f32 %v5566_v52, %v5454_v15  ;;  %v5456_v31 = vadd.f32 %v5455_v45, %v11870_v22  ;;  %v5570_v59 = vpop.f32.mrf.mxu1  ;;  %v8333_v28 = vpop.eup %8332 }
 0x4df   :  { %8356 = vrcp.f32 %v6156_v4  ;;  %v6157_v1 = vadd.f32 1.0, %v8331_v24  ;;  %v5457_v51 = vpop.f32.mrf.mxu0  ;;  %v8335_v14 = vpop.eup %8334  ;;  %6581 = vst [vmem:[%s12134_s10 + $0x320] sm:$0xff] %v8333_v28 }
 0x4e0   :  { %8358 = vpow2.f32 %v7197_v25  ;;  %v7204_v40 = vmul.f32 -1.442695, %v5567_v37  ;;  %v5569_v60 = vadd.f32 %v5568_v63, %v5456_v31  ;;  %v5458_v62 = vadd.f32 %v5457_v51, %v11863_v20  ;;  %v5572_v29 = vpop.f32.mrf.mxu1  ;;  %v8337_v43 = vpop.eup %8336 }
 0x4e1   :  { %8360 = vrcp.f32 %v6157_v1  ;;  %v6163_v39 = vadd.f32 1.0, %v8335_v14  ;;  %v5459_v23 = vpop.f32.mrf.mxu0  ;;  %v8339_v42 = vpop.eup %8338  ;;  %6582 = vst [vmem:[%s12134_s10 + $0x328] sm:$0xff] %v8337_v43 }
 0x4e2   :  { %8362 = vpow2.f32 %v7198_v5  ;;  %v7205_v11 = vmul.f32 -1.442695, %v5569_v60  ;;  %v5571_v27 = vadd.f32 %v5570_v59, %v5458_v62  ;;  %v5460_v50 = vadd.f32 %v5459_v23, %v11870_v22  ;;  %v5576_v54 = vpop.f32.mrf.mxu1  ;;  %v8341_v13 = vpop.eup %8340 }
 0x4e3   :  { %8364 = vrcp.f32 %v6163_v39  ;;  %v6164_v34 = vadd.f32 1.0, %v8339_v42  ;;  %v5463_v53 = vpop.f32.mrf.mxu0  ;;  %v8343_v32 = vpop.eup %8342  ;;  %6588 = vst [vmem:[%s12134_s10 + $0x358] sm:$0xff] %v8341_v13 }
 0x4e4   :  { %8366 = vpow2.f32 %v7204_v40  ;;  %v7211_v48 = vmul.f32 -1.442695, %v5571_v27  ;;  %v5573_v30 = vadd.f32 %v5572_v29, %v5460_v50  ;;  %v5464_v21 = vadd.f32 %v5463_v53, %v11863_v20  ;;  %v5578_v7 = vpop.f32.mrf.mxu1  ;;  %v8345_v18 = vpop.eup %8344 }
 0x4e5   :  { %8368 = vrcp.f32 %v6164_v34  ;;  %v6170_v61 = vadd.f32 1.0, %v8343_v32  ;;  %v5465_v10 = vpop.f32.mrf.mxu0  ;;  %v8347_v57 = vpop.eup %8346  ;;  %6589 = vst [vmem:[%s12134_s10 + $0x360] sm:$0xff] %v8345_v18 }
 0x4e6   :  { %8370 = vpow2.f32 %v7205_v11  ;;  %v7212_v0 = vmul.f32 -1.442695, %v5573_v30  ;;  %v5577_v55 = vadd.f32 %v5576_v54, %v5464_v21  ;;  %v5466_v6 = vadd.f32 %v5465_v10, %v11870_v22  ;;  %v5580_v49 = vpop.f32.mrf.mxu1 }
 0x4e7   :  { %8372 = vrcp.f32 %v6170_v61  ;;  %v6171_v2 = vadd.f32 1.0, %v8347_v57  ;;  %v5467_v58 = vpop.f32.mrf.mxu0  ;;  %v8349_v44 = vpop.eup %8348 }
 0x4e8   :  { %8374 = vpow2.f32 %v7211_v48  ;;  %v7218_v17 = vmul.f32 -1.442695, %v5577_v55  ;;  %v5579_v3 = vadd.f32 %v5578_v7, %v5466_v6  ;;  %v5468_v46 = vadd.f32 %v5467_v58, %v11863_v20  ;;  %v5582_v56 = vpop.f32.mrf.mxu1  ;;  %v8351_v26 = vpop.eup %8350  ;;  %6485 = vst [vmem:[%s12134_s10 + $0x20] sm:$0xff] %v8349_v44 }
 0x4e9   :  { %8376 = vrcp.f32 %v6171_v2  ;;  %v5469_v9 = vpop.f32.mrf.mxu0  ;;  %v6177_v8 = vadd.f32 1.0, %v8351_v26 }
 0x4ea   :  { %v8353_v36 = vpop.eup %8352  ;;  %8378 = vpow2.f32 %v7212_v0  ;;  %v7219_v52 = vmul.f32 -1.442695, %v5579_v3  ;;  %v5581_v19 = vadd.f32 %v5580_v49, %v5468_v46  ;;  %v5586_v47 = vpop.f32.mrf.mxu1  ;;  %v5470_v41 = vadd.f32 %v5469_v9, %v11870_v22 }
 0x4eb   :  { %v8355_v35 = vpop.eup %8354  ;;  %6486 = vst [vmem:[%s12134_s10 + $0x28] sm:$0xff] %v8353_v36  ;;  %8380 = vpow2.f32 %v7218_v17  ;;  %v5473_v25 = vpop.f32.mrf.mxu0 }
 0x4ec   :  { %v8357_v38 = vpop.eup %8356  ;;  %8382 = vrcp.f32 %v6177_v8  ;;  %v6178_v15 = vadd.f32 1.0, %v8355_v35  ;;  %v7225_v63 = vmul.f32 -1.442695, %v5581_v19  ;;  %v5474_v16 = vadd.f32 %v5473_v25, %v11863_v20  ;;  %v5588_v4 = vpop.f32.mrf.mxu1 }
 0x4ed   :  { %v8359_v45 = vpop.eup %8358  ;;  %6492 = vst [vmem:[%s12134_s10 + $0x58] sm:$0xff] %v8357_v38  ;;  %8384 = vpow2.f32 %v7219_v52  ;;  %v5583_v24 = vadd.f32 %v5582_v56, %v5470_v41  ;;  %v5475_v5 = vpop.f32.mrf.mxu0 }
 0x4ee   :  { %v8361_v37 = vpop.eup %8360  ;;  %8386 = vrcp.f32 %v6178_v15  ;;  %v6184_v31 = vadd.f32 1.0, %v8359_v45  ;;  %v5587_v59 = vadd.f32 %v5586_v47, %v5474_v16  ;;  %v5476_v28 = vadd.f32 %v5475_v5, %v11870_v22  ;;  %v5590_v1 = vpop.f32.mrf.mxu1 }
 0x4ef   :  { %v8363_v51 = vpop.eup %8362  ;;  %6493 = vst [vmem:[%s12134_s10 + $0x60] sm:$0xff] %v8361_v37  ;;  %8388 = vpow2.f32 %v7225_v63  ;;  %v7226_v14 = vmul.f32 -1.442695, %v5583_v24  ;;  %v5477_v40 = vpop.f32.mrf.mxu0 }
 0x4f0   :  { %v8365_v60 = vpop.eup %8364  ;;  %8390 = vrcp.f32 %v6184_v31  ;;  %v6185_v62 = vadd.f32 1.0, %v8363_v51  ;;  %v7232_v29 = vmul.f32 -1.442695, %v5587_v59  ;;  %v5589_v43 = vadd.f32 %v5588_v4, %v5476_v28  ;;  %v5592_v39 = vpop.f32.mrf.mxu1 }
 0x4f1   :  { %v8367_v23 = vpop.eup %8366  ;;  %6499 = vst [vmem:[%s12134_s10 + $0x90] sm:$0xff] %v8365_v60  ;;  %8392 = vpow2.f32 %v7226_v14  ;;  %v5478_v42 = vadd.f32 %v5477_v40, %v11863_v20  ;;  %v5479_v11 = vpop.f32.mrf.mxu0 }
 0x4f2   :  { %v8369_v27 = vpop.eup %8368  ;;  %8394 = vrcp.f32 %v6185_v62  ;;  %v6191_v50 = vadd.f32 1.0, %v8367_v23  ;;  %v7233_v54 = vmul.f32 -1.442695, %v5589_v43  ;;  %v5480_v13 = vadd.f32 %v5479_v11, %v11870_v22  ;;  %v5596_v34 = vpop.f32.mrf.mxu1 }
 0x4f3   :  { %v8371_v53 = vpop.eup %8370  ;;  %6500 = vst [vmem:[%s12134_s10 + $0x98] sm:$0xff] %v8369_v27  ;;  %8396 = vpow2.f32 %v7232_v29  ;;  %v5591_v32 = vadd.f32 %v5590_v1, %v5478_v42  ;;  %v5483_v48 = vpop.f32.mrf.mxu0  ;;  %v4004_v23 = vsub.s32 6, %v12197_v12 }
 0x4f4   :  { %v8373_v30 = vpop.eup %8372  ;;  %8398 = vrcp.f32 %v6191_v50  ;;  %v6192_v21 = vadd.f32 1.0, %v8371_v53  ;;  %v5593_v7 = vadd.f32 %v5592_v39, %v5480_v13  ;;  %v5484_v18 = vadd.f32 %v5483_v48, %v11863_v20  ;;  %v5598_v61 = vpop.f32.mrf.mxu1 }
 0x4f5   :  { %v8375_v10 = vpop.eup %8374  ;;  %6506 = vst [vmem:[%s12134_s10 + $0xc8] sm:$0xff] %v8373_v30  ;;  %8400 = vpow2.f32 %v7233_v54  ;;  %v7239_v57 = vmul.f32 -1.442695, %v5591_v32  ;;  %v5485_v0 = vpop.f32.mrf.mxu0 }
 0x4f6   :  { %v8377_v55 = vpop.eup %8376  ;;  %8402 = vrcp.f32 %v6192_v21  ;;  %v6198_v6 = vadd.f32 1.0, %v8375_v10  ;;  %v7240_v49 = vmul.f32 -1.442695, %v5593_v7  ;;  %v5597_v2 = vadd.f32 %v5596_v34, %v5484_v18  ;;  %v5600_v58 = vpop.f32.mrf.mxu1 }
 0x4f7   :  { %v8379_v44 = vpop.eup %8378  ;;  %6507 = vst [vmem:[%s12134_s10 + $0xd0] sm:$0xff] %v8377_v55  ;;  %8404 = vpow2.f32 %v7239_v57  ;;  %v5486_v17 = vadd.f32 %v5485_v0, %v11870_v22  ;;  %v5487_v3 = vpop.f32.mrf.mxu0  ;;  %v12002_v0 = vrot.slane %v11860_v33, %v4004_v23 }
 0x4f8   :  { %v8381_v46 = vpop.eup %8380  ;;  %8406 = vrcp.f32 %v6198_v6  ;;  %v6199_v56 = vadd.f32 1.0, %v8379_v44  ;;  %v7246_v26 = vmul.f32 -1.442695, %v5597_v2  ;;  %v5488_v9 = vadd.f32 %v5487_v3, %v11863_v20  ;;  %v5602_v36 = vpop.f32.mrf.mxu1 }
 0x4f9   :  { %v8383_v8 = vpop.eup %8382  ;;  %v6205_v52 = vadd.f32 1.0, %v8381_v46  ;;  %8408 = vpow2.f32 %v7240_v49  ;;  %v5599_v19 = vadd.f32 %v5598_v61, %v5486_v17  ;;  %v5489_v47 = vpop.f32.mrf.mxu0 }
 0x4fa   :  { %v8385_v35 = vpop.eup %8384  ;;  %6513 = vst [vmem:[%s12134_s10 + $0x100] sm:$0xff] %v8383_v8  ;;  %8410 = vrcp.f32 %v6199_v56  ;;  %v5601_v41 = vadd.f32 %v5600_v58, %v5488_v9  ;;  %v5490_v25 = vadd.f32 %v5489_v47, %v11870_v22  ;;  %v5606_v38 = vpop.f32.mrf.mxu1 }
 0x4fb   :  { %v8387_v15 = vpop.eup %8386  ;;  %8412 = vrcp.f32 %v6205_v52  ;;  %v6206_v63 = vadd.f32 1.0, %v8385_v35  ;;  %v7247_v16 = vmul.f32 -1.442695, %v5599_v19  ;;  %v5493_v4 = vpop.f32.mrf.mxu0 }
 0x4fc   :  { %v8389_v45 = vpop.eup %8388  ;;  %6514 = vst [vmem:[%s12134_s10 + $0x108] sm:$0xff] %v8387_v15  ;;  %8414 = vpow2.f32 %v7246_v26  ;;  %v7253_v24 = vmul.f32 -1.442695, %v5601_v41  ;;  %v5603_v5 = vadd.f32 %v5602_v36, %v5490_v25  ;;  %v5494_v37 = vadd.f32 %v5493_v4, %v11863_v20  ;;  %v5608_v31 = vpop.f32.mrf.mxu1 }
 0x4fd   :  { %v8391_v59 = vpop.eup %8390  ;;  %8416 = vrcp.f32 %v6206_v63  ;;  %v6212_v28 = vadd.f32 1.0, %v8389_v45  ;;  %v5495_v1 = vpop.f32.mrf.mxu0 }
 0x4fe   :  { %v8393_v51 = vpop.eup %8392  ;;  %6520 = vst [vmem:[%s12134_s10 + $0x138] sm:$0xff] %v8391_v59  ;;  %8418 = vpow2.f32 %v7247_v16  ;;  %v7254_v14 = vmul.f32 -1.442695, %v5603_v5  ;;  %v5607_v40 = vadd.f32 %v5606_v38, %v5494_v37  ;;  %v5496_v60 = vadd.f32 %v5495_v1, %v11870_v22  ;;  %v5610_v62 = vpop.f32.mrf.mxu1 }
 0x4ff   :  { %v8395_v29 = vpop.eup %8394  ;;  %8420 = vrcp.f32 %v6212_v28  ;;  %v6213_v43 = vadd.f32 1.0, %v8393_v51  ;;  %v5497_v39 = vpop.f32.mrf.mxu0 }
 0x500   :  { %v8397_v42 = vpop.eup %8396  ;;  %6521 = vst [vmem:[%s12134_s10 + $0x140] sm:$0xff] %v8395_v29  ;;  %8422 = vpow2.f32 %v7253_v24  ;;  %v7260_v11 = vmul.f32 -1.442695, %v5607_v40  ;;  %v5609_v27 = vadd.f32 %v5608_v31, %v5496_v60  ;;  %v5498_v50 = vadd.f32 %v5497_v39, %v11863_v20  ;;  %v5612_v54 = vpop.f32.mrf.mxu1 }
 0x501   :  { %v8399_v13 = vpop.eup %8398  ;;  %8424 = vrcp.f32 %v6213_v43  ;;  %v6219_v34 = vadd.f32 1.0, %v8397_v42  ;;  %v5499_v53 = vpop.f32.mrf.mxu0 }
 0x502   :  { %v8401_v32 = vpop.eup %8400  ;;  %6527 = vst [vmem:[%s12134_s10 + $0x170] sm:$0xff] %v8399_v13  ;;  %8426 = vpow2.f32 %v7254_v14  ;;  %v7261_v12 = vmul.f32 -1.442695, %v5609_v27  ;;  %v5611_v48 = vadd.f32 %v5610_v62, %v5498_v50  ;;  %v5500_v30 = vadd.f32 %v5499_v53, %v11870_v22  ;;  %v5746_v21 = vpop.f32.mrf.mxu1 }
 0x503   :  { %v8403_v7 = vpop.eup %8402  ;;  %8428 = vrcp.f32 %v6219_v34  ;;  %v6220_v18 = vadd.f32 1.0, %v8401_v32  ;;  %v7286_v20 = vpop.f32.mrf.mxu0 }
 0x504   :  { %v8405_v61 = vpop.eup %8404  ;;  %6528 = vst [vmem:[%s12134_s10 + $0x178] sm:$0xff] %v8403_v7  ;;  %8430 = vpow2.f32 %v7260_v11  ;;  %v7267_v10 = vmul.f32 -1.442695, %v5611_v48  ;;  %v5613_v57 = vadd.f32 %v5612_v54, %v5500_v30  ;;  %v5748_v55 = vpop.f32.mrf.mxu1 }
 0x505   :  { %v8407_v6 = vpop.eup %8406  ;;  %8432 = vrcp.f32 %v6220_v18  ;;  %v6226_v22 = vadd.f32 1.0, %v8405_v61  ;;  %v7287_v49 = vpop.f32.mrf.mxu0 }
 0x506   :  { %v8409_v2 = vpop.eup %8408  ;;  %6534 = vst [vmem:[%s12134_s10 + $0x1a8] sm:$0xff] %v8407_v6  ;;  %8434 = vpow2.f32 %v7261_v12  ;;  %v7268_v58 = vmul.f32 -1.442695, %v5613_v57  ;;  %v7288_v44 = vadd.f32 %v7287_v49, %v7286_v20  ;;  %v5749_v17 = vpop.f32.mrf.mxu1 }
 0x507   :  { %v8411_v3 = vpop.eup %8410  ;;  %8436 = vrcp.f32 %v6226_v22  ;;  %v6227_v46 = vadd.f32 1.0, %v8409_v2  ;;  %v7289_v56 = vpop.f32.mrf.mxu0 }
 0x508   :  { %v8413_v33 = vpop.eup %8412  ;;  %6535 = vst [vmem:[%s12134_s10 + $0x1b0] sm:$0xff] %v8411_v3  ;;  %8438 = vpow2.f32 %v7267_v10  ;;  %v5650_v26 = vadd.f32 %v7288_v44, %v12002_v0  ;;  %v5751_v9 = vpop.f32.mrf.mxu1 }
 0x509   :  { %v8415_v36 = vpop.eup %8414  ;;  %6541 = vst [vmem:[%s12134_s10 + $0x1e0] sm:$0xff] %v8413_v33  ;;  %8440 = vrcp.f32 %v6227_v46  ;;  %v7290_v8 = vpop.f32.mrf.mxu0 }
 0x50a   :  { %v8417_v52 = vpop.eup %8416  ;;  %v6233_v19 = vadd.f32 1.0, %v8415_v36  ;;  %8442 = vpow2.f32 %v7268_v58  ;;  %v5747_v47 = vadd.f32 %v5746_v21, %v5650_v26  ;;  %v7291_v35 = vadd.f32 %v7290_v8, %v7289_v56  ;;  %v5754_v41 = vpop.f32.mrf.mxu1 }
 0x50b   :  { %v8419_v25 = vpop.eup %8418  ;;  %6542 = vst [vmem:[%s12134_s10 + $0x1e8] sm:$0xff] %v8417_v52  ;;  %v7292_v38 = vpop.f32.mrf.mxu0 }
 0x50c   :  { %v8421_v15 = vpop.eup %8420  ;;  %8444 = vrcp.f32 %v6233_v19  ;;  %v6234_v63 = vadd.f32 1.0, %v8419_v25  ;;  %v7164_v16 = vmul.f32 -1.442695, %v5747_v47  ;;  %v5653_v4 = vadd.f32 %v7291_v35, %v12002_v0  ;;  %v5756_v45 = vpop.f32.mrf.mxu1 }
 0x50d   :  { %v8423_v24 = vpop.eup %8422  ;;  %6548 = vst [vmem:[%s12134_s10 + $0x218] sm:$0xff] %v8421_v15  ;;  %v7293_v5 = vpop.f32.mrf.mxu0 }
 0x50e   :  { %v8425_v37 = vpop.eup %8424  ;;  %8446 = vrcp.f32 %v6234_v63  ;;  %v6240_v31 = vadd.f32 1.0, %v8423_v24  ;;  %v5750_v59 = vadd.f32 %v5749_v17, %v5653_v4  ;;  %v7294_v28 = vadd.f32 %v7293_v5, %v7292_v38  ;;  %v5757_v1 = vpop.f32.mrf.mxu1 }
 0x50f   :  { %v8427_v51 = vpop.eup %8426  ;;  %6549 = vst [vmem:[%s12134_s10 + $0x220] sm:$0xff] %v8425_v37  ;;  %8448 = vpow2.f32 %v7164_v16  ;;  %v7295_v14 = vpop.f32.mrf.mxu0 }
 0x510   :  { %v8429_v40 = vpop.eup %8428  ;;  %8450 = vrcp.f32 %v6240_v31  ;;  %v6241_v60 = vadd.f32 1.0, %v8427_v51  ;;  %v7171_v62 = vmul.f32 -1.442695, %v5750_v59  ;;  %v5658_v29 = vadd.f32 %v7294_v28, %v12002_v0  ;;  %v5759_v43 = vpop.f32.mrf.mxu1 }
 0x511   :  { %v8431_v39 = vpop.eup %8430  ;;  %6555 = vst [vmem:[%s12134_s10 + $0x250] sm:$0xff] %v8429_v40  ;;  %v7296_v23 = vpop.f32.mrf.mxu0 }
 0x512   :  { %v8433_v42 = vpop.eup %8432  ;;  %8452 = vrcp.f32 %v6241_v60  ;;  %v6247_v11 = vadd.f32 1.0, %v8431_v39  ;;  %v5755_v27 = vadd.f32 %v5754_v41, %v5658_v29  ;;  %v7297_v50 = vadd.f32 %v7296_v23, %v7295_v14  ;;  %v5762_v54 = vpop.f32.mrf.mxu1 }
 0x513   :  { %v8435_v13 = vpop.eup %8434  ;;  %6556 = vst [vmem:[%s12134_s10 + $0x258] sm:$0xff] %v8433_v42  ;;  %8454 = vpow2.f32 %v7171_v62  ;;  %v7298_v34 = vpop.f32.mrf.mxu0 }
 0x514   :  { %v8437_v53 = vpop.eup %8436  ;;  %8456 = vrcp.f32 %v6247_v11  ;;  %v6248_v32 = vadd.f32 1.0, %v8435_v13  ;;  %v7178_v12 = vmul.f32 -1.442695, %v5755_v27  ;;  %v5661_v48 = vadd.f32 %v7297_v50, %v12002_v0  ;;  %v5764_v30 = vpop.f32.mrf.mxu1 }
 0x515   :  { %v8439_v21 = vpop.eup %8438  ;;  %6562 = vst [vmem:[%s12134_s10 + $0x288] sm:$0xff] %v8437_v53  ;;  %v7299_v7 = vpop.f32.mrf.mxu0 }
 0x516   :  { %v8441_v18 = vpop.eup %8440  ;;  %8458 = vrcp.f32 %v6248_v32  ;;  %v6254_v20 = vadd.f32 1.0, %v8439_v21  ;;  %v5758_v61 = vadd.f32 %v5757_v1, %v5661_v48  ;;  %v7300_v10 = vadd.f32 %v7299_v7, %v7298_v34  ;;  %v5765_v57 = vpop.f32.mrf.mxu1 }
 0x517   :  { %v8443_v55 = vpop.eup %8442  ;;  %6563 = vst [vmem:[%s12134_s10 + $0x290] sm:$0xff] %v8441_v18  ;;  %8460 = vpow2.f32 %v7178_v12  ;;  %v7301_v6 = vpop.f32.mrf.mxu0 }
 0x518   :  { %8462 = vrcp.f32 %v6254_v20  ;;  %v6255_v22 = vadd.f32 1.0, %v8443_v55  ;;  %v7185_v49 = vmul.f32 -1.442695, %v5758_v61  ;;  %v5666_v2 = vadd.f32 %v7300_v10, %v12002_v0  ;;  %v5767_v58 = vpop.f32.mrf.mxu1 }
 0x519   :  { %v8445_v44 = vpop.eup %8444  ;;  %v7302_v17 = vpop.f32.mrf.mxu0 }
 0x51a   :  { %6569 = vst [vmem:[%s12134_s10 + $0x2c0] sm:$0xff] %v8445_v44  ;;  %8464 = vrcp.f32 %v6255_v22  ;;  %v5763_v3 = vadd.f32 %v5762_v54, %v5666_v2  ;;  %v7303_v46 = vadd.f32 %v7302_v17, %v7301_v6  ;;  %v5770_v56 = vpop.f32.mrf.mxu1 }
 0x51b   :  { %v8447_v33 = vpop.eup %8446  ;;  %8466 = vpow2.f32 %v7185_v49  ;;  %v7304_v26 = vpop.f32.mrf.mxu0 }
 0x51c   :  { %v8449_v9 = vpop.eup %8448  ;;  %6570 = vst [vmem:[%s12134_s10 + $0x2c8] sm:$0xff] %v8447_v33  ;;  %v7192_v36 = vmul.f32 -1.442695, %v5763_v3  ;;  %v5669_v8 = vadd.f32 %v7303_v46, %v12002_v0  ;;  %v5772_v52 = vpop.f32.mrf.mxu1 }
 0x51d   :  { %v8451_v19 = vpop.eup %8450  ;;  %v6151_v47 = vadd.f32 1.0, %v8449_v9  ;;  %v7305_v35 = vpop.f32.mrf.mxu0 }
 0x51e   :  { %6576 = vst [vmem:[%s12134_s10 + $0x2f8] sm:$0xff] %v8451_v19  ;;  %8468 = vpow2.f32 %v7192_v36  ;;  %v5766_v41 = vadd.f32 %v5765_v57, %v5669_v8  ;;  %v7306_v25 = vadd.f32 %v7305_v35, %v7304_v26  ;;  %v5773_v38 = vpop.f32.mrf.mxu1 }
 0x51f   :  { %v8453_v15 = vpop.eup %8452  ;;  %8470 = vrcp.f32 %v6151_v47  ;;  %v7307_v63 = vpop.f32.mrf.mxu0 }
 0x520   :  { %v8455_v16 = vpop.eup %8454  ;;  %6577 = vst [vmem:[%s12134_s10 + $0x300] sm:$0xff] %v8453_v15  ;;  %v7199_v4 = vmul.f32 -1.442695, %v5766_v41  ;;  %v5674_v45 = vadd.f32 %v7306_v25, %v12002_v0  ;;  %v5775_v24 = vpop.f32.mrf.mxu1 }
 0x521   :  { %v8457_v5 = vpop.eup %8456  ;;  %v6158_v37 = vadd.f32 1.0, %v8455_v16  ;;  %v7308_v31 = vpop.f32.mrf.mxu0 }
 0x522   :  { %6583 = vst [vmem:[%s12134_s10 + $0x330] sm:$0xff] %v8457_v5  ;;  %8472 = vpow2.f32 %v7199_v4  ;;  %v5771_v59 = vadd.f32 %v5770_v56, %v5674_v45  ;;  %v7309_v28 = vadd.f32 %v7308_v31, %v7307_v63  ;;  %v5778_v1 = vpop.f32.mrf.mxu1 }
 0x523   :  { %v8459_v51 = vpop.eup %8458  ;;  %8474 = vrcp.f32 %v6158_v37  ;;  %v7310_v14 = vpop.f32.mrf.mxu0 }
 0x524   :  { %v8461_v40 = vpop.eup %8460  ;;  %6584 = vst [vmem:[%s12134_s10 + $0x338] sm:$0xff] %v8459_v51  ;;  %v7206_v60 = vmul.f32 -1.442695, %v5771_v59  ;;  %v5677_v62 = vadd.f32 %v7309_v28, %v12002_v0  ;;  %v5780_v29 = vpop.f32.mrf.mxu1 }
 0x525   :  { %v8463_v43 = vpop.eup %8462  ;;  %v6165_v39 = vadd.f32 1.0, %v8461_v40  ;;  %v7311_v23 = vpop.f32.mrf.mxu0 }
 0x526   :  { %6590 = vst [vmem:[%s12134_s10 + $0x368] sm:$0xff] %v8463_v43  ;;  %8476 = vpow2.f32 %v7206_v60  ;;  %v5774_v42 = vadd.f32 %v5773_v38, %v5677_v62  ;;  %v7312_v11 = vadd.f32 %v7311_v23, %v7310_v14  ;;  %v5781_v27 = vpop.f32.mrf.mxu1 }
 0x527   :  { %v8465_v50 = vpop.eup %8464  ;;  %8478 = vrcp.f32 %v6165_v39  ;;  %v7313_v54 = vpop.f32.mrf.mxu0 }
 0x528   :  { %v8467_v13 = vpop.eup %8466  ;;  %6591 = vst [vmem:[%s12134_s10 + $0x370] sm:$0xff] %v8465_v50  ;;  %v7213_v34 = vmul.f32 -1.442695, %v5774_v42  ;;  %v5682_v53 = vadd.f32 %v7312_v11, %v12002_v0  ;;  %v5783_v32 = vpop.f32.mrf.mxu1 }
 0x529   :  { %v6172_v12 = vadd.f32 1.0, %v8467_v13  ;;  %v7314_v48 = vpop.f32.mrf.mxu0 }
 0x52a   :  { %8480 = vpow2.f32 %v7213_v34  ;;  %v5779_v30 = vadd.f32 %v5778_v1, %v5682_v53  ;;  %v7315_v21 = vadd.f32 %v7314_v48, %v7313_v54  ;;  %v5786_v7 = vpop.f32.mrf.mxu1 }
 0x52b   :  { %v8469_v18 = vpop.eup %8468  ;;  %8482 = vrcp.f32 %v6172_v12  ;;  %v7316_v20 = vpop.f32.mrf.mxu0 }
 0x52c   :  { %v8471_v61 = vpop.eup %8470  ;;  %v6179_v10 = vadd.f32 1.0, %v8469_v18  ;;  %v7220_v57 = vmul.f32 -1.442695, %v5779_v30  ;;  %v5685_v55 = vadd.f32 %v7315_v21, %v12002_v0  ;;  %v5788_v6 = vpop.f32.mrf.mxu1 }
 0x52d   :  { %6487 = vst [vmem:[%s12134_s10 + $0x30] sm:$0xff] %v8471_v61  ;;  %v7317_v22 = vpop.f32.mrf.mxu0 }
 0x52e   :  { %8484 = vrcp.f32 %v6179_v10  ;;  %v5782_v49 = vadd.f32 %v5781_v27, %v5685_v55  ;;  %v7318_v2 = vadd.f32 %v7317_v22, %v7316_v20  ;;  %v5789_v58 = vpop.f32.mrf.mxu1 }
 0x52f   :  { %v8473_v44 = vpop.eup %8472  ;;  %8486 = vpow2.f32 %v7220_v57  ;;  %v7319_v17 = vpop.f32.mrf.mxu0 }
 0x530   :  { %v8475_v3 = vpop.eup %8474  ;;  %v6186_v46 = vadd.f32 1.0, %v8473_v44  ;;  %v7227_v56 = vmul.f32 -1.442695, %v5782_v49  ;;  %v5690_v33 = vadd.f32 %v7318_v2, %v12002_v0  ;;  %v5791_v26 = vpop.f32.mrf.mxu1 }
 0x531   :  { %6494 = vst [vmem:[%s12134_s10 + $0x68] sm:$0xff] %v8475_v3  ;;  %v7320_v9 = vpop.f32.mrf.mxu0 }
 0x532   :  { %8488 = vrcp.f32 %v6186_v46  ;;  %v5787_v36 = vadd.f32 %v5786_v7, %v5690_v33  ;;  %v7321_v8 = vadd.f32 %v7320_v9, %v7319_v17  ;;  %v5794_v52 = vpop.f32.mrf.mxu1 }
 0x533   :  { %v8477_v19 = vpop.eup %8476  ;;  %8490 = vpow2.f32 %v7227_v56  ;;  %v7322_v47 = vpop.f32.mrf.mxu0 }
 0x534   :  { %v8479_v35 = vpop.eup %8478  ;;  %v6193_v41 = vadd.f32 1.0, %v8477_v19  ;;  %v7234_v25 = vmul.f32 -1.442695, %v5787_v36  ;;  %v5693_v38 = vadd.f32 %v7321_v8, %v12002_v0  ;;  %v5796_v15 = vpop.f32.mrf.mxu1 }
 0x535   :  { %6501 = vst [vmem:[%s12134_s10 + $0xa0] sm:$0xff] %v8479_v35  ;;  %v7323_v63 = vpop.f32.mrf.mxu0 }
 0x536   :  { %8492 = vrcp.f32 %v6193_v41  ;;  %v5790_v16 = vadd.f32 %v5789_v58, %v5693_v38  ;;  %v7324_v4 = vadd.f32 %v7323_v63, %v7322_v47  ;;  %v5797_v45 = vpop.f32.mrf.mxu1 }
 0x537   :  { %v8481_v24 = vpop.eup %8480  ;;  %8494 = vpow2.f32 %v7234_v25  ;;  %v7325_v5 = vpop.f32.mrf.mxu0 }
 0x538   :  { %v8483_v37 = vpop.eup %8482  ;;  %v6200_v31 = vadd.f32 1.0, %v8481_v24  ;;  %v7241_v59 = vmul.f32 -1.442695, %v5790_v16  ;;  %v5698_v28 = vadd.f32 %v7324_v4, %v12002_v0  ;;  %v5799_v1 = vpop.f32.mrf.mxu1 }
 0x539   :  { %6508 = vst [vmem:[%s12134_s10 + $0xd8] sm:$0xff] %v8483_v37  ;;  %v7326_v51 = vpop.f32.mrf.mxu0 }
 0x53a   :  { %8496 = vrcp.f32 %v6200_v31  ;;  %v5795_v14 = vadd.f32 %v5794_v52, %v5698_v28  ;;  %v7327_v40 = vadd.f32 %v7326_v51, %v7325_v5  ;;  %v5802_v60 = vpop.f32.mrf.mxu1 }
 0x53b   :  { %v8485_v62 = vpop.eup %8484  ;;  %8498 = vpow2.f32 %v7241_v59  ;;  %v7328_v29 = vpop.f32.mrf.mxu0 }
 0x53c   :  { %v8487_v43 = vpop.eup %8486  ;;  %6515 = vst [vmem:[%s12134_s10 + $0x110] sm:$0xff] %v8485_v62  ;;  %v7248_v39 = vmul.f32 -1.442695, %v5795_v14  ;;  %v5701_v23 = vadd.f32 %v7327_v40, %v12002_v0  ;;  %v5804_v42 = vpop.f32.mrf.mxu1 }
 0x53d   :  { %v6207_v11 = vadd.f32 1.0, %v8487_v43  ;;  %v7329_v27 = vpop.f32.mrf.mxu0 }
 0x53e   :  { %8500 = vpow2.f32 %v7248_v39  ;;  %v5798_v50 = vadd.f32 %v5797_v45, %v5701_v23  ;;  %v7330_v54 = vadd.f32 %v7329_v27, %v7328_v29  ;;  %v5805_v13 = vpop.f32.mrf.mxu1 }
 0x53f   :  { %v8489_v34 = vpop.eup %8488  ;;  %8502 = vrcp.f32 %v6207_v11  ;;  %v7331_v53 = vpop.f32.mrf.mxu0 }
 0x540   :  { %v8491_v32 = vpop.eup %8490  ;;  %6522 = vst [vmem:[%s12134_s10 + $0x148] sm:$0xff] %v8489_v34  ;;  %v7255_v12 = vmul.f32 -1.442695, %v5798_v50  ;;  %v5706_v48 = vadd.f32 %v7330_v54, %v12002_v0  ;;  %v5807_v30 = vpop.f32.mrf.mxu1 }
 0x541   :  { %v6214_v21 = vadd.f32 1.0, %v8491_v32  ;;  %v7332_v7 = vpop.f32.mrf.mxu0 }
 0x542   :  { %8504 = vpow2.f32 %v7255_v12  ;;  %v5803_v18 = vadd.f32 %v5802_v60, %v5706_v48  ;;  %v7333_v20 = vadd.f32 %v7332_v7, %v7331_v53 }
 0x543   :  { %v8493_v61 = vpop.eup %8492  ;;  %8506 = vrcp.f32 %v6214_v21 }
 0x544   :  { %v8495_v10 = vpop.eup %8494  ;;  %6529 = vst [vmem:[%s12134_s10 + $0x180] sm:$0xff] %v8493_v61  ;;  %v7262_v57 = vmul.f32 -1.442695, %v5803_v18  ;;  %v5709_v55 = vadd.f32 %v7333_v20, %v12002_v0 }
 0x545   :  { %v6221_v6 = vadd.f32 1.0, %v8495_v10 }
 0x546   :  { %8508 = vpow2.f32 %v7262_v57  ;;  %v5806_v22 = vadd.f32 %v5805_v13, %v5709_v55 }
 0x547   :  { %v8497_v49 = vpop.eup %8496  ;;  %8510 = vrcp.f32 %v6221_v6 }
 0x548   :  { %v8499_v2 = vpop.eup %8498  ;;  %6536 = vst [vmem:[%s12134_s10 + $0x1b8] sm:$0xff] %v8497_v49  ;;  %v7269_v58 = vmul.f32 -1.442695, %v5806_v22 }
 0x549   :  { %v6228_v44 = vadd.f32 1.0, %v8499_v2 }
 0x54a   :  { %8512 = vpow2.f32 %v7269_v58 }
 0x54b   :  { %v8501_v17 = vpop.eup %8500  ;;  %8514 = vrcp.f32 %v6228_v44 }
 0x54c   :  { %v8503_v3 = vpop.eup %8502  ;;  %v6235_v46 = vadd.f32 1.0, %v8501_v17 }
 0x54d   :  { %6543 = vst [vmem:[%s12134_s10 + $0x1f0] sm:$0xff] %v8503_v3 }
 0x54e   :  { %8516 = vrcp.f32 %v6235_v46 }
 0x54f   :  { %v8505_v0 = vpop.eup %8504 }
 0x550   :  { %v8507_v56 = vpop.eup %8506  ;;  %v6242_v33 = vadd.f32 1.0, %v8505_v0 }
 0x551   :  { %6550 = vst [vmem:[%s12134_s10 + $0x228] sm:$0xff] %v8507_v56 }
 0x552   :  { %8518 = vrcp.f32 %v6242_v33 }
 0x553   :  { %v8509_v26 = vpop.eup %8508 }
 0x554   :  { %v8511_v9 = vpop.eup %8510  ;;  %v6249_v36 = vadd.f32 1.0, %v8509_v26 }
 0x555   :  { %6557 = vst [vmem:[%s12134_s10 + $0x260] sm:$0xff] %v8511_v9 }
 0x556   :  { %8520 = vrcp.f32 %v6249_v36 }
 0x557   :  { %v8513_v8 = vpop.eup %8512 }
 0x558   :  { %v8515_v52 = vpop.eup %8514  ;;  %v6256_v19 = vadd.f32 1.0, %v8513_v8 }
 0x559   :  { %6564 = vst [vmem:[%s12134_s10 + $0x298] sm:$0xff] %v8515_v52 }
 0x55a   :  { %8522 = vrcp.f32 %v6256_v19 }
 0x55b   :  { %v8517_v47 = vpop.eup %8516 }
 0x55c   :  { %6571 = vst [vmem:[%s12134_s10 + $0x2d0] sm:$0xff] %v8517_v47 }
 0x55f   :  { %v8519_v35 = vpop.eup %8518 }
 0x560   :  { %6578 = vst [vmem:[%s12134_s10 + $0x308] sm:$0xff] %v8519_v35 }
 0x563   :  { %v8521_v41 = vpop.eup %8520 }
 0x564   :  { %6585 = vst [vmem:[%s12134_s10 + $0x340] sm:$0xff] %v8521_v41 }
 0x567   :  { %v8523_v25 = vpop.eup %8522 }
 0x568   :  { %6592 = vst [vmem:[%s12134_s10 + $0x378] sm:$0xff] %v8523_v25 }

</bundles_post_ra>
